<compile_context>
chip_gen: v7x
topology: tpu7x:2x2x1
jax: 0.10.0
libtpu: 0.0.40
codegen_flags: <defaults>
</compile_context>

<pallas_src>
import jax
import jax.numpy as jnp
from jax.experimental import pallas as pl
from jax.experimental.pallas import tpu as pltpu

N_ITERS = 12
HIDDEN = 50
LANE = 128


def _round_up(x, m):
    return (x + m - 1) // m * m


def admm_kernel(pty_ref, invs_ref,
                w1_ref, b1_ref, w2_ref, b2_ref, w3_ref, b3_ref,
                w4_ref, b4_ref, w5_ref, b5_ref,
                v_out_ref):
    tb = pty_ref.shape[0]

    pty = pty_ref[...]                                    # (TILE_B, Nx_pad)

    # Hoist weight loads and pre-broadcast biases ONCE (loop below is unrolled and JAX
    # does not CSE broadcast_in_dim, so this avoids 12x5 broadcasts).
    w1 = w1_ref[...]; w2 = w2_ref[...]; w3 = w3_ref[...]
    w4 = w4_ref[...]; w5 = w5_ref[...]
    b1 = jnp.broadcast_to(b1_ref[...], (tb, b1_ref.shape[1]))
    b2 = jnp.broadcast_to(b2_ref[...], (tb, b2_ref.shape[1]))
    b3 = jnp.broadcast_to(b3_ref[...], (tb, b3_ref.shape[1]))
    b4 = jnp.broadcast_to(b4_ref[...], (tb, b4_ref.shape[1]))
    b5 = jnp.broadcast_to(b5_ref[...], (tb, b5_ref.shape[1]))

    def mlp(z):
        # MyModel: Nx -> 50 -> 50 -> 50 -> 50 -> Nx, ReLU on first four layers.
        h = jnp.maximum(jnp.dot(z, w1, preferred_element_type=jnp.float32) + b1, 0.0)
        h = jnp.maximum(jnp.dot(h, w2, preferred_element_type=jnp.float32) + b2, 0.0)
        h = jnp.maximum(jnp.dot(h, w3, preferred_element_type=jnp.float32) + b3, 0.0)
        h = jnp.maximum(jnp.dot(h, w4, preferred_element_type=jnp.float32) + b4, 0.0)
        return jnp.dot(h, w5, preferred_element_type=jnp.float32) + b5

    v = pty                                               # v = PhiT @ y
    u = jnp.zeros_like(v)                                 # u = zeros_like(v)
    for i in range(N_ITERS):                              # fully unrolled, static indices
        inv_t = invs_ref[i]                               # ((PhiT_Phi + g_i I)^-1)^T, (Nx_pad, Nx_pad)
        x = jnp.dot(pty + v + u, inv_t, preferred_element_type=jnp.float32)
        v = mlp(x - u)
        u = u - (x - v)
    v_out_ref[...] = v


def init_params(key, channel=26):
    """Deterministic init mimicking torch.nn.Linear defaults (U[-1/sqrt(in), 1/sqrt(in)]).
    Weights stored pre-transposed as (in, out) so every step is row-vec @ W (MXU friendly)."""
    dims = [(channel, HIDDEN), (HIDDEN, HIDDEN), (HIDDEN, HIDDEN),
            (HIDDEN, HIDDEN), (HIDDEN, channel)]
    params = {}
    for idx, (din, dout) in enumerate(dims, start=1):
        key, kw, kb = jax.random.split(key, 3)
        bound = 1.0 / (float(din) ** 0.5)
        params[f"w{idx}t"] = jax.random.uniform(kw, (din, dout), jnp.float32, -bound, bound)
        params[f"b{idx}"] = jax.random.uniform(kb, (1, dout), jnp.float32, -bound, bound)
    params["gamma"] = jnp.full((N_ITERS,), 10.0, dtype=jnp.float32)
    return params


def admm_net_forward(imgs, Phi, params, tile_b=256):
    B, Nx, _ = imgs.shape
    imgs_flat = imgs.reshape(B, Nx).astype(jnp.float32)
    Phi = Phi.astype(jnp.float32)

    # ---------------- wrapper-side glue ----------------
    PhiT_Phi = Phi.T @ Phi                                            # (Nx, Nx)
    I = jnp.eye(Nx, dtype=jnp.float32)
    gamma = params["gamma"]
    # TODO(synk): torch.inverse has no Pallas equivalent; computed here with jnp.linalg.inv.
    invs = jnp.linalg.inv(PhiT_Phi[None, :, :] + gamma[:, None, None] * I[None, :, :])
    invs_t = jnp.swapaxes(invs, 1, 2)                                 # (12, Nx, Nx), transposed for row-vec form

    # TODO(synk): NoiseLayer is not defined in the reference source; identity pass-through,
    # so PhiT @ noise(Phi @ imgs) == PhiT_Phi @ imgs, which is loop-invariant -> precompute here.
    pty = imgs_flat @ PhiT_Phi                                        # (B, Nx)  (PhiT_Phi symmetric)

    # ------ pad channel axis to a full 128-lane tile, batch to a sublane-aligned tile ------
    nx_pad = _round_up(Nx, LANE)
    tb = min(tile_b, _round_up(B, 8))
    b_pad = _round_up(B, tb)

    pty_p = jnp.zeros((b_pad, nx_pad), jnp.float32).at[:B, :Nx].set(pty)
    invs_p = jnp.zeros((N_ITERS, nx_pad, nx_pad), jnp.float32).at[:, :Nx, :Nx].set(invs_t)
    w1_p = jnp.zeros((nx_pad, HIDDEN), jnp.float32).at[:Nx, :].set(params["w1t"])
    w5_p = jnp.zeros((HIDDEN, nx_pad), jnp.float32).at[:, :Nx].set(params["w5t"])
    b5_p = jnp.zeros((1, nx_pad), jnp.float32).at[:, :Nx].set(params["b5"])

    inputs = [pty_p, invs_p,
              w1_p, params["b1"],
              params["w2t"], params["b2"],
              params["w3t"], params["b3"],
              params["w4t"], params["b4"],
              w5_p, b5_p]

    def const_spec(arr):
        nd = arr.ndim
        return pl.BlockSpec(arr.shape, lambda i, _nd=nd: (0,) * _nd)

    in_specs = ([pl.BlockSpec((tb, nx_pad), lambda i: (i, 0))]
                + [const_spec(a) for a in inputs[1:]])

    v = pl.pallas_call(
        admm_kernel,
        out_shape=jax.ShapeDtypeStruct((b_pad, nx_pad), jnp.float32),
        grid=(b_pad // tb,),
        in_specs=in_specs,
        out_specs=pl.BlockSpec((tb, nx_pad), lambda i: (i, 0)),
        compiler_params=pltpu.CompilerParams(
            dimension_semantics=("parallel",)),
    )(*inputs)

    # PyTorch returns v with shape (batch, channel, 1)
    return v[:B, :Nx].reshape(B, Nx, 1)


def admm_net_reference(imgs, Phi, params):
    """Pure-JAX replica of the PyTorch forward (NoiseLayer = identity)."""
    B, Nx, _ = imgs.shape
    Phi = Phi.astype(jnp.float32)
    PhiT = Phi.T
    PhiT_Phi = PhiT @ Phi
    clear_y = jnp.einsum("mn,bnk->bmk", Phi, imgs.astype(jnp.float32))
    y = clear_y
    v = jnp.einsum("nm,bmk->bnk", PhiT, y)
    u = jnp.zeros_like(v)
    pty = v
    I = jnp.eye(Nx, dtype=jnp.float32)

    def mlp(x3):
        z = x3[..., 0]
        z = jax.nn.relu(z @ params["w1t"] + params["b1"])
        z = jax.nn.relu(z @ params["w2t"] + params["b2"])
        z = jax.nn.relu(z @ params["w3t"] + params["b3"])
        z = jax.nn.relu(z @ params["w4t"] + params["b4"])
        z = z @ params["w5t"] + params["b5"]
        return z[..., None]

    for i in range(N_ITERS):
        qiu_ni = jnp.linalg.inv(PhiT_Phi + params["gamma"][i] * I)
        x = jnp.einsum("nm,bmk->bnk", qiu_ni, pty + v + u)
        v = mlp(x - u)
        u = u - (x - v)
    return v


if __name__ == "__main__":
    channel = 26        # Nx (default of ADMM_net)
    M = 10              # number of measurement rows in Phi
    batch = 2

    key = jax.random.PRNGKey(0)
    k_params, k_imgs, k_phi = jax.random.split(key, 3)

    params = init_params(k_params, channel=channel)
    imgs = jax.random.normal(k_imgs, (batch, channel, 1), dtype=jnp.float32)
    Phi = jax.random.normal(k_phi, (M, channel), dtype=jnp.float32)

    out = admm_net_forward(imgs, Phi, params)
    jax.block_until_ready(out)
    assert out.shape == (batch, channel, 1)

    ref = admm_net_reference(imgs, Phi, params)
    assert jnp.allclose(out, ref, atol=1e-2, rtol=1e-2), float(jnp.max(jnp.abs(out - ref)))

    print("KERNEL_OK")
</pallas_src>

<mosaic_0001>
module attributes {stable_mosaic.version = 11 : i64} {
  func.func @admm_kernel(%arg0: i32, %arg1: memref<8x128xf32, #tpu.memory_space<vmem>>, %arg2: memref<12x128x128xf32, #tpu.memory_space<vmem>>, %arg3: memref<128x50xf32, #tpu.memory_space<vmem>>, %arg4: memref<1x50xf32, #tpu.memory_space<vmem>>, %arg5: memref<50x50xf32, #tpu.memory_space<vmem>>, %arg6: memref<1x50xf32, #tpu.memory_space<vmem>>, %arg7: memref<50x50xf32, #tpu.memory_space<vmem>>, %arg8: memref<1x50xf32, #tpu.memory_space<vmem>>, %arg9: memref<50x50xf32, #tpu.memory_space<vmem>>, %arg10: memref<1x50xf32, #tpu.memory_space<vmem>>, %arg11: memref<50x128xf32, #tpu.memory_space<vmem>>, %arg12: memref<1x128xf32, #tpu.memory_space<vmem>>, %arg13: memref<8x128xf32, #tpu.memory_space<vmem>>) attributes {dimension_semantics = [#tpu.dimension_semantics<parallel>], iteration_bounds = array<i64: 1>, scalar_prefetch = 0 : i64, scratch_operands = 0 : i64, tpu.core_type = #tpu.core_type<tc>, window_params = [{transform_indices = @transform_0, window_bounds = array<i64: 8, 128>}, {pipeline_mode = #tpu.pipeline_mode<synchronous>, transform_indices = @transform_1, window_bounds = array<i64: 12, 128, 128>}, {pipeline_mode = #tpu.pipeline_mode<synchronous>, transform_indices = @transform_2, window_bounds = array<i64: 128, 50>}, {pipeline_mode = #tpu.pipeline_mode<synchronous>, transform_indices = @transform_3, window_bounds = array<i64: 1, 50>}, {pipeline_mode = #tpu.pipeline_mode<synchronous>, transform_indices = @transform_4, window_bounds = array<i64: 50, 50>}, {pipeline_mode = #tpu.pipeline_mode<synchronous>, transform_indices = @transform_5, window_bounds = array<i64: 1, 50>}, {pipeline_mode = #tpu.pipeline_mode<synchronous>, transform_indices = @transform_6, window_bounds = array<i64: 50, 50>}, {pipeline_mode = #tpu.pipeline_mode<synchronous>, transform_indices = @transform_7, window_bounds = array<i64: 1, 50>}, {pipeline_mode = #tpu.pipeline_mode<synchronous>, transform_indices = @transform_8, window_bounds = array<i64: 50, 50>}, {pipeline_mode = #tpu.pipeline_mode<synchronous>, transform_indices = @transform_9, window_bounds = array<i64: 1, 50>}, {pipeline_mode = #tpu.pipeline_mode<synchronous>, transform_indices = @transform_10, window_bounds = array<i64: 50, 128>}, {pipeline_mode = #tpu.pipeline_mode<synchronous>, transform_indices = @transform_11, window_bounds = array<i64: 1, 128>}, {transform_indices = @transform_12, window_bounds = array<i64: 8, 128>}]} {
    %c0 = arith.constant 0 : index
    %c0_0 = arith.constant 0 : index
    %0 = vector.load %arg1[%c0, %c0_0] : memref<8x128xf32, #tpu.memory_space<vmem>>, vector<8x128xf32>
    %c0_1 = arith.constant 0 : index
    %c0_2 = arith.constant 0 : index
    %1 = vector.load %arg3[%c0_1, %c0_2] : memref<128x50xf32, #tpu.memory_space<vmem>>, vector<128x50xf32>
    %c0_3 = arith.constant 0 : index
    %c0_4 = arith.constant 0 : index
    %2 = vector.load %arg5[%c0_3, %c0_4] : memref<50x50xf32, #tpu.memory_space<vmem>>, vector<50x50xf32>
    %c0_5 = arith.constant 0 : index
    %c0_6 = arith.constant 0 : index
    %3 = vector.load %arg7[%c0_5, %c0_6] : memref<50x50xf32, #tpu.memory_space<vmem>>, vector<50x50xf32>
    %c0_7 = arith.constant 0 : index
    %c0_8 = arith.constant 0 : index
    %4 = vector.load %arg9[%c0_7, %c0_8] : memref<50x50xf32, #tpu.memory_space<vmem>>, vector<50x50xf32>
    %c0_9 = arith.constant 0 : index
    %c0_10 = arith.constant 0 : index
    %5 = vector.load %arg11[%c0_9, %c0_10] : memref<50x128xf32, #tpu.memory_space<vmem>>, vector<50x128xf32>
    %c0_11 = arith.constant 0 : index
    %c0_12 = arith.constant 0 : index
    %6 = vector.load %arg4[%c0_11, %c0_12] : memref<1x50xf32, #tpu.memory_space<vmem>>, vector<1x50xf32>
    %7 = vector.shape_cast %6 : vector<1x50xf32> to vector<1x50xf32>
    %8 = vector.broadcast %7 : vector<1x50xf32> to vector<8x50xf32>
    %c0_13 = arith.constant 0 : index
    %c0_14 = arith.constant 0 : index
    %9 = vector.load %arg6[%c0_13, %c0_14] : memref<1x50xf32, #tpu.memory_space<vmem>>, vector<1x50xf32>
    %10 = vector.shape_cast %9 : vector<1x50xf32> to vector<1x50xf32>
    %11 = vector.broadcast %10 : vector<1x50xf32> to vector<8x50xf32>
    %c0_15 = arith.constant 0 : index
    %c0_16 = arith.constant 0 : index
    %12 = vector.load %arg8[%c0_15, %c0_16] : memref<1x50xf32, #tpu.memory_space<vmem>>, vector<1x50xf32>
    %13 = vector.shape_cast %12 : vector<1x50xf32> to vector<1x50xf32>
    %14 = vector.broadcast %13 : vector<1x50xf32> to vector<8x50xf32>
    %c0_17 = arith.constant 0 : index
    %c0_18 = arith.constant 0 : index
    %15 = vector.load %arg10[%c0_17, %c0_18] : memref<1x50xf32, #tpu.memory_space<vmem>>, vector<1x50xf32>
    %16 = vector.shape_cast %15 : vector<1x50xf32> to vector<1x50xf32>
    %17 = vector.broadcast %16 : vector<1x50xf32> to vector<8x50xf32>
    %c0_19 = arith.constant 0 : index
    %c0_20 = arith.constant 0 : index
    %18 = vector.load %arg12[%c0_19, %c0_20] : memref<1x128xf32, #tpu.memory_space<vmem>>, vector<1x128xf32>
    %19 = vector.shape_cast %18 : vector<1x128xf32> to vector<1x128xf32>
    %20 = vector.broadcast %19 : vector<1x128xf32> to vector<8x128xf32>
    %cst = arith.constant 0.000000e+00 : f32
    %21 = vector.broadcast %cst : f32 to vector<8x128xf32>
    %c0_21 = arith.constant 0 : index
    %c0_22 = arith.constant 0 : index
    %c0_23 = arith.constant 0 : index
    %22 = vector.load %arg2[%c0_21, %c0_22, %c0_23] : memref<12x128x128xf32, #tpu.memory_space<vmem>>, vector<1x128x128xf32>
    %23 = vector.shape_cast %22 : vector<1x128x128xf32> to vector<128x128xf32>
    %24 = arith.addf %0, %0 : vector<8x128xf32>
    %25 = arith.addf %24, %21 : vector<8x128xf32>
    %cst_24 = arith.constant dense<0.000000e+00> : vector<8x128xf32>
    %26 = tpu.matmul %25, %23, %cst_24 {dimension_numbers = #tpu.dot_dimension_numbers<[1], [0], [0], [1], [0, 0, 1, 1], [], []>} : vector<8x128xf32>, vector<128x128xf32>, vector<8x128xf32> -> vector<8x128xf32>
    %27 = arith.subf %26, %21 : vector<8x128xf32>
    %cst_25 = arith.constant dense<0.000000e+00> : vector<8x50xf32>
    %28 = tpu.matmul %27, %1, %cst_25 {dimension_numbers = #tpu.dot_dimension_numbers<[1], [0], [0], [1], [0, 0, 1, 1], [], []>} : vector<8x128xf32>, vector<128x50xf32>, vector<8x50xf32> -> vector<8x50xf32>
    %29 = arith.addf %28, %8 : vector<8x50xf32>
    %cst_26 = arith.constant 0.000000e+00 : f32
    %30 = vector.broadcast %cst_26 : f32 to vector<8x50xf32>
    %31 = arith.maximumf %29, %30 : vector<8x50xf32>
    %cst_27 = arith.constant dense<0.000000e+00> : vector<8x50xf32>
    %32 = tpu.matmul %31, %2, %cst_27 {dimension_numbers = #tpu.dot_dimension_numbers<[1], [0], [0], [1], [0, 0, 1, 1], [], []>} : vector<8x50xf32>, vector<50x50xf32>, vector<8x50xf32> -> vector<8x50xf32>
    %33 = arith.addf %32, %11 : vector<8x50xf32>
    %cst_28 = arith.constant 0.000000e+00 : f32
    %34 = vector.broadcast %cst_28 : f32 to vector<8x50xf32>
    %35 = arith.maximumf %33, %34 : vector<8x50xf32>
    %cst_29 = arith.constant dense<0.000000e+00> : vector<8x50xf32>
    %36 = tpu.matmul %35, %3, %cst_29 {dimension_numbers = #tpu.dot_dimension_numbers<[1], [0], [0], [1], [0, 0, 1, 1], [], []>} : vector<8x50xf32>, vector<50x50xf32>, vector<8x50xf32> -> vector<8x50xf32>
    %37 = arith.addf %36, %14 : vector<8x50xf32>
    %cst_30 = arith.constant 0.000000e+00 : f32
    %38 = vector.broadcast %cst_30 : f32 to vector<8x50xf32>
    %39 = arith.maximumf %37, %38 : vector<8x50xf32>
    %cst_31 = arith.constant dense<0.000000e+00> : vector<8x50xf32>
    %40 = tpu.matmul %39, %4, %cst_31 {dimension_numbers = #tpu.dot_dimension_numbers<[1], [0], [0], [1], [0, 0, 1, 1], [], []>} : vector<8x50xf32>, vector<50x50xf32>, vector<8x50xf32> -> vector<8x50xf32>
    %41 = arith.addf %40, %17 : vector<8x50xf32>
    %cst_32 = arith.constant 0.000000e+00 : f32
    %42 = vector.broadcast %cst_32 : f32 to vector<8x50xf32>
    %43 = arith.maximumf %41, %42 : vector<8x50xf32>
    %cst_33 = arith.constant dense<0.000000e+00> : vector<8x128xf32>
    %44 = tpu.matmul %43, %5, %cst_33 {dimension_numbers = #tpu.dot_dimension_numbers<[1], [0], [0], [1], [0, 0, 1, 1], [], []>} : vector<8x50xf32>, vector<50x128xf32>, vector<8x128xf32> -> vector<8x128xf32>
    %45 = arith.addf %44, %20 : vector<8x128xf32>
    %46 = arith.subf %26, %45 : vector<8x128xf32>
    %47 = arith.subf %21, %46 : vector<8x128xf32>
    %c1 = arith.constant 1 : index
    %c0_34 = arith.constant 0 : index
    %c0_35 = arith.constant 0 : index
    %48 = vector.load %arg2[%c1, %c0_34, %c0_35] : memref<12x128x128xf32, #tpu.memory_space<vmem>>, vector<1x128x128xf32>
    %49 = vector.shape_cast %48 : vector<1x128x128xf32> to vector<128x128xf32>
    %50 = arith.addf %0, %45 : vector<8x128xf32>
    %51 = arith.addf %50, %47 : vector<8x128xf32>
    %cst_36 = arith.constant dense<0.000000e+00> : vector<8x128xf32>
    %52 = tpu.matmul %51, %49, %cst_36 {dimension_numbers = #tpu.dot_dimension_numbers<[1], [0], [0], [1], [0, 0, 1, 1], [], []>} : vector<8x128xf32>, vector<128x128xf32>, vector<8x128xf32> -> vector<8x128xf32>
    %53 = arith.subf %52, %47 : vector<8x128xf32>
    %cst_37 = arith.constant dense<0.000000e+00> : vector<8x50xf32>
    %54 = tpu.matmul %53, %1, %cst_37 {dimension_numbers = #tpu.dot_dimension_numbers<[1], [0], [0], [1], [0, 0, 1, 1], [], []>} : vector<8x128xf32>, vector<128x50xf32>, vector<8x50xf32> -> vector<8x50xf32>
    %55 = arith.addf %54, %8 : vector<8x50xf32>
    %cst_38 = arith.constant 0.000000e+00 : f32
    %56 = vector.broadcast %cst_38 : f32 to vector<8x50xf32>
    %57 = arith.maximumf %55, %56 : vector<8x50xf32>
    %cst_39 = arith.constant dense<0.000000e+00> : vector<8x50xf32>
    %58 = tpu.matmul %57, %2, %cst_39 {dimension_numbers = #tpu.dot_dimension_numbers<[1], [0], [0], [1], [0, 0, 1, 1], [], []>} : vector<8x50xf32>, vector<50x50xf32>, vector<8x50xf32> -> vector<8x50xf32>
    %59 = arith.addf %58, %11 : vector<8x50xf32>
    %cst_40 = arith.constant 0.000000e+00 : f32
    %60 = vector.broadcast %cst_40 : f32 to vector<8x50xf32>
    %61 = arith.maximumf %59, %60 : vector<8x50xf32>
    %cst_41 = arith.constant dense<0.000000e+00> : vector<8x50xf32>
    %62 = tpu.matmul %61, %3, %cst_41 {dimension_numbers = #tpu.dot_dimension_numbers<[1], [0], [0], [1], [0, 0, 1, 1], [], []>} : vector<8x50xf32>, vector<50x50xf32>, vector<8x50xf32> -> vector<8x50xf32>
    %63 = arith.addf %62, %14 : vector<8x50xf32>
    %cst_42 = arith.constant 0.000000e+00 : f32
    %64 = vector.broadcast %cst_42 : f32 to vector<8x50xf32>
    %65 = arith.maximumf %63, %64 : vector<8x50xf32>
    %cst_43 = arith.constant dense<0.000000e+00> : vector<8x50xf32>
    %66 = tpu.matmul %65, %4, %cst_43 {dimension_numbers = #tpu.dot_dimension_numbers<[1], [0], [0], [1], [0, 0, 1, 1], [], []>} : vector<8x50xf32>, vector<50x50xf32>, vector<8x50xf32> -> vector<8x50xf32>
    %67 = arith.addf %66, %17 : vector<8x50xf32>
    %cst_44 = arith.constant 0.000000e+00 : f32
    %68 = vector.broadcast %cst_44 : f32 to vector<8x50xf32>
    %69 = arith.maximumf %67, %68 : vector<8x50xf32>
    %cst_45 = arith.constant dense<0.000000e+00> : vector<8x128xf32>
    %70 = tpu.matmul %69, %5, %cst_45 {dimension_numbers = #tpu.dot_dimension_numbers<[1], [0], [0], [1], [0, 0, 1, 1], [], []>} : vector<8x50xf32>, vector<50x128xf32>, vector<8x128xf32> -> vector<8x128xf32>
    %71 = arith.addf %70, %20 : vector<8x128xf32>
    %72 = arith.subf %52, %71 : vector<8x128xf32>
    %73 = arith.subf %47, %72 : vector<8x128xf32>
    %c2 = arith.constant 2 : index
    %c0_46 = arith.constant 0 : index
    %c0_47 = arith.constant 0 : index
    %74 = vector.load %arg2[%c2, %c0_46, %c0_47] : memref<12x128x128xf32, #tpu.memory_space<vmem>>, vector<1x128x128xf32>
    %75 = vector.shape_cast %74 : vector<1x128x128xf32> to vector<128x128xf32>
    %76 = arith.addf %0, %71 : vector<8x128xf32>
    %77 = arith.addf %76, %73 : vector<8x128xf32>
    %cst_48 = arith.constant dense<0.000000e+00> : vector<8x128xf32>
    %78 = tpu.matmul %77, %75, %cst_48 {dimension_numbers = #tpu.dot_dimension_numbers<[1], [0], [0], [1], [0, 0, 1, 1], [], []>} : vector<8x128xf32>, vector<128x128xf32>, vector<8x128xf32> -> vector<8x128xf32>
    %79 = arith.subf %78, %73 : vector<8x128xf32>
    %cst_49 = arith.constant dense<0.000000e+00> : vector<8x50xf32>
    %80 = tpu.matmul %79, %1, %cst_49 {dimension_numbers = #tpu.dot_dimension_numbers<[1], [0], [0], [1], [0, 0, 1, 1], [], []>} : vector<8x128xf32>, vector<128x50xf32>, vector<8x50xf32> -> vector<8x50xf32>
    %81 = arith.addf %80, %8 : vector<8x50xf32>
    %cst_50 = arith.constant 0.000000e+00 : f32
    %82 = vector.broadcast %cst_50 : f32 to vector<8x50xf32>
    %83 = arith.maximumf %81, %82 : vector<8x50xf32>
    %cst_51 = arith.constant dense<0.000000e+00> : vector<8x50xf32>
    %84 = tpu.matmul %83, %2, %cst_51 {dimension_numbers = #tpu.dot_dimension_numbers<[1], [0], [0], [1], [0, 0, 1, 1], [], []>} : vector<8x50xf32>, vector<50x50xf32>, vector<8x50xf32> -> vector<8x50xf32>
    %85 = arith.addf %84, %11 : vector<8x50xf32>
    %cst_52 = arith.constant 0.000000e+00 : f32
    %86 = vector.broadcast %cst_52 : f32 to vector<8x50xf32>
    %87 = arith.maximumf %85, %86 : vector<8x50xf32>
    %cst_53 = arith.constant dense<0.000000e+00> : vector<8x50xf32>
    %88 = tpu.matmul %87, %3, %cst_53 {dimension_numbers = #tpu.dot_dimension_numbers<[1], [0], [0], [1], [0, 0, 1, 1], [], []>} : vector<8x50xf32>, vector<50x50xf32>, vector<8x50xf32> -> vector<8x50xf32>
    %89 = arith.addf %88, %14 : vector<8x50xf32>
    %cst_54 = arith.constant 0.000000e+00 : f32
    %90 = vector.broadcast %cst_54 : f32 to vector<8x50xf32>
    %91 = arith.maximumf %89, %90 : vector<8x50xf32>
    %cst_55 = arith.constant dense<0.000000e+00> : vector<8x50xf32>
    %92 = tpu.matmul %91, %4, %cst_55 {dimension_numbers = #tpu.dot_dimension_numbers<[1], [0], [0], [1], [0, 0, 1, 1], [], []>} : vector<8x50xf32>, vector<50x50xf32>, vector<8x50xf32> -> vector<8x50xf32>
    %93 = arith.addf %92, %17 : vector<8x50xf32>
    %cst_56 = arith.constant 0.000000e+00 : f32
    %94 = vector.broadcast %cst_56 : f32 to vector<8x50xf32>
    %95 = arith.maximumf %93, %94 : vector<8x50xf32>
    %cst_57 = arith.constant dense<0.000000e+00> : vector<8x128xf32>
    %96 = tpu.matmul %95, %5, %cst_57 {dimension_numbers = #tpu.dot_dimension_numbers<[1], [0], [0], [1], [0, 0, 1, 1], [], []>} : vector<8x50xf32>, vector<50x128xf32>, vector<8x128xf32> -> vector<8x128xf32>
    %97 = arith.addf %96, %20 : vector<8x128xf32>
    %98 = arith.subf %78, %97 : vector<8x128xf32>
    %99 = arith.subf %73, %98 : vector<8x128xf32>
    %c3 = arith.constant 3 : index
    %c0_58 = arith.constant 0 : index
    %c0_59 = arith.constant 0 : index
    %100 = vector.load %arg2[%c3, %c0_58, %c0_59] : memref<12x128x128xf32, #tpu.memory_space<vmem>>, vector<1x128x128xf32>
    %101 = vector.shape_cast %100 : vector<1x128x128xf32> to vector<128x128xf32>
    %102 = arith.addf %0, %97 : vector<8x128xf32>
    %103 = arith.addf %102, %99 : vector<8x128xf32>
    %cst_60 = arith.constant dense<0.000000e+00> : vector<8x128xf32>
    %104 = tpu.matmul %103, %101, %cst_60 {dimension_numbers = #tpu.dot_dimension_numbers<[1], [0], [0], [1], [0, 0, 1, 1], [], []>} : vector<8x128xf32>, vector<128x128xf32>, vector<8x128xf32> -> vector<8x128xf32>
    %105 = arith.subf %104, %99 : vector<8x128xf32>
    %cst_61 = arith.constant dense<0.000000e+00> : vector<8x50xf32>
    %106 = tpu.matmul %105, %1, %cst_61 {dimension_numbers = #tpu.dot_dimension_numbers<[1], [0], [0], [1], [0, 0, 1, 1], [], []>} : vector<8x128xf32>, vector<128x50xf32>, vector<8x50xf32> -> vector<8x50xf32>
    %107 = arith.addf %106, %8 : vector<8x50xf32>
    %cst_62 = arith.constant 0.000000e+00 : f32
    %108 = vector.broadcast %cst_62 : f32 to vector<8x50xf32>
    %109 = arith.maximumf %107, %108 : vector<8x50xf32>
    %cst_63 = arith.constant dense<0.000000e+00> : vector<8x50xf32>
    %110 = tpu.matmul %109, %2, %cst_63 {dimension_numbers = #tpu.dot_dimension_numbers<[1], [0], [0], [1], [0, 0, 1, 1], [], []>} : vector<8x50xf32>, vector<50x50xf32>, vector<8x50xf32> -> vector<8x50xf32>
    %111 = arith.addf %110, %11 : vector<8x50xf32>
    %cst_64 = arith.constant 0.000000e+00 : f32
    %112 = vector.broadcast %cst_64 : f32 to vector<8x50xf32>
    %113 = arith.maximumf %111, %112 : vector<8x50xf32>
    %cst_65 = arith.constant dense<0.000000e+00> : vector<8x50xf32>
    %114 = tpu.matmul %113, %3, %cst_65 {dimension_numbers = #tpu.dot_dimension_numbers<[1], [0], [0], [1], [0, 0, 1, 1], [], []>} : vector<8x50xf32>, vector<50x50xf32>, vector<8x50xf32> -> vector<8x50xf32>
    %115 = arith.addf %114, %14 : vector<8x50xf32>
    %cst_66 = arith.constant 0.000000e+00 : f32
    %116 = vector.broadcast %cst_66 : f32 to vector<8x50xf32>
    %117 = arith.maximumf %115, %116 : vector<8x50xf32>
    %cst_67 = arith.constant dense<0.000000e+00> : vector<8x50xf32>
    %118 = tpu.matmul %117, %4, %cst_67 {dimension_numbers = #tpu.dot_dimension_numbers<[1], [0], [0], [1], [0, 0, 1, 1], [], []>} : vector<8x50xf32>, vector<50x50xf32>, vector<8x50xf32> -> vector<8x50xf32>
    %119 = arith.addf %118, %17 : vector<8x50xf32>
    %cst_68 = arith.constant 0.000000e+00 : f32
    %120 = vector.broadcast %cst_68 : f32 to vector<8x50xf32>
    %121 = arith.maximumf %119, %120 : vector<8x50xf32>
    %cst_69 = arith.constant dense<0.000000e+00> : vector<8x128xf32>
    %122 = tpu.matmul %121, %5, %cst_69 {dimension_numbers = #tpu.dot_dimension_numbers<[1], [0], [0], [1], [0, 0, 1, 1], [], []>} : vector<8x50xf32>, vector<50x128xf32>, vector<8x128xf32> -> vector<8x128xf32>
    %123 = arith.addf %122, %20 : vector<8x128xf32>
    %124 = arith.subf %104, %123 : vector<8x128xf32>
    %125 = arith.subf %99, %124 : vector<8x128xf32>
    %c4 = arith.constant 4 : index
    %c0_70 = arith.constant 0 : index
    %c0_71 = arith.constant 0 : index
    %126 = vector.load %arg2[%c4, %c0_70, %c0_71] : memref<12x128x128xf32, #tpu.memory_space<vmem>>, vector<1x128x128xf32>
    %127 = vector.shape_cast %126 : vector<1x128x128xf32> to vector<128x128xf32>
    %128 = arith.addf %0, %123 : vector<8x128xf32>
    %129 = arith.addf %128, %125 : vector<8x128xf32>
    %cst_72 = arith.constant dense<0.000000e+00> : vector<8x128xf32>
    %130 = tpu.matmul %129, %127, %cst_72 {dimension_numbers = #tpu.dot_dimension_numbers<[1], [0], [0], [1], [0, 0, 1, 1], [], []>} : vector<8x128xf32>, vector<128x128xf32>, vector<8x128xf32> -> vector<8x128xf32>
    %131 = arith.subf %130, %125 : vector<8x128xf32>
    %cst_73 = arith.constant dense<0.000000e+00> : vector<8x50xf32>
    %132 = tpu.matmul %131, %1, %cst_73 {dimension_numbers = #tpu.dot_dimension_numbers<[1], [0], [0], [1], [0, 0, 1, 1], [], []>} : vector<8x128xf32>, vector<128x50xf32>, vector<8x50xf32> -> vector<8x50xf32>
    %133 = arith.addf %132, %8 : vector<8x50xf32>
    %cst_74 = arith.constant 0.000000e+00 : f32
    %134 = vector.broadcast %cst_74 : f32 to vector<8x50xf32>
    %135 = arith.maximumf %133, %134 : vector<8x50xf32>
    %cst_75 = arith.constant dense<0.000000e+00> : vector<8x50xf32>
    %136 = tpu.matmul %135, %2, %cst_75 {dimension_numbers = #tpu.dot_dimension_numbers<[1], [0], [0], [1], [0, 0, 1, 1], [], []>} : vector<8x50xf32>, vector<50x50xf32>, vector<8x50xf32> -> vector<8x50xf32>
    %137 = arith.addf %136, %11 : vector<8x50xf32>
    %cst_76 = arith.constant 0.000000e+00 : f32
    %138 = vector.broadcast %cst_76 : f32 to vector<8x50xf32>
    %139 = arith.maximumf %137, %138 : vector<8x50xf32>
    %cst_77 = arith.constant dense<0.000000e+00> : vector<8x50xf32>
    %140 = tpu.matmul %139, %3, %cst_77 {dimension_numbers = #tpu.dot_dimension_numbers<[1], [0], [0], [1], [0, 0, 1, 1], [], []>} : vector<8x50xf32>, vector<50x50xf32>, vector<8x50xf32> -> vector<8x50xf32>
    %141 = arith.addf %140, %14 : vector<8x50xf32>
    %cst_78 = arith.constant 0.000000e+00 : f32
    %142 = vector.broadcast %cst_78 : f32 to vector<8x50xf32>
    %143 = arith.maximumf %141, %142 : vector<8x50xf32>
    %cst_79 = arith.constant dense<0.000000e+00> : vector<8x50xf32>
    %144 = tpu.matmul %143, %4, %cst_79 {dimension_numbers = #tpu.dot_dimension_numbers<[1], [0], [0], [1], [0, 0, 1, 1], [], []>} : vector<8x50xf32>, vector<50x50xf32>, vector<8x50xf32> -> vector<8x50xf32>
    %145 = arith.addf %144, %17 : vector<8x50xf32>
    %cst_80 = arith.constant 0.000000e+00 : f32
    %146 = vector.broadcast %cst_80 : f32 to vector<8x50xf32>
    %147 = arith.maximumf %145, %146 : vector<8x50xf32>
    %cst_81 = arith.constant dense<0.000000e+00> : vector<8x128xf32>
    %148 = tpu.matmul %147, %5, %cst_81 {dimension_numbers = #tpu.dot_dimension_numbers<[1], [0], [0], [1], [0, 0, 1, 1], [], []>} : vector<8x50xf32>, vector<50x128xf32>, vector<8x128xf32> -> vector<8x128xf32>
    %149 = arith.addf %148, %20 : vector<8x128xf32>
    %150 = arith.subf %130, %149 : vector<8x128xf32>
    %151 = arith.subf %125, %150 : vector<8x128xf32>
    %c5 = arith.constant 5 : index
    %c0_82 = arith.constant 0 : index
    %c0_83 = arith.constant 0 : index
    %152 = vector.load %arg2[%c5, %c0_82, %c0_83] : memref<12x128x128xf32, #tpu.memory_space<vmem>>, vector<1x128x128xf32>
    %153 = vector.shape_cast %152 : vector<1x128x128xf32> to vector<128x128xf32>
    %154 = arith.addf %0, %149 : vector<8x128xf32>
    %155 = arith.addf %154, %151 : vector<8x128xf32>
    %cst_84 = arith.constant dense<0.000000e+00> : vector<8x128xf32>
    %156 = tpu.matmul %155, %153, %cst_84 {dimension_numbers = #tpu.dot_dimension_numbers<[1], [0], [0], [1], [0, 0, 1, 1], [], []>} : vector<8x128xf32>, vector<128x128xf32>, vector<8x128xf32> -> vector<8x128xf32>
    %157 = arith.subf %156, %151 : vector<8x128xf32>
    %cst_85 = arith.constant dense<0.000000e+00> : vector<8x50xf32>
    %158 = tpu.matmul %157, %1, %cst_85 {dimension_numbers = #tpu.dot_dimension_numbers<[1], [0], [0], [1], [0, 0, 1, 1], [], []>} : vector<8x128xf32>, vector<128x50xf32>, vector<8x50xf32> -> vector<8x50xf32>
    %159 = arith.addf %158, %8 : vector<8x50xf32>
    %cst_86 = arith.constant 0.000000e+00 : f32
    %160 = vector.broadcast %cst_86 : f32 to vector<8x50xf32>
    %161 = arith.maximumf %159, %160 : vector<8x50xf32>
    %cst_87 = arith.constant dense<0.000000e+00> : vector<8x50xf32>
    %162 = tpu.matmul %161, %2, %cst_87 {dimension_numbers = #tpu.dot_dimension_numbers<[1], [0], [0], [1], [0, 0, 1, 1], [], []>} : vector<8x50xf32>, vector<50x50xf32>, vector<8x50xf32> -> vector<8x50xf32>
    %163 = arith.addf %162, %11 : vector<8x50xf32>
    %cst_88 = arith.constant 0.000000e+00 : f32
    %164 = vector.broadcast %cst_88 : f32 to vector<8x50xf32>
    %165 = arith.maximumf %163, %164 : vector<8x50xf32>
    %cst_89 = arith.constant dense<0.000000e+00> : vector<8x50xf32>
    %166 = tpu.matmul %165, %3, %cst_89 {dimension_numbers = #tpu.dot_dimension_numbers<[1], [0], [0], [1], [0, 0, 1, 1], [], []>} : vector<8x50xf32>, vector<50x50xf32>, vector<8x50xf32> -> vector<8x50xf32>
    %167 = arith.addf %166, %14 : vector<8x50xf32>
    %cst_90 = arith.constant 0.000000e+00 : f32
    %168 = vector.broadcast %cst_90 : f32 to vector<8x50xf32>
    %169 = arith.maximumf %167, %168 : vector<8x50xf32>
    %cst_91 = arith.constant dense<0.000000e+00> : vector<8x50xf32>
    %170 = tpu.matmul %169, %4, %cst_91 {dimension_numbers = #tpu.dot_dimension_numbers<[1], [0], [0], [1], [0, 0, 1, 1], [], []>} : vector<8x50xf32>, vector<50x50xf32>, vector<8x50xf32> -> vector<8x50xf32>
    %171 = arith.addf %170, %17 : vector<8x50xf32>
    %cst_92 = arith.constant 0.000000e+00 : f32
    %172 = vector.broadcast %cst_92 : f32 to vector<8x50xf32>
    %173 = arith.maximumf %171, %172 : vector<8x50xf32>
    %cst_93 = arith.constant dense<0.000000e+00> : vector<8x128xf32>
    %174 = tpu.matmul %173, %5, %cst_93 {dimension_numbers = #tpu.dot_dimension_numbers<[1], [0], [0], [1], [0, 0, 1, 1], [], []>} : vector<8x50xf32>, vector<50x128xf32>, vector<8x128xf32> -> vector<8x128xf32>
    %175 = arith.addf %174, %20 : vector<8x128xf32>
    %176 = arith.subf %156, %175 : vector<8x128xf32>
    %177 = arith.subf %151, %176 : vector<8x128xf32>
    %c6 = arith.constant 6 : index
    %c0_94 = arith.constant 0 : index
    %c0_95 = arith.constant 0 : index
    %178 = vector.load %arg2[%c6, %c0_94, %c0_95] : memref<12x128x128xf32, #tpu.memory_space<vmem>>, vector<1x128x128xf32>
    %179 = vector.shape_cast %178 : vector<1x128x128xf32> to vector<128x128xf32>
    %180 = arith.addf %0, %175 : vector<8x128xf32>
    %181 = arith.addf %180, %177 : vector<8x128xf32>
    %cst_96 = arith.constant dense<0.000000e+00> : vector<8x128xf32>
    %182 = tpu.matmul %181, %179, %cst_96 {dimension_numbers = #tpu.dot_dimension_numbers<[1], [0], [0], [1], [0, 0, 1, 1], [], []>} : vector<8x128xf32>, vector<128x128xf32>, vector<8x128xf32> -> vector<8x128xf32>
    %183 = arith.subf %182, %177 : vector<8x128xf32>
    %cst_97 = arith.constant dense<0.000000e+00> : vector<8x50xf32>
    %184 = tpu.matmul %183, %1, %cst_97 {dimension_numbers = #tpu.dot_dimension_numbers<[1], [0], [0], [1], [0, 0, 1, 1], [], []>} : vector<8x128xf32>, vector<128x50xf32>, vector<8x50xf32> -> vector<8x50xf32>
    %185 = arith.addf %184, %8 : vector<8x50xf32>
    %cst_98 = arith.constant 0.000000e+00 : f32
    %186 = vector.broadcast %cst_98 : f32 to vector<8x50xf32>
    %187 = arith.maximumf %185, %186 : vector<8x50xf32>
    %cst_99 = arith.constant dense<0.000000e+00> : vector<8x50xf32>
    %188 = tpu.matmul %187, %2, %cst_99 {dimension_numbers = #tpu.dot_dimension_numbers<[1], [0], [0], [1], [0, 0, 1, 1], [], []>} : vector<8x50xf32>, vector<50x50xf32>, vector<8x50xf32> -> vector<8x50xf32>
    %189 = arith.addf %188, %11 : vector<8x50xf32>
    %cst_100 = arith.constant 0.000000e+00 : f32
    %190 = vector.broadcast %cst_100 : f32 to vector<8x50xf32>
    %191 = arith.maximumf %189, %190 : vector<8x50xf32>
    %cst_101 = arith.constant dense<0.000000e+00> : vector<8x50xf32>
    %192 = tpu.matmul %191, %3, %cst_101 {dimension_numbers = #tpu.dot_dimension_numbers<[1], [0], [0], [1], [0, 0, 1, 1], [], []>} : vector<8x50xf32>, vector<50x50xf32>, vector<8x50xf32> -> vector<8x50xf32>
    %193 = arith.addf %192, %14 : vector<8x50xf32>
    %cst_102 = arith.constant 0.000000e+00 : f32
    %194 = vector.broadcast %cst_102 : f32 to vector<8x50xf32>
    %195 = arith.maximumf %193, %194 : vector<8x50xf32>
    %cst_103 = arith.constant dense<0.000000e+00> : vector<8x50xf32>
    %196 = tpu.matmul %195, %4, %cst_103 {dimension_numbers = #tpu.dot_dimension_numbers<[1], [0], [0], [1], [0, 0, 1, 1], [], []>} : vector<8x50xf32>, vector<50x50xf32>, vector<8x50xf32> -> vector<8x50xf32>
    %197 = arith.addf %196, %17 : vector<8x50xf32>
    %cst_104 = arith.constant 0.000000e+00 : f32
    %198 = vector.broadcast %cst_104 : f32 to vector<8x50xf32>
    %199 = arith.maximumf %197, %198 : vector<8x50xf32>
    %cst_105 = arith.constant dense<0.000000e+00> : vector<8x128xf32>
    %200 = tpu.matmul %199, %5, %cst_105 {dimension_numbers = #tpu.dot_dimension_numbers<[1], [0], [0], [1], [0, 0, 1, 1], [], []>} : vector<8x50xf32>, vector<50x128xf32>, vector<8x128xf32> -> vector<8x128xf32>
    %201 = arith.addf %200, %20 : vector<8x128xf32>
    %202 = arith.subf %182, %201 : vector<8x128xf32>
    %203 = arith.subf %177, %202 : vector<8x128xf32>
    %c7 = arith.constant 7 : index
    %c0_106 = arith.constant 0 : index
    %c0_107 = arith.constant 0 : index
    %204 = vector.load %arg2[%c7, %c0_106, %c0_107] : memref<12x128x128xf32, #tpu.memory_space<vmem>>, vector<1x128x128xf32>
    %205 = vector.shape_cast %204 : vector<1x128x128xf32> to vector<128x128xf32>
    %206 = arith.addf %0, %201 : vector<8x128xf32>
    %207 = arith.addf %206, %203 : vector<8x128xf32>
    %cst_108 = arith.constant dense<0.000000e+00> : vector<8x128xf32>
    %208 = tpu.matmul %207, %205, %cst_108 {dimension_numbers = #tpu.dot_dimension_numbers<[1], [0], [0], [1], [0, 0, 1, 1], [], []>} : vector<8x128xf32>, vector<128x128xf32>, vector<8x128xf32> -> vector<8x128xf32>
    %209 = arith.subf %208, %203 : vector<8x128xf32>
    %cst_109 = arith.constant dense<0.000000e+00> : vector<8x50xf32>
    %210 = tpu.matmul %209, %1, %cst_109 {dimension_numbers = #tpu.dot_dimension_numbers<[1], [0], [0], [1], [0, 0, 1, 1], [], []>} : vector<8x128xf32>, vector<128x50xf32>, vector<8x50xf32> -> vector<8x50xf32>
    %211 = arith.addf %210, %8 : vector<8x50xf32>
    %cst_110 = arith.constant 0.000000e+00 : f32
    %212 = vector.broadcast %cst_110 : f32 to vector<8x50xf32>
    %213 = arith.maximumf %211, %212 : vector<8x50xf32>
    %cst_111 = arith.constant dense<0.000000e+00> : vector<8x50xf32>
    %214 = tpu.matmul %213, %2, %cst_111 {dimension_numbers = #tpu.dot_dimension_numbers<[1], [0], [0], [1], [0, 0, 1, 1], [], []>} : vector<8x50xf32>, vector<50x50xf32>, vector<8x50xf32> -> vector<8x50xf32>
    %215 = arith.addf %214, %11 : vector<8x50xf32>
    %cst_112 = arith.constant 0.000000e+00 : f32
    %216 = vector.broadcast %cst_112 : f32 to vector<8x50xf32>
    %217 = arith.maximumf %215, %216 : vector<8x50xf32>
    %cst_113 = arith.constant dense<0.000000e+00> : vector<8x50xf32>
    %218 = tpu.matmul %217, %3, %cst_113 {dimension_numbers = #tpu.dot_dimension_numbers<[1], [0], [0], [1], [0, 0, 1, 1], [], []>} : vector<8x50xf32>, vector<50x50xf32>, vector<8x50xf32> -> vector<8x50xf32>
    %219 = arith.addf %218, %14 : vector<8x50xf32>
    %cst_114 = arith.constant 0.000000e+00 : f32
    %220 = vector.broadcast %cst_114 : f32 to vector<8x50xf32>
    %221 = arith.maximumf %219, %220 : vector<8x50xf32>
    %cst_115 = arith.constant dense<0.000000e+00> : vector<8x50xf32>
    %222 = tpu.matmul %221, %4, %cst_115 {dimension_numbers = #tpu.dot_dimension_numbers<[1], [0], [0], [1], [0, 0, 1, 1], [], []>} : vector<8x50xf32>, vector<50x50xf32>, vector<8x50xf32> -> vector<8x50xf32>
    %223 = arith.addf %222, %17 : vector<8x50xf32>
    %cst_116 = arith.constant 0.000000e+00 : f32
    %224 = vector.broadcast %cst_116 : f32 to vector<8x50xf32>
    %225 = arith.maximumf %223, %224 : vector<8x50xf32>
    %cst_117 = arith.constant dense<0.000000e+00> : vector<8x128xf32>
    %226 = tpu.matmul %225, %5, %cst_117 {dimension_numbers = #tpu.dot_dimension_numbers<[1], [0], [0], [1], [0, 0, 1, 1], [], []>} : vector<8x50xf32>, vector<50x128xf32>, vector<8x128xf32> -> vector<8x128xf32>
    %227 = arith.addf %226, %20 : vector<8x128xf32>
    %228 = arith.subf %208, %227 : vector<8x128xf32>
    %229 = arith.subf %203, %228 : vector<8x128xf32>
    %c8 = arith.constant 8 : index
    %c0_118 = arith.constant 0 : index
    %c0_119 = arith.constant 0 : index
    %230 = vector.load %arg2[%c8, %c0_118, %c0_119] : memref<12x128x128xf32, #tpu.memory_space<vmem>>, vector<1x128x128xf32>
    %231 = vector.shape_cast %230 : vector<1x128x128xf32> to vector<128x128xf32>
    %232 = arith.addf %0, %227 : vector<8x128xf32>
    %233 = arith.addf %232, %229 : vector<8x128xf32>
    %cst_120 = arith.constant dense<0.000000e+00> : vector<8x128xf32>
    %234 = tpu.matmul %233, %231, %cst_120 {dimension_numbers = #tpu.dot_dimension_numbers<[1], [0], [0], [1], [0, 0, 1, 1], [], []>} : vector<8x128xf32>, vector<128x128xf32>, vector<8x128xf32> -> vector<8x128xf32>
    %235 = arith.subf %234, %229 : vector<8x128xf32>
    %cst_121 = arith.constant dense<0.000000e+00> : vector<8x50xf32>
    %236 = tpu.matmul %235, %1, %cst_121 {dimension_numbers = #tpu.dot_dimension_numbers<[1], [0], [0], [1], [0, 0, 1, 1], [], []>} : vector<8x128xf32>, vector<128x50xf32>, vector<8x50xf32> -> vector<8x50xf32>
    %237 = arith.addf %236, %8 : vector<8x50xf32>
    %cst_122 = arith.constant 0.000000e+00 : f32
    %238 = vector.broadcast %cst_122 : f32 to vector<8x50xf32>
    %239 = arith.maximumf %237, %238 : vector<8x50xf32>
    %cst_123 = arith.constant dense<0.000000e+00> : vector<8x50xf32>
    %240 = tpu.matmul %239, %2, %cst_123 {dimension_numbers = #tpu.dot_dimension_numbers<[1], [0], [0], [1], [0, 0, 1, 1], [], []>} : vector<8x50xf32>, vector<50x50xf32>, vector<8x50xf32> -> vector<8x50xf32>
    %241 = arith.addf %240, %11 : vector<8x50xf32>
    %cst_124 = arith.constant 0.000000e+00 : f32
    %242 = vector.broadcast %cst_124 : f32 to vector<8x50xf32>
    %243 = arith.maximumf %241, %242 : vector<8x50xf32>
    %cst_125 = arith.constant dense<0.000000e+00> : vector<8x50xf32>
    %244 = tpu.matmul %243, %3, %cst_125 {dimension_numbers = #tpu.dot_dimension_numbers<[1], [0], [0], [1], [0, 0, 1, 1], [], []>} : vector<8x50xf32>, vector<50x50xf32>, vector<8x50xf32> -> vector<8x50xf32>
    %245 = arith.addf %244, %14 : vector<8x50xf32>
    %cst_126 = arith.constant 0.000000e+00 : f32
    %246 = vector.broadcast %cst_126 : f32 to vector<8x50xf32>
    %247 = arith.maximumf %245, %246 : vector<8x50xf32>
    %cst_127 = arith.constant dense<0.000000e+00> : vector<8x50xf32>
    %248 = tpu.matmul %247, %4, %cst_127 {dimension_numbers = #tpu.dot_dimension_numbers<[1], [0], [0], [1], [0, 0, 1, 1], [], []>} : vector<8x50xf32>, vector<50x50xf32>, vector<8x50xf32> -> vector<8x50xf32>
    %249 = arith.addf %248, %17 : vector<8x50xf32>
    %cst_128 = arith.constant 0.000000e+00 : f32
    %250 = vector.broadcast %cst_128 : f32 to vector<8x50xf32>
    %251 = arith.maximumf %249, %250 : vector<8x50xf32>
    %cst_129 = arith.constant dense<0.000000e+00> : vector<8x128xf32>
    %252 = tpu.matmul %251, %5, %cst_129 {dimension_numbers = #tpu.dot_dimension_numbers<[1], [0], [0], [1], [0, 0, 1, 1], [], []>} : vector<8x50xf32>, vector<50x128xf32>, vector<8x128xf32> -> vector<8x128xf32>
    %253 = arith.addf %252, %20 : vector<8x128xf32>
    %254 = arith.subf %234, %253 : vector<8x128xf32>
    %255 = arith.subf %229, %254 : vector<8x128xf32>
    %c9 = arith.constant 9 : index
    %c0_130 = arith.constant 0 : index
    %c0_131 = arith.constant 0 : index
    %256 = vector.load %arg2[%c9, %c0_130, %c0_131] : memref<12x128x128xf32, #tpu.memory_space<vmem>>, vector<1x128x128xf32>
    %257 = vector.shape_cast %256 : vector<1x128x128xf32> to vector<128x128xf32>
    %258 = arith.addf %0, %253 : vector<8x128xf32>
    %259 = arith.addf %258, %255 : vector<8x128xf32>
    %cst_132 = arith.constant dense<0.000000e+00> : vector<8x128xf32>
    %260 = tpu.matmul %259, %257, %cst_132 {dimension_numbers = #tpu.dot_dimension_numbers<[1], [0], [0], [1], [0, 0, 1, 1], [], []>} : vector<8x128xf32>, vector<128x128xf32>, vector<8x128xf32> -> vector<8x128xf32>
    %261 = arith.subf %260, %255 : vector<8x128xf32>
    %cst_133 = arith.constant dense<0.000000e+00> : vector<8x50xf32>
    %262 = tpu.matmul %261, %1, %cst_133 {dimension_numbers = #tpu.dot_dimension_numbers<[1], [0], [0], [1], [0, 0, 1, 1], [], []>} : vector<8x128xf32>, vector<128x50xf32>, vector<8x50xf32> -> vector<8x50xf32>
    %263 = arith.addf %262, %8 : vector<8x50xf32>
    %cst_134 = arith.constant 0.000000e+00 : f32
    %264 = vector.broadcast %cst_134 : f32 to vector<8x50xf32>
    %265 = arith.maximumf %263, %264 : vector<8x50xf32>
    %cst_135 = arith.constant dense<0.000000e+00> : vector<8x50xf32>
    %266 = tpu.matmul %265, %2, %cst_135 {dimension_numbers = #tpu.dot_dimension_numbers<[1], [0], [0], [1], [0, 0, 1, 1], [], []>} : vector<8x50xf32>, vector<50x50xf32>, vector<8x50xf32> -> vector<8x50xf32>
    %267 = arith.addf %266, %11 : vector<8x50xf32>
    %cst_136 = arith.constant 0.000000e+00 : f32
    %268 = vector.broadcast %cst_136 : f32 to vector<8x50xf32>
    %269 = arith.maximumf %267, %268 : vector<8x50xf32>
    %cst_137 = arith.constant dense<0.000000e+00> : vector<8x50xf32>
    %270 = tpu.matmul %269, %3, %cst_137 {dimension_numbers = #tpu.dot_dimension_numbers<[1], [0], [0], [1], [0, 0, 1, 1], [], []>} : vector<8x50xf32>, vector<50x50xf32>, vector<8x50xf32> -> vector<8x50xf32>
    %271 = arith.addf %270, %14 : vector<8x50xf32>
    %cst_138 = arith.constant 0.000000e+00 : f32
    %272 = vector.broadcast %cst_138 : f32 to vector<8x50xf32>
    %273 = arith.maximumf %271, %272 : vector<8x50xf32>
    %cst_139 = arith.constant dense<0.000000e+00> : vector<8x50xf32>
    %274 = tpu.matmul %273, %4, %cst_139 {dimension_numbers = #tpu.dot_dimension_numbers<[1], [0], [0], [1], [0, 0, 1, 1], [], []>} : vector<8x50xf32>, vector<50x50xf32>, vector<8x50xf32> -> vector<8x50xf32>
    %275 = arith.addf %274, %17 : vector<8x50xf32>
    %cst_140 = arith.constant 0.000000e+00 : f32
    %276 = vector.broadcast %cst_140 : f32 to vector<8x50xf32>
    %277 = arith.maximumf %275, %276 : vector<8x50xf32>
    %cst_141 = arith.constant dense<0.000000e+00> : vector<8x128xf32>
    %278 = tpu.matmul %277, %5, %cst_141 {dimension_numbers = #tpu.dot_dimension_numbers<[1], [0], [0], [1], [0, 0, 1, 1], [], []>} : vector<8x50xf32>, vector<50x128xf32>, vector<8x128xf32> -> vector<8x128xf32>
    %279 = arith.addf %278, %20 : vector<8x128xf32>
    %280 = arith.subf %260, %279 : vector<8x128xf32>
    %281 = arith.subf %255, %280 : vector<8x128xf32>
    %c10 = arith.constant 10 : index
    %c0_142 = arith.constant 0 : index
    %c0_143 = arith.constant 0 : index
    %282 = vector.load %arg2[%c10, %c0_142, %c0_143] : memref<12x128x128xf32, #tpu.memory_space<vmem>>, vector<1x128x128xf32>
    %283 = vector.shape_cast %282 : vector<1x128x128xf32> to vector<128x128xf32>
    %284 = arith.addf %0, %279 : vector<8x128xf32>
    %285 = arith.addf %284, %281 : vector<8x128xf32>
    %cst_144 = arith.constant dense<0.000000e+00> : vector<8x128xf32>
    %286 = tpu.matmul %285, %283, %cst_144 {dimension_numbers = #tpu.dot_dimension_numbers<[1], [0], [0], [1], [0, 0, 1, 1], [], []>} : vector<8x128xf32>, vector<128x128xf32>, vector<8x128xf32> -> vector<8x128xf32>
    %287 = arith.subf %286, %281 : vector<8x128xf32>
    %cst_145 = arith.constant dense<0.000000e+00> : vector<8x50xf32>
    %288 = tpu.matmul %287, %1, %cst_145 {dimension_numbers = #tpu.dot_dimension_numbers<[1], [0], [0], [1], [0, 0, 1, 1], [], []>} : vector<8x128xf32>, vector<128x50xf32>, vector<8x50xf32> -> vector<8x50xf32>
    %289 = arith.addf %288, %8 : vector<8x50xf32>
    %cst_146 = arith.constant 0.000000e+00 : f32
    %290 = vector.broadcast %cst_146 : f32 to vector<8x50xf32>
    %291 = arith.maximumf %289, %290 : vector<8x50xf32>
    %cst_147 = arith.constant dense<0.000000e+00> : vector<8x50xf32>
    %292 = tpu.matmul %291, %2, %cst_147 {dimension_numbers = #tpu.dot_dimension_numbers<[1], [0], [0], [1], [0, 0, 1, 1], [], []>} : vector<8x50xf32>, vector<50x50xf32>, vector<8x50xf32> -> vector<8x50xf32>
    %293 = arith.addf %292, %11 : vector<8x50xf32>
    %cst_148 = arith.constant 0.000000e+00 : f32
    %294 = vector.broadcast %cst_148 : f32 to vector<8x50xf32>
    %295 = arith.maximumf %293, %294 : vector<8x50xf32>
    %cst_149 = arith.constant dense<0.000000e+00> : vector<8x50xf32>
    %296 = tpu.matmul %295, %3, %cst_149 {dimension_numbers = #tpu.dot_dimension_numbers<[1], [0], [0], [1], [0, 0, 1, 1], [], []>} : vector<8x50xf32>, vector<50x50xf32>, vector<8x50xf32> -> vector<8x50xf32>
    %297 = arith.addf %296, %14 : vector<8x50xf32>
    %cst_150 = arith.constant 0.000000e+00 : f32
    %298 = vector.broadcast %cst_150 : f32 to vector<8x50xf32>
    %299 = arith.maximumf %297, %298 : vector<8x50xf32>
    %cst_151 = arith.constant dense<0.000000e+00> : vector<8x50xf32>
    %300 = tpu.matmul %299, %4, %cst_151 {dimension_numbers = #tpu.dot_dimension_numbers<[1], [0], [0], [1], [0, 0, 1, 1], [], []>} : vector<8x50xf32>, vector<50x50xf32>, vector<8x50xf32> -> vector<8x50xf32>
    %301 = arith.addf %300, %17 : vector<8x50xf32>
    %cst_152 = arith.constant 0.000000e+00 : f32
    %302 = vector.broadcast %cst_152 : f32 to vector<8x50xf32>
    %303 = arith.maximumf %301, %302 : vector<8x50xf32>
    %cst_153 = arith.constant dense<0.000000e+00> : vector<8x128xf32>
    %304 = tpu.matmul %303, %5, %cst_153 {dimension_numbers = #tpu.dot_dimension_numbers<[1], [0], [0], [1], [0, 0, 1, 1], [], []>} : vector<8x50xf32>, vector<50x128xf32>, vector<8x128xf32> -> vector<8x128xf32>
    %305 = arith.addf %304, %20 : vector<8x128xf32>
    %306 = arith.subf %286, %305 : vector<8x128xf32>
    %307 = arith.subf %281, %306 : vector<8x128xf32>
    %c11 = arith.constant 11 : index
    %c0_154 = arith.constant 0 : index
    %c0_155 = arith.constant 0 : index
    %308 = vector.load %arg2[%c11, %c0_154, %c0_155] : memref<12x128x128xf32, #tpu.memory_space<vmem>>, vector<1x128x128xf32>
    %309 = vector.shape_cast %308 : vector<1x128x128xf32> to vector<128x128xf32>
    %310 = arith.addf %0, %305 : vector<8x128xf32>
    %311 = arith.addf %310, %307 : vector<8x128xf32>
    %cst_156 = arith.constant dense<0.000000e+00> : vector<8x128xf32>
    %312 = tpu.matmul %311, %309, %cst_156 {dimension_numbers = #tpu.dot_dimension_numbers<[1], [0], [0], [1], [0, 0, 1, 1], [], []>} : vector<8x128xf32>, vector<128x128xf32>, vector<8x128xf32> -> vector<8x128xf32>
    %313 = arith.subf %312, %307 : vector<8x128xf32>
    %cst_157 = arith.constant dense<0.000000e+00> : vector<8x50xf32>
    %314 = tpu.matmul %313, %1, %cst_157 {dimension_numbers = #tpu.dot_dimension_numbers<[1], [0], [0], [1], [0, 0, 1, 1], [], []>} : vector<8x128xf32>, vector<128x50xf32>, vector<8x50xf32> -> vector<8x50xf32>
    %315 = arith.addf %314, %8 : vector<8x50xf32>
    %cst_158 = arith.constant 0.000000e+00 : f32
    %316 = vector.broadcast %cst_158 : f32 to vector<8x50xf32>
    %317 = arith.maximumf %315, %316 : vector<8x50xf32>
    %cst_159 = arith.constant dense<0.000000e+00> : vector<8x50xf32>
    %318 = tpu.matmul %317, %2, %cst_159 {dimension_numbers = #tpu.dot_dimension_numbers<[1], [0], [0], [1], [0, 0, 1, 1], [], []>} : vector<8x50xf32>, vector<50x50xf32>, vector<8x50xf32> -> vector<8x50xf32>
    %319 = arith.addf %318, %11 : vector<8x50xf32>
    %cst_160 = arith.constant 0.000000e+00 : f32
    %320 = vector.broadcast %cst_160 : f32 to vector<8x50xf32>
    %321 = arith.maximumf %319, %320 : vector<8x50xf32>
    %cst_161 = arith.constant dense<0.000000e+00> : vector<8x50xf32>
    %322 = tpu.matmul %321, %3, %cst_161 {dimension_numbers = #tpu.dot_dimension_numbers<[1], [0], [0], [1], [0, 0, 1, 1], [], []>} : vector<8x50xf32>, vector<50x50xf32>, vector<8x50xf32> -> vector<8x50xf32>
    %323 = arith.addf %322, %14 : vector<8x50xf32>
    %cst_162 = arith.constant 0.000000e+00 : f32
    %324 = vector.broadcast %cst_162 : f32 to vector<8x50xf32>
    %325 = arith.maximumf %323, %324 : vector<8x50xf32>
    %cst_163 = arith.constant dense<0.000000e+00> : vector<8x50xf32>
    %326 = tpu.matmul %325, %4, %cst_163 {dimension_numbers = #tpu.dot_dimension_numbers<[1], [0], [0], [1], [0, 0, 1, 1], [], []>} : vector<8x50xf32>, vector<50x50xf32>, vector<8x50xf32> -> vector<8x50xf32>
    %327 = arith.addf %326, %17 : vector<8x50xf32>
    %cst_164 = arith.constant 0.000000e+00 : f32
    %328 = vector.broadcast %cst_164 : f32 to vector<8x50xf32>
    %329 = arith.maximumf %327, %328 : vector<8x50xf32>
    %cst_165 = arith.constant dense<0.000000e+00> : vector<8x128xf32>
    %330 = tpu.matmul %329, %5, %cst_165 {dimension_numbers = #tpu.dot_dimension_numbers<[1], [0], [0], [1], [0, 0, 1, 1], [], []>} : vector<8x50xf32>, vector<50x128xf32>, vector<8x128xf32> -> vector<8x128xf32>
    %331 = arith.addf %330, %20 : vector<8x128xf32>
    %c0_166 = arith.constant 0 : index
    %c0_167 = arith.constant 0 : index
    %332 = vector.load %arg13[%c0_166, %c0_167] : memref<8x128xf32, #tpu.memory_space<vmem>>, vector<8x128xf32>
    tpu.vector_store %arg13[%c0_166, %c0_167], %331 {strides = array<i32>} : memref<8x128xf32, #tpu.memory_space<vmem>>, vector<8x128xf32>,
    return
  }
  func.func @transform_0(%arg0: i32) -> (i32, i32) {
    %c0_i32 = arith.constant 0 : i32
    %c0_i32_0 = arith.constant 0 : i32
    return %arg0, %c0_i32 : i32, i32
  }
  func.func @transform_1(%arg0: i32) -> (i32, i32, i32) {
    %c0_i32 = arith.constant 0 : i32
    %c0_i32_0 = arith.constant 0 : i32
    %c0_i32_1 = arith.constant 0 : i32
    %c0_i32_2 = arith.constant 0 : i32
    return %c0_i32, %c0_i32_0, %c0_i32_1 : i32, i32, i32
  }
  func.func @transform_2(%arg0: i32) -> (i32, i32) {
    %c0_i32 = arith.constant 0 : i32
    %c0_i32_0 = arith.constant 0 : i32
    %c0_i32_1 = arith.constant 0 : i32
    return %c0_i32, %c0_i32_0 : i32, i32
  }
  func.func @transform_3(%arg0: i32) -> (i32, i32) {
    %c0_i32 = arith.constant 0 : i32
    %c0_i32_0 = arith.constant 0 : i32
    %c0_i32_1 = arith.constant 0 : i32
    return %c0_i32, %c0_i32_0 : i32, i32
  }
  func.func @transform_4(%arg0: i32) -> (i32, i32) {
    %c0_i32 = arith.constant 0 : i32
    %c0_i32_0 = arith.constant 0 : i32
    %c0_i32_1 = arith.constant 0 : i32
    return %c0_i32, %c0_i32_0 : i32, i32
  }
  func.func @transform_5(%arg0: i32) -> (i32, i32) {
    %c0_i32 = arith.constant 0 : i32
    %c0_i32_0 = arith.constant 0 : i32
    %c0_i32_1 = arith.constant 0 : i32
    return %c0_i32, %c0_i32_0 : i32, i32
  }
  func.func @transform_6(%arg0: i32) -> (i32, i32) {
    %c0_i32 = arith.constant 0 : i32
    %c0_i32_0 = arith.constant 0 : i32
    %c0_i32_1 = arith.constant 0 : i32
    return %c0_i32, %c0_i32_0 : i32, i32
  }
  func.func @transform_7(%arg0: i32) -> (i32, i32) {
    %c0_i32 = arith.constant 0 : i32
    %c0_i32_0 = arith.constant 0 : i32
    %c0_i32_1 = arith.constant 0 : i32
    return %c0_i32, %c0_i32_0 : i32, i32
  }
  func.func @transform_8(%arg0: i32) -> (i32, i32) {
    %c0_i32 = arith.constant 0 : i32
    %c0_i32_0 = arith.constant 0 : i32
    %c0_i32_1 = arith.constant 0 : i32
    return %c0_i32, %c0_i32_0 : i32, i32
  }
  func.func @transform_9(%arg0: i32) -> (i32, i32) {
    %c0_i32 = arith.constant 0 : i32
    %c0_i32_0 = arith.constant 0 : i32
    %c0_i32_1 = arith.constant 0 : i32
    return %c0_i32, %c0_i32_0 : i32, i32
  }
  func.func @transform_10(%arg0: i32) -> (i32, i32) {
    %c0_i32 = arith.constant 0 : i32
    %c0_i32_0 = arith.constant 0 : i32
    %c0_i32_1 = arith.constant 0 : i32
    return %c0_i32, %c0_i32_0 : i32, i32
  }
  func.func @transform_11(%arg0: i32) -> (i32, i32) {
    %c0_i32 = arith.constant 0 : i32
    %c0_i32_0 = arith.constant 0 : i32
    %c0_i32_1 = arith.constant 0 : i32
    return %c0_i32, %c0_i32_0 : i32, i32
  }
  func.func @transform_12(%arg0: i32) -> (i32, i32) {
    %c0_i32 = arith.constant 0 : i32
    %c0_i32_0 = arith.constant 0 : i32
    return %arg0, %c0_i32 : i32, i32
  }
}

</mosaic_0001>

<bundles_post_ra>
// kernel: tpu_custom_call.1
= control target key start
LH: loop header
LB: loop body
LE: loop exit
PB: predicated region body
PF: predicated region fallthrough
CT: control target
= control target key end

     0   :  { %17 = vsyncpa [#allocation3], 0  ;;  %s10801_s0 = inlined_call_operand.vmem [shape: f32[8,128], index: 0, kind: input, shape index: {}]   ;;  %s10802_s1 = inlined_call_operand.hbm [shape: f32[12,128,128], index: 1, kind: input, shape index: {}]   ;;  %s10803_s2 = inlined_call_operand.vmem [shape: f32[128,50], index: 2, kind: input, shape index: {}]   ;;  %s10804_s3 = inlined_call_operand.vmem [shape: f32[1,50], index: 3, kind: input, shape index: {}]   ;;  %s10805_s4 = inlined_call_operand.vmem [shape: f32[50,50], index: 4, kind: input, shape index: {}]   ;;  %s10806_s5 = inlined_call_operand.vmem [shape: f32[1,50], index: 5, kind: input, shape index: {}]   ;;  %s10807_s6 = inlined_call_operand.vmem [shape: f32[50,50], index: 6, kind: input, shape index: {}]   ;;  %s10808_s7 = inlined_call_operand.vmem [shape: f32[1,50], index: 7, kind: input, shape index: {}]   ;;  %s10809_s8 = inlined_call_operand.vmem [shape: f32[50,50], index: 8, kind: input, shape index: {}]   ;;  %s10810_s9 = inlined_call_operand.vmem [shape: f32[1,50], index: 9, kind: input, shape index: {}]   ;;  %s10811_s10 = inlined_call_operand.hbm [shape: f32[50,128], index: 10, kind: input, shape index: {}]   ;;  %s10812_s11 = inlined_call_operand.vmem [shape: f32[1,128], index: 11, kind: input, shape index: {}]   ;;  %s10813_s12 = inlined_call_operand.hbm [shape: f32[8,128], index: 12, kind: output, shape index: {}]  }
   0x1   :  { %18 = vsyncpa [#allocation6], 0 }
   0x2   :  { %19 = vsyncpa [#allocation4], 0  ;;  %s9330_s21 = smov [#allocation2]   ;;  %s9258_s25 = scalar_lea.hbm %s10802_s1, 24576 }
   0x3   :  { %s27_s22 = sshll.u32 %s9330_s21, 4  ;;  %p9259_p0 = scmp.ne.s32.totalorder %s10802_s1, %s9258_s25  ;;  %s28_s22 = int_to_ptr.vmem [resolvable:$true] %s27_s22 }
   0x4   :  { %p9262_p1 = scmp.lt.u32.totalorder %s9258_s25, %s10802_s1 }
   0x6   :  { %p9264_p2 = pnand %p9262_p1, %p9259_p0 }
   0x8   :  { %9267 = shalt.err (!%p9264_p2)
}
   0x9   :  { %s9268_s30 = scalar_lea.vmem %s28_s22, 24576  ;;  %p9273_p4 = scmp.lt.s32.totalorder %s28_s22, %s28_s22 }
   0xa   :  { %p9269_p3 = scmp.ne.s32.totalorder %s28_s22, %s9268_s30  ;;  %p9274_p5 = scmp.lt.s32.totalorder %s9268_s30, %s9268_s30 }
   0xc   :  { %p9275_p6 = por %p9274_p5, %p9273_p4 }
   0xe   :  { %p9276_p7 = pnand %p9275_p6, %p9269_p3 }
  0x10   :  { %9279 = shalt.err (!%p9276_p7)
}
  0x11   :  { %s9331_s13 = smov 128   ;;  %s9332_s14 = smov 8  }
  0x12   :  { %33 = dma.hbm_to_vmem [thread:$0]  %s10802_s1, 24576, %s28_s22, [#allocation3], %s9331_s13, %s9331_s13, %s9332_s14  }
  0x13   :  { %s9333_s17 = smov [#allocation5]   ;;  %s9280_s21 = scalar_lea.hbm %s10811_s10, 896 }
  0x14   :  { %s55_s18 = sshll.u32 %s9333_s17, 4  ;;  %p9281_p8 = scmp.ne.s32.totalorder %s10811_s10, %s9280_s21  ;;  %s56_s18 = int_to_ptr.vmem [resolvable:$true] %s55_s18 }
  0x15   :  { %p9284_p9 = scmp.lt.u32.totalorder %s9280_s21, %s10811_s10 }
  0x17   :  { %p9286_p10 = pnand %p9284_p9, %p9281_p8 }
  0x19   :  { %9289 = shalt.err (!%p9286_p10)
}
  0x1a   :  { %s9290_s27 = scalar_lea.vmem %s56_s18, 896  ;;  %p9295_p12 = scmp.lt.s32.totalorder %s56_s18, %s56_s18 }
  0x1b   :  { %p9291_p11 = scmp.ne.s32.totalorder %s56_s18, %s9290_s27  ;;  %p9296_p13 = scmp.lt.s32.totalorder %s9290_s27, %s9290_s27 }
  0x1d   :  { %p9297_p0 = por %p9296_p13, %p9295_p12 }
  0x1f   :  { %p9298_p1 = pnand %p9297_p0, %p9291_p11 }
  0x21   :  { %9301 = shalt.err (!%p9298_p1)
}
  0x22   :  { %61 = dma.hbm_to_vmem [thread:$0]  %s10811_s10, 896, %s56_s18, [#allocation6], %s9331_s13, %s9331_s13, %s9332_s14  }
  0x23   :  { %9324 = dma.done.wait [#allocation3], 24576  }
  0x24   :  { %9325 = vsyncadd [#allocation3], 4294942720 }
  0x25   :  { %9326 = dma.done.wait [#allocation6], 896  }
  0x26   :  { %9327 = vsyncadd [#allocation6], 4294966400  ;;  %v9334_v0 = vmov 0.0|0.0   ;;  %vm9335_vm0 = vmmov 0   ;;  %v9336_v1 = vmov 0.0   ;;  %v150_v2 = vld [vmem:[#allocation2] sm:$0xff] }
  0x27   :  { %8222 = vmatprep.subr.bf16.mxu0 %v9334_v0  ;;  %6598 = vmatprep.mubr.msk.f32.mxu0 %vm9335_vm0, %v9336_v1  ;;  %v151_v3 = vld [vmem:[#allocation2 + $0x8] sm:$0xff]  ;;  %v152_v4 = vld [vmem:[#allocation2 + $0x10] sm:$0xff]  ;;  %v153_v6 = vld [vmem:[#allocation2 + $0x18] sm:$0xff]  ;;  %vm313_vm1 = vcmask 1041408   ;;  %vm309_vm2 = vcmask 408576  }
  0x28   :  { %8246 = vmatprep.subr.bf16.mxu1 %v9334_v0  ;;  %6633 = vmatprep.mubr.msk.f32.mxu1 %vm9335_vm0, %v9336_v1  ;;  %v8223_v5 = vpack.c.bf16 %v151_v3, %v150_v2  ;;  %v8226_v7 = vpack.c.bf16 %v153_v6, %v152_v4  ;;  %v154_v8 = vld [vmem:[#allocation2 + $0x20] sm:$0xff]  ;;  %v155_v9 = vld [vmem:[#allocation2 + $0x28] sm:$0xff]  ;;  %v73_v12 = vld [vmem:[%s10803_s2 + $0x10] sm:$0xff] }
  0x29   :  { %v71_v10 = vld [vmem:[%s10803_s2] sm:$0xff]  ;;  %v72_v11 = vld [vmem:[%s10803_s2 + $0x8] sm:$0xff]  ;;  %v74_v13 = vld [vmem:[%s10803_s2 + $0x18] sm:$0xff]  ;;  %v8229_v14 = vpack.c.bf16 %v155_v9, %v154_v8 }
  0x2a   :  { %8224 = vmatpush3.bf16.msra.mxu0 %v8223_v5  ;;  %v9446_v15 = vpack.c.bf16 %v72_v11, %v71_v10  ;;  %v156_v16 = vld [vmem:[#allocation2 + $0x30] sm:$0xff]  ;;  %v157_v17 = vld [vmem:[#allocation2 + $0x38] sm:$0xff]  ;;  %v9450_v18 = vpack.c.bf16 %v74_v13, %v73_v12  ;;  %v75_v19 = vld [vmem:[%s10803_s2 + $0x20] sm:$0xff] }
  0x2b   :  { %8225 = vmatprep.subr.bf16.mxu0 %v9334_v0  ;;  %v76_v20 = vld [vmem:[%s10803_s2 + $0x28] sm:$0xff]  ;;  %v8232_v21 = vpack.c.bf16 %v157_v17, %v156_v16  ;;  %v158_v22 = vld [vmem:[#allocation2 + $0x40] sm:$0xff]  ;;  %v77_v25 = vld [vmem:[%s10803_s2 + $0x30] sm:$0xff] }
  0x2c   :  { %8248 = vmatpush3.bf16.msra.mxu1 %v9446_v15  ;;  %v159_v23 = vld [vmem:[#allocation2 + $0x48] sm:$0xff]  ;;  %v9461_v24 = vpack.c.bf16 %v76_v20, %v75_v19  ;;  %v78_v26 = vld [vmem:[%s10803_s2 + $0x38] sm:$0xff]  ;;  %v160_v28 = vld [vmem:[#allocation2 + $0x50] sm:$0xff] }
  0x2d   :  { %8249 = vmatprep.subr.bf16.mxu1 %v9334_v0  ;;  %v8235_v27 = vpack.c.bf16 %v159_v23, %v158_v22  ;;  %v161_v29 = vld [vmem:[#allocation2 + $0x58] sm:$0xff]  ;;  %v9472_v30 = vpack.c.bf16 %v78_v26, %v77_v25  ;;  %v79_v31 = vld [vmem:[%s10803_s2 + $0x40] sm:$0xff]  ;;  %v80_v32 = vld [vmem:[%s10803_s2 + $0x48] sm:$0xff] }
  0x2e   :  { %8227 = vmatpush3.bf16.msra.mxu0 %v8226_v7  ;;  %v8238_v33 = vpack.c.bf16 %v161_v29, %v160_v28  ;;  %v162_v34 = vld [vmem:[#allocation2 + $0x60] sm:$0xff]  ;;  %v163_v35 = vld [vmem:[#allocation2 + $0x68] sm:$0xff]  ;;  %v9483_v36 = vpack.c.bf16 %v80_v32, %v79_v31  ;;  %v81_v37 = vld [vmem:[%s10803_s2 + $0x50] sm:$0xff] }
  0x2f   :  { %8228 = vmatprep.subr.bf16.mxu0 %v9334_v0  ;;  %v82_v38 = vld [vmem:[%s10803_s2 + $0x58] sm:$0xff]  ;;  %v8241_v39 = vpack.c.bf16 %v163_v35, %v162_v34  ;;  %v164_v40 = vld [vmem:[#allocation2 + $0x70] sm:$0xff]  ;;  %v83_v43 = vld [vmem:[%s10803_s2 + $0x60] sm:$0xff] }
  0x30   :  { %8251 = vmatpush3.bf16.msra.mxu1 %v9450_v18  ;;  %v165_v41 = vld [vmem:[#allocation2 + $0x78] sm:$0xff]  ;;  %v9494_v42 = vpack.c.bf16 %v82_v38, %v81_v37  ;;  %v84_v44 = vld [vmem:[%s10803_s2 + $0x68] sm:$0xff]  ;;  %v9506_v46 = vld [vmem:[%s10801_s0] sm:$0xff] }
  0x31   :  { %8252 = vmatprep.subr.bf16.mxu1 %v9334_v0  ;;  %v8244_v45 = vpack.c.bf16 %v165_v41, %v164_v40  ;;  %v9510_v47 = vpack.c.bf16 %v84_v44, %v83_v43  ;;  %v166_v48 = vadd.f32 %v9506_v46, %v9506_v46  ;;  %v85_v49 = vld [vmem:[%s10803_s2 + $0x70] sm:$0xff]  ;;  %v86_v50 = vld [vmem:[%s10803_s2 + $0x78] sm:$0xff]  ;;  %v87_v52 = vld [vmem:[%s10805_s4] sm:$0xff] }
  0x32   :  { %8230 = vmatpush3.bf16.msra.mxu0 %v8229_v14  ;;  %v9523_v51 = vpack.c.bf16 %v86_v50, %v85_v49  ;;  %v88_v53 = vld [vmem:[%s10805_s4 + $0x8] sm:$0xff]  ;;  %v89_v54 = vld [vmem:[%s10805_s4 + $0x10] sm:$0xff]  ;;  %v90_v56 = vld [vmem:[%s10805_s4 + $0x18] sm:$0xff] }
  0x33   :  { %8231 = vmatprep.subr.bf16.mxu0 %v9334_v0  ;;  %v9539_v55 = vpack.c.bf16 %v88_v53, %v87_v52  ;;  %v9545_v57 = vpack.c.bf16 %v90_v56, %v89_v54  ;;  %v91_v60 = vld [vmem:[%s10805_s4 + $0x20] sm:$0xff]  ;;  %v92_v61 = vld [vmem:[%s10805_s4 + $0x28] sm:$0xff]  ;;  %v9568_v63 = vld [vmem:[%s10805_s4 + $0x30] sm:$0x3] }
  0x34   :  { %8254 = vmatpush3.bf16.msra.mxu1 %v9461_v24  ;;  %v9561_v62 = vpack.c.bf16 %v92_v61, %v91_v60  ;;  %v94_v2 = vld [vmem:[%s10807_s6] sm:$0xff]  ;;  %v95_v3 = vld [vmem:[%s10807_s6 + $0x8] sm:$0xff]  ;;  %v96_v4 = vld [vmem:[%s10807_s6 + $0x10] sm:$0xff] }
  0x35   :  { %8255 = vmatprep.subr.bf16.mxu1 %v9334_v0  ;;  %v9582_v5 = vpack.c.bf16 %v95_v3, %v94_v2  ;;  %v97_v6 = vld [vmem:[%s10807_s6 + $0x18] sm:$0xff]  ;;  %v9596_v8 = vld [vmem:[%s10804_s3] ss:$0 sm:$0xff]  ;;  %v99_v14 = vld [vmem:[%s10807_s6 + $0x28] sm:$0xff] }
  0x36   :  { %8233 = vmatpush3.bf16.msra.mxu0 %v8232_v21  ;;  %v9588_v7 = vpack.c.bf16 %v97_v6, %v96_v4  ;;  %v98_v13 = vld [vmem:[%s10807_s6 + $0x20] sm:$0xff]  ;;  %v9615_v17 = vld [vmem:[%s10807_s6 + $0x30] sm:$0x3]  ;;  %v102_v20 = vld [vmem:[%s10809_s8 + $0x8] sm:$0xff] }
  0x37   :  { %8234 = vmatprep.subr.bf16.mxu0 %v9334_v0  ;;  %v9608_v16 = vpack.c.bf16 %v99_v14, %v98_v13  ;;  %v101_v19 = vld [vmem:[%s10809_s8] sm:$0xff]  ;;  %v103_v21 = vld [vmem:[%s10809_s8 + $0x10] sm:$0xff]  ;;  %v104_v23 = vld [vmem:[%s10809_s8 + $0x18] sm:$0xff] }
  0x38   :  { %8257 = vmatpush3.bf16.msra.mxu1 %v9472_v30  ;;  %v9629_v22 = vpack.c.bf16 %v102_v20, %v101_v19  ;;  %v9635_v25 = vpack.c.bf16 %v104_v23, %v103_v21  ;;  %v9643_v26 = vld [vmem:[%s10806_s5] ss:$0 sm:$0xff]  ;;  %v9662_v35 = vld [vmem:[%s10809_s8 + $0x30] sm:$0x3]  ;;  %v109_v38 = vld [vmem:[#allocation5 + $0x8] sm:$0xff] }
  0x39   :  { %8258 = vmatprep.subr.bf16.mxu1 %v9334_v0  ;;  %v105_v32 = vld [vmem:[%s10809_s8 + $0x20] sm:$0xff]  ;;  %v111_v41 = vld [vmem:[#allocation5 + $0x18] sm:$0xff]  ;;  %v113_v53 = vld [vmem:[#allocation5 + $0x28] sm:$0xff] }
  0x3a   :  { %8236 = vmatpush3.bf16.msra.mxu0 %v8235_v27  ;;  %v108_v37 = vld [vmem:[#allocation5] sm:$0xff]  ;;  %v9688_v56 = vld [vmem:[#allocation5 + $0x30] sm:$0x3]  ;;  %v622_v60 = vld [vmem:[#allocation2 + $0x88] sm:$0xff] }
  0x3b   :  { %8237 = vmatprep.subr.bf16.mxu0 %v9334_v0  ;;  %v9667_v40 = vpack.c.bf16 %v109_v38, %v108_v37  ;;  %v9678_v44 = vld [vmem:[%s10808_s7] ss:$0 sm:$0xff]  ;;  %v623_v61 = vld [vmem:[#allocation2 + $0x90] sm:$0xff]  ;;  %v624_v3 = vld [vmem:[#allocation2 + $0x98] sm:$0xff] }
  0x3c   :  { %8260 = vmatpush3.bf16.msra.mxu1 %v9483_v36  ;;  %v112_v52 = vld [vmem:[#allocation5 + $0x20] sm:$0xff]  ;;  %v8310_v4 = vpack.c.bf16 %v624_v3, %v623_v61  ;;  %v630_v19 = vld [vmem:[#allocation2 + $0xc8] sm:$0xff]  ;;  %v631_v21 = vld [vmem:[#allocation2 + $0xd0] sm:$0xff] }
  0x3d   :  { %8261 = vmatprep.subr.bf16.mxu1 %v9334_v0  ;;  %v9684_v54 = vpack.c.bf16 %v113_v53, %v112_v52  ;;  %v625_v6 = vld [vmem:[#allocation2 + $0xa0] sm:$0xff]  ;;  %v632_v23 = vld [vmem:[#allocation2 + $0xd8] sm:$0xff]  ;;  %v634_v38 = vld [vmem:[#allocation2 + $0xe8] sm:$0xff] }
  0x3e   :  { %8239 = vmatpush3.bf16.msra.mxu0 %v8238_v33  ;;  %v106_v33 = vld [vmem:[%s10809_s8 + $0x28] sm:$0xff]  ;;  %v629_v14 = vld [vmem:[#allocation2 + $0xc0] sm:$0xff] }
  0x3f   :  { %8240 = vmatprep.subr.bf16.mxu0 %v9334_v0  ;;  %v9655_v34 = vpack.c.bf16 %v106_v33, %v105_v32  ;;  %v8319_v20 = vpack.c.bf16 %v630_v19, %v629_v14  ;;  %v633_v37 = vld [vmem:[#allocation2 + $0xe0] sm:$0xff] }
  0x40   :  { %8263 = vmatpush3.bf16.msra.mxu1 %v9494_v42 }
  0x41   :  { %8264 = vmatprep.subr.bf16.mxu1 %v9334_v0 }
  0x42   :  { %8242 = vmatpush3.bf16.msra.mxu0 %v8241_v39  ;;  %v110_v39 = vld [vmem:[#allocation5 + $0x10] sm:$0xff] }
  0x43   :  { %8243 = vmatprep.subr.bf16.mxu0 %v9334_v0  ;;  %v9670_v43 = vpack.c.bf16 %v111_v41, %v110_v39  ;;  %v8325_v39 = vpack.c.bf16 %v634_v38, %v633_v37  ;;  %v635_v41 = vld [vmem:[#allocation2 + $0xf0] sm:$0xff]  ;;  %v1082_v37 = vld [vmem:[#allocation2 + $0x118] sm:$0xff] }
  0x44   :  { %8266 = vmatpush3.bf16.msra.mxu1 %v9510_v47 }
  0x45   :  { %8267 = vmatprep.subr.bf16.mxu1 %v9334_v0 }
  0x46   :  { %8245 = vmatpush3.bf16.msra.mxu0 %v8244_v45 }
  0x47   :  { %8270 = vmatprep.subr.bf16.mxu0 %v9334_v0 }
  0x48   :  { %8269 = vmatpush3.bf16.msra.mxu1 %v9523_v51 }
  0x49   :  { %6599 = vmatmul.mubr.f32.vlgmr.msra.gmra.mrb[0].mxu0 %v166_v48  ;;  %8279 = vmatprep.subr.bf16.mxu1 %v9334_v0 }
  0x4a   :  { %6650 = vmatprep.mubr.msk.f32.mxu0 %vm9335_vm0, %v9336_v1  ;;  %8272 = vmatpush3.bf16.msra.mxu0 %v9539_v55 }
  0x4b   :  { %8273 = vmatprep.subr.bf16.mxu0 %v9334_v0 }
  0x4e   :  { %8275 = vmatpush3.bf16.msra.mxu0 %v9545_v57 }
  0x4f   :  { %8276 = vmatprep.subr.bf16.mxu0 %v9334_v0 }
  0x52   :  { %8278 = vmatpush3.bf16.msra.mxu0 %v9561_v62 }
  0x53   :  { %6648 = vmatprep.subr.mxu0 %v9336_v1 }
  0x56   :  { %6649 = vmatpush3.msk.msra.mxu0 %vm313_vm1, %v9568_v63 }
  0x57   :  { %8288 = vmatprep.subr.bf16.mxu0 %v9334_v0 }
 0x11c   :  { %v9550_v58 = vpop.f32.mrb[0].mxu0 }
 0x11d   :  { %v6600_v59 = vpop.f32.mrb[1].mxu0  ;;  %6634 = vmatmul.mubr.f32.vlgmr.msra.gmra.mrb[0].mxu1 %v9550_v58 }
 0x11e   :  { %6667 = vmatprep.mubr.msk.f32.mxu1 %vm9335_vm0, %v9336_v1  ;;  %8281 = vmatpush3.bf16.msra.mxu1 %v9582_v5  ;;  %v621_v59 = vld [vmem:[#allocation2 + $0x80] sm:$0xff] }
 0x11f   :  { %8282 = vmatprep.subr.bf16.mxu1 %v9334_v0  ;;  %v8307_v2 = vpack.c.bf16 %v622_v60, %v621_v59 }
 0x122   :  { %8284 = vmatpush3.bf16.msra.mxu1 %v9588_v7 }
 0x123   :  { %8285 = vmatprep.subr.bf16.mxu1 %v9334_v0 }
 0x126   :  { %8287 = vmatpush3.bf16.msra.mxu1 %v9608_v16 }
 0x127   :  { %6665 = vmatprep.subr.mxu1 %v9336_v1 }
 0x12a   :  { %6666 = vmatpush3.msk.msra.mxu1 %vm313_vm1, %v9615_v17 }
 0x12b   :  { %8297 = vmatprep.subr.bf16.mxu1 %v9334_v0 }
 0x1f0   :  { %v304_v9 = vpop.f32.mrb[0].mxu1 }
 0x1f1   :  { %v305_v10 = vadd.f32 %v9596_v8, %v304_v9  ;;  %v6635_v11 = vpop.f32.mrb[1].mxu1  ;;  %v626_v9 = vld [vmem:[#allocation2 + $0xa8] sm:$0xff] }
 0x1f2   :  { %v627_v11 = vld [vmem:[#allocation2 + $0xb0] sm:$0xff] }
 0x1f3   :  { %v308_v12 = vmax.f32 %v305_v10, 0.0  ;;  %v8313_v10 = vpack.c.bf16 %v626_v9, %v625_v6 }
 0x1f5   :  { %6651 = vmatmul.mubr.msk.f32.vlgmr.msra.gmra.mrb[2].mxu0 %vm309_vm2, %v308_v12  ;;  %v628_v12 = vld [vmem:[#allocation2 + $0xb8] sm:$0xff] }
 0x1f6   :  { %6684 = vmatprep.mubr.msk.f32.mxu0 %vm9335_vm0, %v9336_v1  ;;  %8290 = vmatpush3.bf16.msra.mxu0 %v9629_v22  ;;  %v8316_v13 = vpack.c.bf16 %v628_v12, %v627_v11 }
 0x1f7   :  { %8291 = vmatprep.subr.bf16.mxu0 %v9334_v0 }
 0x1fa   :  { %8293 = vmatpush3.bf16.msra.mxu0 %v9635_v25 }
 0x1fb   :  { %8294 = vmatprep.subr.bf16.mxu0 %v9334_v0 }
 0x1fe   :  { %8296 = vmatpush3.bf16.msra.mxu0 %v9655_v34 }
 0x1ff   :  { %6682 = vmatprep.subr.mxu0 %v9336_v1 }
 0x202   :  { %6683 = vmatpush3.msk.msra.mxu0 %vm313_vm1, %v9662_v35 }
 0x203   :  { %8306 = vmatprep.subr.bf16.mxu0 %v9334_v0 }
 0x2c8   :  { %v383_v27 = vpop.f32.mrb[2].mxu0 }
 0x2c9   :  { %v384_v28 = vadd.f32 %v9643_v26, %v383_v27  ;;  %v6652_v29 = vpop.f32.mrb[3].mxu0  ;;  %v8322_v27 = vpack.c.bf16 %v632_v23, %v631_v21 }
 0x2cb   :  { %v387_v31 = vmax.f32 %v384_v28, 0.0  ;;  %v9702_v28 = vld [vmem:[%s10810_s9] ss:$0 sm:$0xff] }
 0x2cd   :  { %6668 = vmatmul.mubr.msk.f32.vlgmr.msra.gmra.mrb[2].mxu1 %vm309_vm2, %v387_v31 }
 0x2ce   :  { %6701 = vmatprep.mubr.msk.f32.mxu1 %vm9335_vm0, %v9336_v1  ;;  %8299 = vmatpush3.bf16.msra.mxu1 %v9667_v40 }
 0x2cf   :  { %8300 = vmatprep.subr.bf16.mxu1 %v9334_v0 }
 0x2d2   :  { %8302 = vmatpush3.bf16.msra.mxu1 %v9670_v43 }
 0x2d3   :  { %8303 = vmatprep.subr.bf16.mxu1 %v9334_v0 }
 0x2d6   :  { %8305 = vmatpush3.bf16.msra.mxu1 %v9684_v54 }
 0x2d7   :  { %6699 = vmatprep.subr.mxu1 %v9336_v1 }
 0x2da   :  { %6700 = vmatpush3.msk.msra.mxu1 %vm313_vm1, %v9688_v56 }
 0x2db   :  { %8330 = vmatprep.subr.bf16.mxu1 %v9334_v0 }
 0x3a0   :  { %v460_v45 = vpop.f32.mrb[2].mxu1 }
 0x3a1   :  { %v461_v48 = vadd.f32 %v9678_v44, %v460_v45  ;;  %v6669_v49 = vpop.f32.mrb[3].mxu1  ;;  %v636_v45 = vld [vmem:[#allocation2 + $0xf8] sm:$0xff] }
 0x3a2   :  { %v9729_v49 = vld [vmem:[%s10812_s11] ss:$0 sm:$0xff] }
 0x3a3   :  { %v464_v50 = vmax.f32 %v461_v48, 0.0  ;;  %v8328_v48 = vpack.c.bf16 %v636_v45, %v635_v41  ;;  %v1084_v41 = vld [vmem:[#allocation2 + $0x128] sm:$0xff] }
 0x3a5   :  { %6685 = vmatmul.mubr.msk.f32.vlgmr.msra.gmra.mrb[4].mxu0 %vm309_vm2, %v464_v50 }
 0x3a6   :  { %6736 = vmatprep.mubr.msk.f32.mxu0 %vm9335_vm0, %v9336_v1  ;;  %8308 = vmatpush3.bf16.msra.mxu0 %v8307_v2 }
 0x3a7   :  { %8309 = vmatprep.subr.bf16.mxu0 %v9334_v0 }
 0x3aa   :  { %8311 = vmatpush3.bf16.msra.mxu0 %v8310_v4 }
 0x3ab   :  { %8312 = vmatprep.subr.bf16.mxu0 %v9334_v0 }
 0x3ae   :  { %8314 = vmatpush3.bf16.msra.mxu0 %v8313_v10 }
 0x3af   :  { %8315 = vmatprep.subr.bf16.mxu0 %v9334_v0 }
 0x3b2   :  { %8317 = vmatpush3.bf16.msra.mxu0 %v8316_v13 }
 0x3b3   :  { %8318 = vmatprep.subr.bf16.mxu0 %v9334_v0 }
 0x3b6   :  { %8320 = vmatpush3.bf16.msra.mxu0 %v8319_v20 }
 0x3b7   :  { %8321 = vmatprep.subr.bf16.mxu0 %v9334_v0 }
 0x3ba   :  { %8323 = vmatpush3.bf16.msra.mxu0 %v8322_v27 }
 0x3bb   :  { %8324 = vmatprep.subr.bf16.mxu0 %v9334_v0 }
 0x3be   :  { %8326 = vmatpush3.bf16.msra.mxu0 %v8325_v39  ;;  %v1083_v39 = vld [vmem:[#allocation2 + $0x120] sm:$0xff] }
 0x3bf   :  { %8327 = vmatprep.subr.bf16.mxu0 %v9334_v0  ;;  %v8397_v45 = vpack.c.bf16 %v1084_v41, %v1083_v39 }
 0x3c2   :  { %8329 = vmatpush3.bf16.msra.mxu0 %v8328_v48  ;;  %v1085_v48 = vld [vmem:[#allocation2 + $0x130] sm:$0xff] }
 0x3c3   :  { %8354 = vmatprep.subr.bf16.mxu0 %v9334_v0 }
 0x478   :  { %v537_v29 = vpop.f32.mrb[4].mxu0 }
 0x479   :  { %v538_v31 = vadd.f32 %v9702_v28, %v537_v29  ;;  %v6686_v32 = vpop.f32.mrb[5].mxu0  ;;  %v1079_v29 = vld [vmem:[#allocation2 + $0x100] sm:$0xff] }
 0x47a   :  { %v1081_v32 = vld [vmem:[#allocation2 + $0x110] sm:$0xff] }
 0x47b   :  { %v541_v33 = vmax.f32 %v538_v31, 0.0  ;;  %v1080_v31 = vld [vmem:[#allocation2 + $0x108] sm:$0xff]  ;;  %v8394_v38 = vpack.c.bf16 %v1082_v37, %v1081_v32 }
 0x47d   :  { %6702 = vmatmul.mubr.msk.f32.vlgmr.msra.gmra.mrb[4].mxu1 %vm309_vm2, %v541_v33  ;;  %v8391_v33 = vpack.c.bf16 %v1080_v31, %v1079_v29 }
 0x47e   :  { %8332 = vmatpush3.bf16.msra.mxu1 %v9446_v15  ;;  %6771 = vmatprep.mubr.msk.f32.mxu1 %vm9335_vm0, %v9336_v1 }
 0x47f   :  { %8333 = vmatprep.subr.bf16.mxu1 %v9334_v0 }
 0x482   :  { %8335 = vmatpush3.bf16.msra.mxu1 %v9450_v18 }
 0x483   :  { %8336 = vmatprep.subr.bf16.mxu1 %v9334_v0 }
 0x486   :  { %8338 = vmatpush3.bf16.msra.mxu1 %v9461_v24 }
 0x487   :  { %8339 = vmatprep.subr.bf16.mxu1 %v9334_v0 }
 0x48a   :  { %8341 = vmatpush3.bf16.msra.mxu1 %v9472_v30 }
 0x48b   :  { %8342 = vmatprep.subr.bf16.mxu1 %v9334_v0 }
 0x48e   :  { %8344 = vmatpush3.bf16.msra.mxu1 %v9483_v36 }
 0x48f   :  { %8345 = vmatprep.subr.bf16.mxu1 %v9334_v0 }
 0x492   :  { %8347 = vmatpush3.bf16.msra.mxu1 %v9494_v42 }
 0x493   :  { %8348 = vmatprep.subr.bf16.mxu1 %v9334_v0 }
 0x496   :  { %8350 = vmatpush3.bf16.msra.mxu1 %v9510_v47 }
 0x497   :  { %8351 = vmatprep.subr.bf16.mxu1 %v9334_v0 }
 0x49a   :  { %8353 = vmatpush3.bf16.msra.mxu1 %v9523_v51 }
 0x49b   :  { %8363 = vmatprep.subr.bf16.mxu1 %v9334_v0 }
 0x550   :  { %v614_v50 = vpop.f32.mrb[4].mxu1 }
 0x551   :  { %v615_v52 = vadd.f32 %v9729_v49, %v614_v50  ;;  %v6703_v53 = vpop.f32.mrb[5].mxu1  ;;  %v1086_v50 = vld [vmem:[#allocation2 + $0x138] sm:$0xff] }
 0x552   :  { %v1087_v53 = vld [vmem:[#allocation2 + $0x140] sm:$0xff] }
 0x553   :  { %v618_v59 = vsub.f32 %v9550_v58, %v615_v52  ;;  %v637_v61 = vadd.f32 %v615_v52, %v9506_v46  ;;  %v8400_v52 = vpack.c.bf16 %v1086_v50, %v1085_v48 }
 0x555   :  { %v9733_v60 = vsub.f32 0.0, %v618_v59  ;;  %v1088_v59 = vld [vmem:[#allocation2 + $0x148] sm:$0xff] }
 0x557   :  { %v638_v2 = vadd.f32 %v637_v61, %v9733_v60  ;;  %v8403_v61 = vpack.c.bf16 %v1088_v59, %v1087_v53 }
 0x559   :  { %6737 = vmatmul.mubr.f32.vlgmr.msra.gmra.mrb[6].mxu0 %v638_v2  ;;  %v1089_v2 = vld [vmem:[#allocation2 + $0x150] sm:$0xff] }
 0x55a   :  { %8356 = vmatpush3.bf16.msra.mxu0 %v9539_v55  ;;  %6788 = vmatprep.mubr.msk.f32.mxu0 %vm9335_vm0, %v9336_v1 }
 0x55b   :  { %8357 = vmatprep.subr.bf16.mxu0 %v9334_v0 }
 0x55e   :  { %8359 = vmatpush3.bf16.msra.mxu0 %v9545_v57 }
 0x55f   :  { %8360 = vmatprep.subr.bf16.mxu0 %v9334_v0 }
 0x562   :  { %8362 = vmatpush3.bf16.msra.mxu0 %v9561_v62 }
 0x563   :  { %6786 = vmatprep.subr.mxu0 %v9336_v1 }
 0x566   :  { %6787 = vmatpush3.msk.msra.mxu0 %vm313_vm1, %v9568_v63 }
 0x567   :  { %8372 = vmatprep.subr.bf16.mxu0 %v9334_v0 }
 0x62c   :  { %v9748_v58 = vpop.f32.mrb[6].mxu0 }
 0x62d   :  { %v709_v3 = vsub.f32 %v9748_v58, %v9733_v60  ;;  %v6738_v4 = vpop.f32.mrb[7].mxu0 }
 0x62f   :  { %6772 = vmatmul.mubr.f32.vlgmr.msra.gmra.mrb[6].mxu1 %v709_v3  ;;  %v1090_v3 = vld [vmem:[#allocation2 + $0x158] sm:$0xff] }
 0x630   :  { %8365 = vmatpush3.bf16.msra.mxu1 %v9582_v5  ;;  %6805 = vmatprep.mubr.msk.f32.mxu1 %vm9335_vm0, %v9336_v1  ;;  %v8406_v4 = vpack.c.bf16 %v1090_v3, %v1089_v2 }
 0x631   :  { %8366 = vmatprep.subr.bf16.mxu1 %v9334_v0 }
 0x634   :  { %8368 = vmatpush3.bf16.msra.mxu1 %v9588_v7 }
 0x635   :  { %8369 = vmatprep.subr.bf16.mxu1 %v9334_v0 }
 0x638   :  { %8371 = vmatpush3.bf16.msra.mxu1 %v9608_v16 }
 0x639   :  { %6803 = vmatprep.subr.mxu1 %v9336_v1 }
 0x63c   :  { %6804 = vmatpush3.msk.msra.mxu1 %vm313_vm1, %v9615_v17 }
 0x63d   :  { %8381 = vmatprep.subr.bf16.mxu1 %v9334_v0 }
 0x702   :  { %v776_v6 = vpop.f32.mrb[6].mxu1 }
 0x703   :  { %v777_v9 = vadd.f32 %v9596_v8, %v776_v6  ;;  %v6773_v10 = vpop.f32.mrb[7].mxu1 }
 0x705   :  { %v780_v11 = vmax.f32 %v777_v9, 0.0 }
 0x707   :  { %6789 = vmatmul.mubr.msk.f32.vlgmr.msra.gmra.mrb[8].mxu0 %vm309_vm2, %v780_v11 }
 0x708   :  { %8374 = vmatpush3.bf16.msra.mxu0 %v9629_v22  ;;  %6822 = vmatprep.mubr.msk.f32.mxu0 %vm9335_vm0, %v9336_v1 }
 0x709   :  { %8375 = vmatprep.subr.bf16.mxu0 %v9334_v0 }
 0x70c   :  { %8377 = vmatpush3.bf16.msra.mxu0 %v9635_v25 }
 0x70d   :  { %8378 = vmatprep.subr.bf16.mxu0 %v9334_v0 }
 0x710   :  { %8380 = vmatpush3.bf16.msra.mxu0 %v9655_v34 }
 0x711   :  { %6820 = vmatprep.subr.mxu0 %v9336_v1 }
 0x714   :  { %6821 = vmatpush3.msk.msra.mxu0 %vm313_vm1, %v9662_v35 }
 0x715   :  { %8390 = vmatprep.subr.bf16.mxu0 %v9334_v0 }
 0x7da   :  { %v850_v12 = vpop.f32.mrb[8].mxu0 }
 0x7db   :  { %v851_v13 = vadd.f32 %v9643_v26, %v850_v12  ;;  %v6790_v14 = vpop.f32.mrb[9].mxu0  ;;  %v1091_v12 = vld [vmem:[#allocation2 + $0x160] sm:$0xff] }
 0x7dd   :  { %v854_v19 = vmax.f32 %v851_v13, 0.0  ;;  %v1092_v13 = vld [vmem:[#allocation2 + $0x168] sm:$0xff] }
 0x7de   :  { %v8409_v14 = vpack.c.bf16 %v1092_v13, %v1091_v12  ;;  %v1540_v12 = vld [vmem:[#allocation2 + $0x198] sm:$0xff] }
 0x7df   :  { %6806 = vmatmul.mubr.msk.f32.vlgmr.msra.gmra.mrb[8].mxu1 %vm309_vm2, %v854_v19  ;;  %v1093_v19 = vld [vmem:[#allocation2 + $0x170] sm:$0xff] }
 0x7e0   :  { %8383 = vmatpush3.bf16.msra.mxu1 %v9667_v40  ;;  %6839 = vmatprep.mubr.msk.f32.mxu1 %vm9335_vm0, %v9336_v1 }
 0x7e1   :  { %8384 = vmatprep.subr.bf16.mxu1 %v9334_v0 }
 0x7e4   :  { %8386 = vmatpush3.bf16.msra.mxu1 %v9670_v43 }
 0x7e5   :  { %8387 = vmatprep.subr.bf16.mxu1 %v9334_v0 }
 0x7e8   :  { %8389 = vmatpush3.bf16.msra.mxu1 %v9684_v54 }
 0x7e9   :  { %6837 = vmatprep.subr.mxu1 %v9336_v1 }
 0x7ec   :  { %6838 = vmatpush3.msk.msra.mxu1 %vm313_vm1, %v9688_v56 }
 0x7ed   :  { %8414 = vmatprep.subr.bf16.mxu1 %v9334_v0 }
 0x8b2   :  { %v924_v20 = vpop.f32.mrb[8].mxu1 }
 0x8b3   :  { %v925_v21 = vadd.f32 %v9678_v44, %v924_v20  ;;  %v6807_v23 = vpop.f32.mrb[9].mxu1  ;;  %v1094_v20 = vld [vmem:[#allocation2 + $0x178] sm:$0xff] }
 0x8b5   :  { %v928_v27 = vmax.f32 %v925_v21, 0.0  ;;  %v8412_v21 = vpack.c.bf16 %v1094_v20, %v1093_v19  ;;  %v1542_v19 = vld [vmem:[#allocation2 + $0x1a8] sm:$0xff] }
 0x8b7   :  { %6823 = vmatmul.mubr.msk.f32.vlgmr.msra.gmra.mrb[10].mxu0 %vm309_vm2, %v928_v27 }
 0x8b8   :  { %6874 = vmatprep.mubr.msk.f32.mxu0 %vm9335_vm0, %v9336_v1  ;;  %8392 = vmatpush3.bf16.msra.mxu0 %v8391_v33 }
 0x8b9   :  { %8393 = vmatprep.subr.bf16.mxu0 %v9334_v0 }
 0x8bc   :  { %8395 = vmatpush3.bf16.msra.mxu0 %v8394_v38 }
 0x8bd   :  { %8396 = vmatprep.subr.bf16.mxu0 %v9334_v0 }
 0x8c0   :  { %8398 = vmatpush3.bf16.msra.mxu0 %v8397_v45 }
 0x8c1   :  { %8399 = vmatprep.subr.bf16.mxu0 %v9334_v0 }
 0x8c4   :  { %8401 = vmatpush3.bf16.msra.mxu0 %v8400_v52 }
 0x8c5   :  { %8402 = vmatprep.subr.bf16.mxu0 %v9334_v0 }
 0x8c8   :  { %8404 = vmatpush3.bf16.msra.mxu0 %v8403_v61 }
 0x8c9   :  { %8405 = vmatprep.subr.bf16.mxu0 %v9334_v0 }
 0x8cc   :  { %8407 = vmatpush3.bf16.msra.mxu0 %v8406_v4 }
 0x8cd   :  { %8408 = vmatprep.subr.bf16.mxu0 %v9334_v0 }
 0x8d0   :  { %8410 = vmatpush3.bf16.msra.mxu0 %v8409_v14  ;;  %v1541_v14 = vld [vmem:[#allocation2 + $0x1a0] sm:$0xff] }
 0x8d1   :  { %8411 = vmatprep.subr.bf16.mxu0 %v9334_v0  ;;  %v8481_v20 = vpack.c.bf16 %v1542_v19, %v1541_v14 }
 0x8d4   :  { %8413 = vmatpush3.bf16.msra.mxu0 %v8412_v21  ;;  %v1543_v21 = vld [vmem:[#allocation2 + $0x1b0] sm:$0xff] }
 0x8d5   :  { %8438 = vmatprep.subr.bf16.mxu0 %v9334_v0 }
 0x98a   :  { %v998_v6 = vpop.f32.mrb[10].mxu0 }
 0x98b   :  { %v999_v9 = vadd.f32 %v9702_v28, %v998_v6  ;;  %v6824_v10 = vpop.f32.mrb[11].mxu0  ;;  %v1537_v6 = vld [vmem:[#allocation2 + $0x180] sm:$0xff] }
 0x98c   :  { %v1539_v10 = vld [vmem:[#allocation2 + $0x190] sm:$0xff] }
 0x98d   :  { %v1002_v11 = vmax.f32 %v999_v9, 0.0  ;;  %v1538_v9 = vld [vmem:[#allocation2 + $0x188] sm:$0xff]  ;;  %v8478_v13 = vpack.c.bf16 %v1540_v12, %v1539_v10 }
 0x98f   :  { %6840 = vmatmul.mubr.msk.f32.vlgmr.msra.gmra.mrb[10].mxu1 %vm309_vm2, %v1002_v11  ;;  %v8475_v11 = vpack.c.bf16 %v1538_v9, %v1537_v6 }
 0x990   :  { %8416 = vmatpush3.bf16.msra.mxu1 %v9446_v15  ;;  %6909 = vmatprep.mubr.msk.f32.mxu1 %vm9335_vm0, %v9336_v1 }
 0x991   :  { %8417 = vmatprep.subr.bf16.mxu1 %v9334_v0 }
 0x994   :  { %8419 = vmatpush3.bf16.msra.mxu1 %v9450_v18 }
 0x995   :  { %8420 = vmatprep.subr.bf16.mxu1 %v9334_v0 }
 0x998   :  { %8422 = vmatpush3.bf16.msra.mxu1 %v9461_v24 }
 0x999   :  { %8423 = vmatprep.subr.bf16.mxu1 %v9334_v0 }
 0x99c   :  { %8425 = vmatpush3.bf16.msra.mxu1 %v9472_v30 }
 0x99d   :  { %8426 = vmatprep.subr.bf16.mxu1 %v9334_v0 }
 0x9a0   :  { %8428 = vmatpush3.bf16.msra.mxu1 %v9483_v36 }
 0x9a1   :  { %8429 = vmatprep.subr.bf16.mxu1 %v9334_v0 }
 0x9a4   :  { %8431 = vmatpush3.bf16.msra.mxu1 %v9494_v42 }
 0x9a5   :  { %8432 = vmatprep.subr.bf16.mxu1 %v9334_v0 }
 0x9a8   :  { %8434 = vmatpush3.bf16.msra.mxu1 %v9510_v47 }
 0x9a9   :  { %8435 = vmatprep.subr.bf16.mxu1 %v9334_v0 }
 0x9ac   :  { %8437 = vmatpush3.bf16.msra.mxu1 %v9523_v51 }
 0x9ad   :  { %8447 = vmatprep.subr.bf16.mxu1 %v9334_v0 }
 0xa62   :  { %v1072_v23 = vpop.f32.mrb[10].mxu1 }
 0xa63   :  { %v1073_v27 = vadd.f32 %v9729_v49, %v1072_v23  ;;  %v6841_v29 = vpop.f32.mrb[11].mxu1  ;;  %v1544_v23 = vld [vmem:[#allocation2 + $0x1b8] sm:$0xff] }
 0xa64   :  { %v1545_v29 = vld [vmem:[#allocation2 + $0x1c0] sm:$0xff] }
 0xa65   :  { %v1076_v31 = vsub.f32 %v9748_v58, %v1073_v27  ;;  %v1095_v33 = vadd.f32 %v1073_v27, %v9506_v46  ;;  %v8484_v27 = vpack.c.bf16 %v1544_v23, %v1543_v21 }
 0xa67   :  { %v9824_v32 = vsub.f32 %v9733_v60, %v1076_v31  ;;  %v1546_v31 = vld [vmem:[#allocation2 + $0x1c8] sm:$0xff] }
 0xa69   :  { %v1096_v37 = vadd.f32 %v1095_v33, %v9824_v32  ;;  %v8487_v33 = vpack.c.bf16 %v1546_v31, %v1545_v29  ;;  %v1995_v29 = vld [vmem:[#allocation2 + $0x200] sm:$0xff]  ;;  %v1996_v31 = vld [vmem:[#allocation2 + $0x208] sm:$0xff] }
 0xa6b   :  { %6875 = vmatmul.mubr.f32.vlgmr.msra.gmra.mrb[12].mxu0 %v1096_v37  ;;  %v1547_v37 = vld [vmem:[#allocation2 + $0x1d0] sm:$0xff] }
 0xa6c   :  { %8440 = vmatpush3.bf16.msra.mxu0 %v9539_v55  ;;  %6926 = vmatprep.mubr.msk.f32.mxu0 %vm9335_vm0, %v9336_v1 }
 0xa6d   :  { %8441 = vmatprep.subr.bf16.mxu0 %v9334_v0 }
 0xa70   :  { %8443 = vmatpush3.bf16.msra.mxu0 %v9545_v57 }
 0xa71   :  { %8444 = vmatprep.subr.bf16.mxu0 %v9334_v0 }
 0xa74   :  { %8446 = vmatpush3.bf16.msra.mxu0 %v9561_v62 }
 0xa75   :  { %6924 = vmatprep.subr.mxu0 %v9336_v1 }
 0xa78   :  { %6925 = vmatpush3.msk.msra.mxu0 %vm313_vm1, %v9568_v63 }
 0xa79   :  { %8456 = vmatprep.subr.bf16.mxu0 %v9334_v0 }
 0xb3e   :  { %v9839_v60 = vpop.f32.mrb[12].mxu0 }
 0xb3f   :  { %v1167_v58 = vsub.f32 %v9839_v60, %v9824_v32  ;;  %v6876_v38 = vpop.f32.mrb[13].mxu0 }
 0xb41   :  { %6910 = vmatmul.mubr.f32.vlgmr.msra.gmra.mrb[12].mxu1 %v1167_v58  ;;  %v1548_v58 = vld [vmem:[#allocation2 + $0x1d8] sm:$0xff] }
 0xb42   :  { %8449 = vmatpush3.bf16.msra.mxu1 %v9582_v5  ;;  %6943 = vmatprep.mubr.msk.f32.mxu1 %vm9335_vm0, %v9336_v1  ;;  %v8490_v38 = vpack.c.bf16 %v1548_v58, %v1547_v37  ;;  %v8559_v37 = vpack.c.bf16 %v1996_v31, %v1995_v29  ;;  %v1998_v58 = vld [vmem:[#allocation2 + $0x218] sm:$0xff]  ;;  %v10046_v31 = vld [vmem:[%s10807_s6 + $0x30] sm:$0x3] }
 0xb43   :  { %8450 = vmatprep.subr.bf16.mxu1 %v9334_v0 }
 0xb46   :  { %8452 = vmatpush3.bf16.msra.mxu1 %v9588_v7 }
 0xb47   :  { %8453 = vmatprep.subr.bf16.mxu1 %v9334_v0 }
 0xb4a   :  { %8455 = vmatpush3.bf16.msra.mxu1 %v9608_v16 }
 0xb4b   :  { %6941 = vmatprep.subr.mxu1 %v9336_v1 }
 0xb4e   :  { %6942 = vmatpush3.msk.msra.mxu1 %vm313_vm1, %v9615_v17 }
 0xb4f   :  { %8465 = vmatprep.subr.bf16.mxu1 %v9334_v0 }
 0xc14   :  { %v1234_v39 = vpop.f32.mrb[12].mxu1 }
 0xc15   :  { %v1235_v41 = vadd.f32 %v9596_v8, %v1234_v39  ;;  %v6911_v45 = vpop.f32.mrb[13].mxu1 }
 0xc17   :  { %v1238_v48 = vmax.f32 %v1235_v41, 0.0 }
 0xc19   :  { %6927 = vmatmul.mubr.msk.f32.vlgmr.msra.gmra.mrb[14].mxu0 %vm309_vm2, %v1238_v48 }
 0xc1a   :  { %8458 = vmatpush3.bf16.msra.mxu0 %v9629_v22  ;;  %6960 = vmatprep.mubr.msk.f32.mxu0 %vm9335_vm0, %v9336_v1 }
 0xc1b   :  { %8459 = vmatprep.subr.bf16.mxu0 %v9334_v0 }
 0xc1e   :  { %8461 = vmatpush3.bf16.msra.mxu0 %v9635_v25 }
 0xc1f   :  { %8462 = vmatprep.subr.bf16.mxu0 %v9334_v0 }
 0xc22   :  { %8464 = vmatpush3.bf16.msra.mxu0 %v9655_v34 }
 0xc23   :  { %6958 = vmatprep.subr.mxu0 %v9336_v1 }
 0xc26   :  { %6959 = vmatpush3.msk.msra.mxu0 %vm313_vm1, %v9662_v35 }
 0xc27   :  { %8474 = vmatprep.subr.bf16.mxu0 %v9334_v0 }
 0xcec   :  { %v1308_v50 = vpop.f32.mrb[14].mxu0 }
 0xced   :  { %v1309_v52 = vadd.f32 %v9643_v26, %v1308_v50  ;;  %v6928_v53 = vpop.f32.mrb[15].mxu0  ;;  %v1549_v50 = vld [vmem:[#allocation2 + $0x1e0] sm:$0xff] }
 0xcef   :  { %v1312_v59 = vmax.f32 %v1309_v52, 0.0  ;;  %v1550_v52 = vld [vmem:[#allocation2 + $0x1e8] sm:$0xff] }
 0xcf0   :  { %v8493_v53 = vpack.c.bf16 %v1550_v52, %v1549_v50  ;;  %v2003_v52 = vld [vmem:[#allocation2 + $0x240] sm:$0xff] }
 0xcf1   :  { %6944 = vmatmul.mubr.msk.f32.vlgmr.msra.gmra.mrb[14].mxu1 %vm309_vm2, %v1312_v59  ;;  %v1551_v59 = vld [vmem:[#allocation2 + $0x1f0] sm:$0xff] }
 0xcf2   :  { %8467 = vmatpush3.bf16.msra.mxu1 %v9667_v40  ;;  %6977 = vmatprep.mubr.msk.f32.mxu1 %vm9335_vm0, %v9336_v1 }
 0xcf3   :  { %8468 = vmatprep.subr.bf16.mxu1 %v9334_v0 }
 0xcf6   :  { %8470 = vmatpush3.bf16.msra.mxu1 %v9670_v43 }
 0xcf7   :  { %8471 = vmatprep.subr.bf16.mxu1 %v9334_v0 }
 0xcfa   :  { %8473 = vmatpush3.bf16.msra.mxu1 %v9684_v54 }
 0xcfb   :  { %6975 = vmatprep.subr.mxu1 %v9336_v1 }
 0xcfe   :  { %6976 = vmatpush3.msk.msra.mxu1 %vm313_vm1, %v9688_v56 }
 0xcff   :  { %8498 = vmatprep.subr.bf16.mxu1 %v9334_v0 }
 0xdc4   :  { %v1382_v61 = vpop.f32.mrb[14].mxu1 }
 0xdc5   :  { %v1383_v2 = vadd.f32 %v9678_v44, %v1382_v61  ;;  %v6945_v3 = vpop.f32.mrb[15].mxu1  ;;  %v1552_v61 = vld [vmem:[#allocation2 + $0x1f8] sm:$0xff] }
 0xdc7   :  { %v1386_v4 = vmax.f32 %v1383_v2, 0.0  ;;  %v8496_v2 = vpack.c.bf16 %v1552_v61, %v1551_v59  ;;  %v2005_v61 = vld [vmem:[#allocation2 + $0x250] sm:$0xff] }
 0xdc9   :  { %6961 = vmatmul.mubr.msk.f32.vlgmr.msra.gmra.mrb[16].mxu0 %vm309_vm2, %v1386_v4 }
 0xdca   :  { %7012 = vmatprep.mubr.msk.f32.mxu0 %vm9335_vm0, %v9336_v1  ;;  %8476 = vmatpush3.bf16.msra.mxu0 %v8475_v11 }
 0xdcb   :  { %8477 = vmatprep.subr.bf16.mxu0 %v9334_v0 }
 0xdce   :  { %8479 = vmatpush3.bf16.msra.mxu0 %v8478_v13 }
 0xdcf   :  { %8480 = vmatprep.subr.bf16.mxu0 %v9334_v0 }
 0xdd2   :  { %8482 = vmatpush3.bf16.msra.mxu0 %v8481_v20 }
 0xdd3   :  { %8483 = vmatprep.subr.bf16.mxu0 %v9334_v0 }
 0xdd6   :  { %8485 = vmatpush3.bf16.msra.mxu0 %v8484_v27 }
 0xdd7   :  { %8486 = vmatprep.subr.bf16.mxu0 %v9334_v0 }
 0xdda   :  { %8488 = vmatpush3.bf16.msra.mxu0 %v8487_v33  ;;  %v1997_v33 = vld [vmem:[#allocation2 + $0x210] sm:$0xff] }
 0xddb   :  { %8489 = vmatprep.subr.bf16.mxu0 %v9334_v0 }
 0xdde   :  { %8491 = vmatpush3.bf16.msra.mxu0 %v8490_v38  ;;  %v8562_v38 = vpack.c.bf16 %v1998_v58, %v1997_v33 }
 0xddf   :  { %8492 = vmatprep.subr.bf16.mxu0 %v9334_v0 }
 0xde2   :  { %8494 = vmatpush3.bf16.msra.mxu0 %v8493_v53  ;;  %v2004_v53 = vld [vmem:[#allocation2 + $0x248] sm:$0xff] }
 0xde3   :  { %8495 = vmatprep.subr.bf16.mxu0 %v9334_v0  ;;  %v8571_v59 = vpack.c.bf16 %v2004_v53, %v2003_v52 }
 0xde6   :  { %8497 = vmatpush3.bf16.msra.mxu0 %v8496_v2  ;;  %v2006_v2 = vld [vmem:[#allocation2 + $0x258] sm:$0xff] }
 0xde7   :  { %8522 = vmatprep.subr.bf16.mxu0 %v9334_v0 }
 0xe9c   :  { %v1456_v39 = vpop.f32.mrb[16].mxu0 }
 0xe9d   :  { %v1457_v41 = vadd.f32 %v9702_v28, %v1456_v39  ;;  %v6962_v45 = vpop.f32.mrb[17].mxu0  ;;  %v1999_v39 = vld [vmem:[#allocation2 + $0x220] sm:$0xff] }
 0xe9e   :  { %v2001_v45 = vld [vmem:[#allocation2 + $0x230] sm:$0xff] }
 0xe9f   :  { %v1460_v48 = vmax.f32 %v1457_v41, 0.0  ;;  %v2000_v41 = vld [vmem:[#allocation2 + $0x228] sm:$0xff] }
 0xea1   :  { %6978 = vmatmul.mubr.msk.f32.vlgmr.msra.gmra.mrb[16].mxu1 %vm309_vm2, %v1460_v48  ;;  %v2002_v48 = vld [vmem:[#allocation2 + $0x238] sm:$0xff] }
 0xea2   :  { %8500 = vmatpush3.bf16.msra.mxu1 %v9446_v15  ;;  %7047 = vmatprep.mubr.msk.f32.mxu1 %vm9335_vm0, %v9336_v1  ;;  %v8568_v50 = vpack.c.bf16 %v2002_v48, %v2001_v45  ;;  %v10077_v45 = vld [vmem:[%s10806_s5] ss:$0 sm:$0xff] }
 0xea3   :  { %8501 = vmatprep.subr.bf16.mxu1 %v9334_v0 }
 0xea6   :  { %8503 = vmatpush3.bf16.msra.mxu1 %v9450_v18 }
 0xea7   :  { %8504 = vmatprep.subr.bf16.mxu1 %v9334_v0 }
 0xeaa   :  { %8506 = vmatpush3.bf16.msra.mxu1 %v9461_v24 }
 0xeab   :  { %8507 = vmatprep.subr.bf16.mxu1 %v9334_v0 }
 0xeae   :  { %8509 = vmatpush3.bf16.msra.mxu1 %v9472_v30 }
 0xeaf   :  { %8510 = vmatprep.subr.bf16.mxu1 %v9334_v0 }
 0xeb2   :  { %8512 = vmatpush3.bf16.msra.mxu1 %v9483_v36 }
 0xeb3   :  { %8513 = vmatprep.subr.bf16.mxu1 %v9334_v0 }
 0xeb6   :  { %8515 = vmatpush3.bf16.msra.mxu1 %v9494_v42 }
 0xeb7   :  { %8516 = vmatprep.subr.bf16.mxu1 %v9334_v0 }
 0xeba   :  { %8518 = vmatpush3.bf16.msra.mxu1 %v9510_v47 }
 0xebb   :  { %8519 = vmatprep.subr.bf16.mxu1 %v9334_v0 }
 0xebe   :  { %8521 = vmatpush3.bf16.msra.mxu1 %v9523_v51 }
 0xebf   :  { %8531 = vmatprep.subr.bf16.mxu1 %v9334_v0 }
 0xf74   :  { %v1530_v3 = vpop.f32.mrb[16].mxu1 }
 0xf75   :  { %v1531_v4 = vadd.f32 %v9729_v49, %v1530_v3  ;;  %v6979_v6 = vpop.f32.mrb[17].mxu1  ;;  %v8574_v3 = vpack.c.bf16 %v2006_v2, %v2005_v61 }
 0xf77   :  { %v1534_v9 = vsub.f32 %v9839_v60, %v1531_v4  ;;  %v1553_v11 = vadd.f32 %v1531_v4, %v9506_v46 }
 0xf79   :  { %v9915_v10 = vsub.f32 %v9824_v32, %v1534_v9 }
 0xf7b   :  { %v1554_v12 = vadd.f32 %v1553_v11, %v9915_v10 }
 0xf7d   :  { %7013 = vmatmul.mubr.f32.vlgmr.msra.gmra.mrb[18].mxu0 %v1554_v12  ;;  %v2007_v12 = vld [vmem:[#allocation2 + $0x260] sm:$0xff] }
 0xf7e   :  { %8524 = vmatpush3.bf16.msra.mxu0 %v9539_v55  ;;  %7064 = vmatprep.mubr.msk.f32.mxu0 %vm9335_vm0, %v9336_v1 }
 0xf7f   :  { %8525 = vmatprep.subr.bf16.mxu0 %v9334_v0 }
 0xf82   :  { %8527 = vmatpush3.bf16.msra.mxu0 %v9545_v57 }
 0xf83   :  { %8528 = vmatprep.subr.bf16.mxu0 %v9334_v0 }
 0xf86   :  { %8530 = vmatpush3.bf16.msra.mxu0 %v9561_v62 }
 0xf87   :  { %7062 = vmatprep.subr.mxu0 %v9336_v1 }
 0xf8a   :  { %7063 = vmatpush3.msk.msra.mxu0 %vm313_vm1, %v9568_v63 }
 0xf8b   :  { %8540 = vmatprep.subr.bf16.mxu0 %v9334_v0 }
0x1050   :  { %v9930_v46 = vpop.f32.mrb[18].mxu0 }
0x1051   :  { %v1625_v32 = vsub.f32 %v9930_v46, %v9915_v10  ;;  %v7014_v60 = vpop.f32.mrb[19].mxu0 }
0x1053   :  { %7048 = vmatmul.mubr.f32.vlgmr.msra.gmra.mrb[18].mxu1 %v1625_v32  ;;  %v2008_v32 = vld [vmem:[#allocation2 + $0x268] sm:$0xff] }
0x1054   :  { %8533 = vmatpush3.bf16.msra.mxu1 %v9582_v5  ;;  %7081 = vmatprep.mubr.msk.f32.mxu1 %vm9335_vm0, %v9336_v1  ;;  %v8577_v60 = vpack.c.bf16 %v2008_v32, %v2007_v12  ;;  %v2457_v32 = vld [vmem:[#allocation2 + $0x2a0] sm:$0xff] }
0x1055   :  { %8534 = vmatprep.subr.bf16.mxu1 %v9334_v0 }
0x1058   :  { %8536 = vmatpush3.bf16.msra.mxu1 %v9588_v7 }
0x1059   :  { %8537 = vmatprep.subr.bf16.mxu1 %v9334_v0 }
0x105c   :  { %8539 = vmatpush3.bf16.msra.mxu1 %v9608_v16 }
0x105d   :  { %7079 = vmatprep.subr.mxu1 %v9336_v1 }
0x1060   :  { %7080 = vmatpush3.msk.msra.mxu1 %vm313_vm1, %v9615_v17 }
0x1061   :  { %8549 = vmatprep.subr.bf16.mxu1 %v9334_v0 }
0x1126   :  { %v1692_v63 = vpop.f32.mrb[18].mxu1 }
0x1127   :  { %v1693_v13 = vadd.f32 %v9596_v8, %v1692_v63  ;;  %v7049_v14 = vpop.f32.mrb[19].mxu1  ;;  %v2009_v63 = vld [vmem:[#allocation2 + $0x270] sm:$0xff] }
0x1129   :  { %v1696_v19 = vmax.f32 %v1693_v13, 0.0  ;;  %v2010_v13 = vld [vmem:[#allocation2 + $0x278] sm:$0xff] }
0x112a   :  { %v8580_v14 = vpack.c.bf16 %v2010_v13, %v2009_v63  ;;  %v2459_v13 = vld [vmem:[#allocation2 + $0x2b0] sm:$0xff] }
0x112b   :  { %7065 = vmatmul.mubr.msk.f32.vlgmr.msra.gmra.mrb[20].mxu0 %vm309_vm2, %v1696_v19 }
0x112c   :  { %8542 = vmatpush3.bf16.msra.mxu0 %v9629_v22  ;;  %7098 = vmatprep.mubr.msk.f32.mxu0 %vm9335_vm0, %v9336_v1 }
0x112d   :  { %8543 = vmatprep.subr.bf16.mxu0 %v9334_v0 }
0x1130   :  { %8545 = vmatpush3.bf16.msra.mxu0 %v9635_v25 }
0x1131   :  { %8546 = vmatprep.subr.bf16.mxu0 %v9334_v0 }
0x1134   :  { %8548 = vmatpush3.bf16.msra.mxu0 %v9655_v34 }
0x1135   :  { %7096 = vmatprep.subr.mxu0 %v9336_v1 }
0x1138   :  { %7097 = vmatpush3.msk.msra.mxu0 %vm313_vm1, %v9662_v35 }
0x1139   :  { %8558 = vmatprep.subr.bf16.mxu0 %v9334_v0 }
0x11fe   :  { %v1766_v8 = vpop.f32.mrb[20].mxu0 }
0x11ff   :  { %v1767_v17 = vadd.f32 %v9643_v26, %v1766_v8  ;;  %v7066_v20 = vpop.f32.mrb[21].mxu0 }
0x1201   :  { %v1770_v21 = vmax.f32 %v1767_v17, 0.0 }
0x1203   :  { %7082 = vmatmul.mubr.msk.f32.vlgmr.msra.gmra.mrb[20].mxu1 %vm309_vm2, %v1770_v21 }
0x1204   :  { %8551 = vmatpush3.bf16.msra.mxu1 %v9667_v40  ;;  %7115 = vmatprep.mubr.msk.f32.mxu1 %vm9335_vm0, %v9336_v1 }
0x1205   :  { %8552 = vmatprep.subr.bf16.mxu1 %v9334_v0 }
0x1208   :  { %8554 = vmatpush3.bf16.msra.mxu1 %v9670_v43 }
0x1209   :  { %8555 = vmatprep.subr.bf16.mxu1 %v9334_v0 }
0x120c   :  { %8557 = vmatpush3.bf16.msra.mxu1 %v9684_v54 }
0x120d   :  { %7113 = vmatprep.subr.mxu1 %v9336_v1 }
0x1210   :  { %7114 = vmatpush3.msk.msra.mxu1 %vm313_vm1, %v9688_v56 }
0x1211   :  { %8582 = vmatprep.subr.bf16.mxu1 %v9334_v0 }
0x12d6   :  { %v1840_v26 = vpop.f32.mrb[20].mxu1 }
0x12d7   :  { %v1841_v35 = vadd.f32 %v9678_v44, %v1840_v26  ;;  %v7083_v23 = vpop.f32.mrb[21].mxu1  ;;  %v8565_v44 = vpack.c.bf16 %v2000_v41, %v1999_v39  ;;  %v10011_v26 = vld [vmem:[%s10801_s0] sm:$0xff]  ;;  %v10069_v41 = vld [vmem:[%s10809_s8 + $0x30] sm:$0x3] }
0x12d9   :  { %v1844_v27 = vmax.f32 %v1841_v35, 0.0 }
0x12db   :  { %7099 = vmatmul.mubr.msk.f32.vlgmr.msra.gmra.mrb[22].mxu0 %vm309_vm2, %v1844_v27 }
0x12dc   :  { %7150 = vmatprep.mubr.msk.f32.mxu0 %vm9335_vm0, %v9336_v1  ;;  %8560 = vmatpush3.bf16.msra.mxu0 %v8559_v37  ;;  %v10054_v37 = vld [vmem:[%s10804_s3] ss:$0 sm:$0xff] }
0x12dd   :  { %8561 = vmatprep.subr.bf16.mxu0 %v9334_v0 }
0x12e0   :  { %8563 = vmatpush3.bf16.msra.mxu0 %v8562_v38 }
0x12e1   :  { %8564 = vmatprep.subr.bf16.mxu0 %v9334_v0 }
0x12e4   :  { %8566 = vmatpush3.bf16.msra.mxu0 %v8565_v44 }
0x12e5   :  { %8567 = vmatprep.subr.bf16.mxu0 %v9334_v0 }
0x12e8   :  { %8569 = vmatpush3.bf16.msra.mxu0 %v8568_v50 }
0x12e9   :  { %8570 = vmatprep.subr.bf16.mxu0 %v9334_v0 }
0x12ec   :  { %8572 = vmatpush3.bf16.msra.mxu0 %v8571_v59  ;;  %v10095_v59 = vld [vmem:[%s10808_s7] ss:$0 sm:$0xff] }
0x12ed   :  { %8573 = vmatprep.subr.bf16.mxu0 %v9334_v0 }
0x12f0   :  { %8575 = vmatpush3.bf16.msra.mxu0 %v8574_v3 }
0x12f1   :  { %8576 = vmatprep.subr.bf16.mxu0 %v9334_v0 }
0x12f4   :  { %8578 = vmatpush3.bf16.msra.mxu0 %v8577_v60  ;;  %v2458_v60 = vld [vmem:[#allocation2 + $0x2a8] sm:$0xff] }
0x12f5   :  { %8579 = vmatprep.subr.bf16.mxu0 %v9334_v0  ;;  %v8649_v63 = vpack.c.bf16 %v2458_v60, %v2457_v32 }
0x12f8   :  { %8581 = vmatpush3.bf16.msra.mxu0 %v8580_v14  ;;  %v2460_v14 = vld [vmem:[#allocation2 + $0x2b8] sm:$0xff] }
0x12f9   :  { %8606 = vmatprep.subr.bf16.mxu0 %v9334_v0 }
0x13ae   :  { %v1914_v4 = vpop.f32.mrb[22].mxu0 }
0x13af   :  { %v1915_v6 = vadd.f32 %v9702_v28, %v1914_v4  ;;  %v7100_v9 = vpop.f32.mrb[23].mxu0  ;;  %v2453_v4 = vld [vmem:[#allocation2 + $0x280] sm:$0xff] }
0x13b1   :  { %v1918_v11 = vmax.f32 %v1915_v6, 0.0  ;;  %v2454_v6 = vld [vmem:[#allocation2 + $0x288] sm:$0xff] }
0x13b2   :  { %v8643_v9 = vpack.c.bf16 %v2454_v6, %v2453_v4 }
0x13b3   :  { %7116 = vmatmul.mubr.msk.f32.vlgmr.msra.gmra.mrb[22].mxu1 %vm309_vm2, %v1918_v11  ;;  %v2456_v11 = vld [vmem:[#allocation2 + $0x298] sm:$0xff] }
0x13b4   :  { %8584 = vmatpush3.bf16.msra.mxu1 %v9446_v15  ;;  %7185 = vmatprep.mubr.msk.f32.mxu1 %vm9335_vm0, %v9336_v1 }
0x13b5   :  { %8585 = vmatprep.subr.bf16.mxu1 %v9334_v0 }
0x13b8   :  { %8587 = vmatpush3.bf16.msra.mxu1 %v9450_v18 }
0x13b9   :  { %8588 = vmatprep.subr.bf16.mxu1 %v9334_v0 }
0x13bc   :  { %8590 = vmatpush3.bf16.msra.mxu1 %v9461_v24 }
0x13bd   :  { %8591 = vmatprep.subr.bf16.mxu1 %v9334_v0 }
0x13c0   :  { %8593 = vmatpush3.bf16.msra.mxu1 %v9472_v30 }
0x13c1   :  { %8594 = vmatprep.subr.bf16.mxu1 %v9334_v0 }
0x13c4   :  { %8596 = vmatpush3.bf16.msra.mxu1 %v9483_v36 }
0x13c5   :  { %8597 = vmatprep.subr.bf16.mxu1 %v9334_v0 }
0x13c8   :  { %8599 = vmatpush3.bf16.msra.mxu1 %v9494_v42 }
0x13c9   :  { %8600 = vmatprep.subr.bf16.mxu1 %v9334_v0 }
0x13cc   :  { %8602 = vmatpush3.bf16.msra.mxu1 %v9510_v47 }
0x13cd   :  { %8603 = vmatprep.subr.bf16.mxu1 %v9334_v0 }
0x13d0   :  { %8605 = vmatpush3.bf16.msra.mxu1 %v9523_v51 }
0x13d1   :  { %8615 = vmatprep.subr.bf16.mxu1 %v9334_v0 }
0x1486   :  { %v1988_v19 = vpop.f32.mrb[22].mxu1 }
0x1487   :  { %v1989_v8 = vadd.f32 %v9729_v49, %v1988_v19  ;;  %v7117_v17 = vpop.f32.mrb[23].mxu1  ;;  %v8652_v19 = vpack.c.bf16 %v2460_v14, %v2459_v13 }
0x1488   :  { %v2462_v17 = vld [vmem:[#allocation2 + $0x2c8] sm:$0xff] }
0x1489   :  { %v1992_v20 = vsub.f32 %v9930_v46, %v1989_v8  ;;  %v2011_v35 = vadd.f32 %v10011_v26, %v1989_v8  ;;  %v2461_v8 = vld [vmem:[#allocation2 + $0x2c0] sm:$0xff] }
0x148b   :  { %v10006_v21 = vsub.f32 %v9915_v10, %v1992_v20  ;;  %v10026_v10 = vld [vmem:[%s10805_s4 + $0x30] sm:$0x3]  ;;  %v8655_v20 = vpack.c.bf16 %v2462_v17, %v2461_v8 }
0x148d   :  { %v2012_v23 = vadd.f32 %v2011_v35, %v10006_v21  ;;  %v2463_v35 = vld [vmem:[#allocation2 + $0x2d0] sm:$0xff] }
0x148f   :  { %7151 = vmatmul.mubr.f32.vlgmr.msra.gmra.mrb[24].mxu0 %v2012_v23  ;;  %v2464_v23 = vld [vmem:[#allocation2 + $0x2d8] sm:$0xff] }
0x1490   :  { %8608 = vmatpush3.bf16.msra.mxu0 %v9539_v55  ;;  %7202 = vmatprep.mubr.msk.f32.mxu0 %vm9335_vm0, %v9336_v1 }
0x1491   :  { %8609 = vmatprep.subr.bf16.mxu0 %v9334_v0 }
0x1494   :  { %8611 = vmatpush3.bf16.msra.mxu0 %v9545_v57 }
0x1495   :  { %8612 = vmatprep.subr.bf16.mxu0 %v9334_v0 }
0x1498   :  { %8614 = vmatpush3.bf16.msra.mxu0 %v9561_v62 }
0x1499   :  { %7200 = vmatprep.subr.mxu0 %v9336_v1 }
0x149c   :  { %7201 = vmatpush3.msk.msra.mxu0 %vm313_vm1, %v10026_v10 }
0x149d   :  { %8624 = vmatprep.subr.bf16.mxu0 %v9334_v0 }
0x1562   :  { %v10031_v46 = vpop.f32.mrb[24].mxu0 }
0x1563   :  { %v2083_v27 = vsub.f32 %v10031_v46, %v10006_v21  ;;  %v7152_v29 = vpop.f32.mrb[25].mxu0 }
0x1565   :  { %7186 = vmatmul.mubr.f32.vlgmr.msra.gmra.mrb[24].mxu1 %v2083_v27  ;;  %v8658_v27 = vpack.c.bf16 %v2464_v23, %v2463_v35  ;;  %v2911_v23 = vld [vmem:[#allocation2 + $0x300] sm:$0xff] }
0x1566   :  { %8617 = vmatpush3.bf16.msra.mxu1 %v9582_v5  ;;  %7219 = vmatprep.mubr.msk.f32.mxu1 %vm9335_vm0, %v9336_v1 }
0x1567   :  { %8618 = vmatprep.subr.bf16.mxu1 %v9334_v0 }
0x156a   :  { %8620 = vmatpush3.bf16.msra.mxu1 %v9588_v7 }
0x156b   :  { %8621 = vmatprep.subr.bf16.mxu1 %v9334_v0 }
0x156e   :  { %8623 = vmatpush3.bf16.msra.mxu1 %v9608_v16 }
0x156f   :  { %7217 = vmatprep.subr.mxu1 %v9336_v1 }
0x1572   :  { %7218 = vmatpush3.msk.msra.mxu1 %vm313_vm1, %v10046_v31 }
0x1573   :  { %8633 = vmatprep.subr.bf16.mxu1 %v9334_v0 }
0x1638   :  { %v2150_v33 = vpop.f32.mrb[24].mxu1 }
0x1639   :  { %v2151_v58 = vadd.f32 %v10054_v37, %v2150_v33  ;;  %v7187_v38 = vpop.f32.mrb[25].mxu1 }
0x163b   :  { %v2154_v39 = vmax.f32 %v2151_v58, 0.0 }
0x163d   :  { %7203 = vmatmul.mubr.msk.f32.vlgmr.msra.gmra.mrb[26].mxu0 %vm309_vm2, %v2154_v39  ;;  %v2466_v39 = vld [vmem:[#allocation2 + $0x2e8] sm:$0xff] }
0x163e   :  { %8626 = vmatpush3.bf16.msra.mxu0 %v9629_v22  ;;  %7236 = vmatprep.mubr.msk.f32.mxu0 %vm9335_vm0, %v9336_v1 }
0x163f   :  { %8627 = vmatprep.subr.bf16.mxu0 %v9334_v0 }
0x1642   :  { %8629 = vmatpush3.bf16.msra.mxu0 %v9635_v25 }
0x1643   :  { %8630 = vmatprep.subr.bf16.mxu0 %v9334_v0 }
0x1646   :  { %8632 = vmatpush3.bf16.msra.mxu0 %v9655_v34 }
0x1647   :  { %7234 = vmatprep.subr.mxu0 %v9336_v1 }
0x164a   :  { %7235 = vmatpush3.msk.msra.mxu0 %vm313_vm1, %v10069_v41 }
0x164b   :  { %8642 = vmatprep.subr.bf16.mxu0 %v9334_v0 }
0x1710   :  { %v2224_v44 = vpop.f32.mrb[26].mxu0 }
0x1711   :  { %v2225_v48 = vadd.f32 %v10077_v45, %v2224_v44  ;;  %v7204_v50 = vpop.f32.mrb[27].mxu0 }
0x1712   :  { %v2468_v50 = vld [vmem:[#allocation2 + $0x2f8] sm:$0xff] }
0x1713   :  { %v2228_v52 = vmax.f32 %v2225_v48, 0.0  ;;  %v2467_v48 = vld [vmem:[#allocation2 + $0x2f0] sm:$0xff] }
0x1715   :  { %7220 = vmatmul.mubr.msk.f32.vlgmr.msra.gmra.mrb[26].mxu1 %vm309_vm2, %v2228_v52  ;;  %v8664_v52 = vpack.c.bf16 %v2468_v50, %v2467_v48  ;;  %v2917_v48 = vld [vmem:[#allocation2 + $0x330] sm:$0xff]  ;;  %v2918_v50 = vld [vmem:[#allocation2 + $0x338] sm:$0xff] }
0x1716   :  { %8635 = vmatpush3.bf16.msra.mxu1 %v9667_v40  ;;  %7253 = vmatprep.mubr.msk.f32.mxu1 %vm9335_vm0, %v9336_v1 }
0x1717   :  { %8636 = vmatprep.subr.bf16.mxu1 %v9334_v0 }
0x171a   :  { %8638 = vmatpush3.bf16.msra.mxu1 %v9670_v43 }
0x171b   :  { %8639 = vmatprep.subr.bf16.mxu1 %v9334_v0 }
0x171e   :  { %8641 = vmatpush3.bf16.msra.mxu1 %v9684_v54 }
0x171f   :  { %7251 = vmatprep.subr.mxu1 %v9336_v1 }
0x1722   :  { %7252 = vmatpush3.msk.msra.mxu1 %vm313_vm1, %v9688_v56  ;;  %v2455_v56 = vld [vmem:[#allocation2 + $0x290] sm:$0xff] }
0x1723   :  { %8666 = vmatprep.subr.bf16.mxu1 %v9334_v0  ;;  %v8646_v12 = vpack.c.bf16 %v2456_v11, %v2455_v56 }
0x17e8   :  { %v2298_v53 = vpop.f32.mrb[26].mxu1 }
0x17e9   :  { %v2299_v61 = vadd.f32 %v10095_v59, %v2298_v53  ;;  %v7221_v2 = vpop.f32.mrb[27].mxu1 }
0x17eb   :  { %v2302_v3 = vmax.f32 %v2299_v61, 0.0 }
0x17ed   :  { %7237 = vmatmul.mubr.msk.f32.vlgmr.msra.gmra.mrb[28].mxu0 %vm309_vm2, %v2302_v3 }
0x17ee   :  { %7288 = vmatprep.mubr.msk.f32.mxu0 %vm9335_vm0, %v9336_v1  ;;  %8644 = vmatpush3.bf16.msra.mxu0 %v8643_v9 }
0x17ef   :  { %8645 = vmatprep.subr.bf16.mxu0 %v9334_v0 }
0x17f2   :  { %8647 = vmatpush3.bf16.msra.mxu0 %v8646_v12 }
0x17f3   :  { %8648 = vmatprep.subr.bf16.mxu0 %v9334_v0 }
0x17f6   :  { %8650 = vmatpush3.bf16.msra.mxu0 %v8649_v63 }
0x17f7   :  { %8651 = vmatprep.subr.bf16.mxu0 %v9334_v0 }
0x17fa   :  { %8653 = vmatpush3.bf16.msra.mxu0 %v8652_v19  ;;  %v10185_v19 = vld [vmem:[#allocation5 + $0x30] sm:$0x3] }
0x17fb   :  { %8654 = vmatprep.subr.bf16.mxu0 %v9334_v0 }
0x17fe   :  { %8656 = vmatpush3.bf16.msra.mxu0 %v8655_v20 }
0x17ff   :  { %8657 = vmatprep.subr.bf16.mxu0 %v9334_v0 }
0x1802   :  { %8659 = vmatpush3.bf16.msra.mxu0 %v8658_v27  ;;  %v2912_v27 = vld [vmem:[#allocation2 + $0x308] sm:$0xff] }
0x1803   :  { %8660 = vmatprep.subr.bf16.mxu0 %v9334_v0 }
0x18c0   :  { %v2372_v29 = vpop.f32.mrb[28].mxu0 }
0x18c1   :  { %v2373_v33 = vadd.f32 %v9702_v28, %v2372_v29  ;;  %v7238_v58 = vpop.f32.mrb[29].mxu0  ;;  %v2465_v28 = vld [vmem:[#allocation2 + $0x2e0] sm:$0xff]  ;;  %v2913_v29 = vld [vmem:[#allocation2 + $0x310] sm:$0xff] }
0x18c2   :  { %v8661_v44 = vpack.c.bf16 %v2466_v39, %v2465_v28  ;;  %v2914_v58 = vld [vmem:[#allocation2 + $0x318] sm:$0xff]  ;;  %v2915_v28 = vld [vmem:[#allocation2 + $0x320] sm:$0xff]  ;;  %v2916_v39 = vld [vmem:[#allocation2 + $0x328] sm:$0xff] }
0x18c3   :  { %v2376_v38 = vmax.f32 %v2373_v33, 0.0  ;;  %v8727_v33 = vpack.c.bf16 %v2912_v27, %v2911_v23 }
0x18c4   :  { %8662 = vmatpush3.bf16.msra.mxu0 %v8661_v44  ;;  %v8733_v44 = vpack.c.bf16 %v2916_v39, %v2915_v28 }
0x18c5   :  { %7254 = vmatmul.mubr.msk.f32.vlgmr.msra.gmra.mrb[28].mxu1 %vm309_vm2, %v2376_v38  ;;  %8663 = vmatprep.subr.bf16.mxu0 %v9334_v0  ;;  %v8730_v38 = vpack.c.bf16 %v2914_v58, %v2913_v29 }
0x18c6   :  { %8668 = vmatpush3.bf16.msra.mxu1 %v9446_v15  ;;  %7323 = vmatprep.mubr.msk.f32.mxu1 %vm9335_vm0, %v9336_v1 }
0x18c7   :  { %8669 = vmatprep.subr.bf16.mxu1 %v9334_v0 }
0x18c8   :  { %8665 = vmatpush3.bf16.msra.mxu0 %v8664_v52  ;;  %v8736_v52 = vpack.c.bf16 %v2918_v50, %v2917_v48 }
0x18c9   :  { %8690 = vmatprep.subr.bf16.mxu0 %v9334_v0 }
0x18ca   :  { %8671 = vmatpush3.bf16.msra.mxu1 %v9450_v18 }
0x18cb   :  { %8672 = vmatprep.subr.bf16.mxu1 %v9334_v0 }
0x18ce   :  { %8674 = vmatpush3.bf16.msra.mxu1 %v9461_v24 }
0x18cf   :  { %8675 = vmatprep.subr.bf16.mxu1 %v9334_v0 }
0x18d2   :  { %8677 = vmatpush3.bf16.msra.mxu1 %v9472_v30 }
0x18d3   :  { %8678 = vmatprep.subr.bf16.mxu1 %v9334_v0 }
0x18d6   :  { %8680 = vmatpush3.bf16.msra.mxu1 %v9483_v36 }
0x18d7   :  { %8681 = vmatprep.subr.bf16.mxu1 %v9334_v0 }
0x18da   :  { %8683 = vmatpush3.bf16.msra.mxu1 %v9494_v42 }
0x18db   :  { %8684 = vmatprep.subr.bf16.mxu1 %v9334_v0 }
0x18de   :  { %8686 = vmatpush3.bf16.msra.mxu1 %v9510_v47 }
0x18df   :  { %8687 = vmatprep.subr.bf16.mxu1 %v9334_v0 }
0x18e2   :  { %8689 = vmatpush3.bf16.msra.mxu1 %v9523_v51 }
0x18e3   :  { %8699 = vmatprep.subr.bf16.mxu1 %v9334_v0 }
0x1998   :  { %v2446_v53 = vpop.f32.mrb[28].mxu1 }
0x1999   :  { %v2447_v61 = vadd.f32 %v9729_v49, %v2446_v53  ;;  %v7255_v2 = vpop.f32.mrb[29].mxu1  ;;  %v2919_v53 = vld [vmem:[#allocation2 + $0x340] sm:$0xff] }
0x199b   :  { %v2450_v3 = vsub.f32 %v10031_v46, %v2447_v61  ;;  %v2469_v6 = vadd.f32 %v10011_v26, %v2447_v61  ;;  %v2920_v61 = vld [vmem:[#allocation2 + $0x348] sm:$0xff] }
0x199c   :  { %v8739_v2 = vpack.c.bf16 %v2920_v61, %v2919_v53 }
0x199d   :  { %v10132_v4 = vsub.f32 %v10006_v21, %v2450_v3  ;;  %v2921_v3 = vld [vmem:[#allocation2 + $0x350] sm:$0xff] }
0x199f   :  { %v2470_v56 = vadd.f32 %v2469_v6, %v10132_v4  ;;  %v2922_v6 = vld [vmem:[#allocation2 + $0x358] sm:$0xff] }
0x19a1   :  { %7289 = vmatmul.mubr.f32.vlgmr.msra.gmra.mrb[30].mxu0 %v2470_v56  ;;  %v8742_v56 = vpack.c.bf16 %v2922_v6, %v2921_v3 }
0x19a2   :  { %8692 = vmatpush3.bf16.msra.mxu0 %v9539_v55  ;;  %7340 = vmatprep.mubr.msk.f32.mxu0 %vm9335_vm0, %v9336_v1 }
0x19a3   :  { %8693 = vmatprep.subr.bf16.mxu0 %v9334_v0 }
0x19a6   :  { %8695 = vmatpush3.bf16.msra.mxu0 %v9545_v57 }
0x19a7   :  { %8696 = vmatprep.subr.bf16.mxu0 %v9334_v0 }
0x19aa   :  { %8698 = vmatpush3.bf16.msra.mxu0 %v9561_v62 }
0x19ab   :  { %7338 = vmatprep.subr.mxu0 %v9336_v1 }
0x19ae   :  { %7339 = vmatpush3.msk.msra.mxu0 %vm313_vm1, %v10026_v10 }
0x19af   :  { %8708 = vmatprep.subr.bf16.mxu0 %v9334_v0 }
0x1a74   :  { %v10147_v49 = vpop.f32.mrb[30].mxu0 }
0x1a75   :  { %v2541_v21 = vsub.f32 %v10147_v49, %v10132_v4  ;;  %v7290_v46 = vpop.f32.mrb[31].mxu0 }
0x1a76   :  { %v10203_v46 = vld [vmem:[%s10810_s9] ss:$0 sm:$0xff] }
0x1a77   :  { %7324 = vmatmul.mubr.f32.vlgmr.msra.gmra.mrb[30].mxu1 %v2541_v21 }
0x1a78   :  { %8701 = vmatpush3.bf16.msra.mxu1 %v9582_v5  ;;  %7357 = vmatprep.mubr.msk.f32.mxu1 %vm9335_vm0, %v9336_v1 }
0x1a79   :  { %8702 = vmatprep.subr.bf16.mxu1 %v9334_v0 }
0x1a7c   :  { %8704 = vmatpush3.bf16.msra.mxu1 %v9588_v7 }
0x1a7d   :  { %8705 = vmatprep.subr.bf16.mxu1 %v9334_v0 }
0x1a80   :  { %8707 = vmatpush3.bf16.msra.mxu1 %v9608_v16 }
0x1a81   :  { %7355 = vmatprep.subr.mxu1 %v9336_v1 }
0x1a84   :  { %7356 = vmatpush3.msk.msra.mxu1 %vm313_vm1, %v10046_v31 }
0x1a85   :  { %8717 = vmatprep.subr.bf16.mxu1 %v9334_v0 }
0x1b4a   :  { %v2608_v9 = vpop.f32.mrb[30].mxu1 }
0x1b4b   :  { %v2609_v11 = vadd.f32 %v10054_v37, %v2608_v9  ;;  %v7325_v12 = vpop.f32.mrb[31].mxu1 }
0x1b4d   :  { %v2612_v32 = vmax.f32 %v2609_v11, 0.0 }
0x1b4f   :  { %7341 = vmatmul.mubr.msk.f32.vlgmr.msra.gmra.mrb[32].mxu0 %vm309_vm2, %v2612_v32  ;;  %v2923_v32 = vld [vmem:[#allocation2 + $0x360] sm:$0xff] }
0x1b50   :  { %8710 = vmatpush3.bf16.msra.mxu0 %v9629_v22  ;;  %7374 = vmatprep.mubr.msk.f32.mxu0 %vm9335_vm0, %v9336_v1 }
0x1b51   :  { %8711 = vmatprep.subr.bf16.mxu0 %v9334_v0 }
0x1b54   :  { %8713 = vmatpush3.bf16.msra.mxu0 %v9635_v25 }
0x1b55   :  { %8714 = vmatprep.subr.bf16.mxu0 %v9334_v0 }
0x1b58   :  { %8716 = vmatpush3.bf16.msra.mxu0 %v9655_v34 }
0x1b59   :  { %7372 = vmatprep.subr.mxu0 %v9336_v1 }
0x1b5c   :  { %7373 = vmatpush3.msk.msra.mxu0 %vm313_vm1, %v10069_v41 }
0x1b5d   :  { %8726 = vmatprep.subr.bf16.mxu0 %v9334_v0 }
0x1c22   :  { %v2682_v60 = vpop.f32.mrb[32].mxu0 }
0x1c23   :  { %v2683_v63 = vadd.f32 %v10077_v45, %v2682_v60  ;;  %v7342_v13 = vpop.f32.mrb[33].mxu0  ;;  %v2924_v60 = vld [vmem:[#allocation2 + $0x368] sm:$0xff] }
0x1c24   :  { %v2925_v13 = vld [vmem:[#allocation2 + $0x370] sm:$0xff] }
0x1c25   :  { %v2686_v14 = vmax.f32 %v2683_v63, 0.0  ;;  %v8745_v63 = vpack.c.bf16 %v2924_v60, %v2923_v32  ;;  %v3372_v32 = vld [vmem:[#allocation2 + $0x398] sm:$0xff] }
0x1c27   :  { %7358 = vmatmul.mubr.msk.f32.vlgmr.msra.gmra.mrb[32].mxu1 %vm309_vm2, %v2686_v14  ;;  %v2926_v14 = vld [vmem:[#allocation2 + $0x378] sm:$0xff] }
0x1c28   :  { %8719 = vmatpush3.bf16.msra.mxu1 %v9667_v40  ;;  %7391 = vmatprep.mubr.msk.f32.mxu1 %vm9335_vm0, %v9336_v1 }
0x1c29   :  { %8720 = vmatprep.subr.bf16.mxu1 %v9334_v0 }
0x1c2c   :  { %8722 = vmatpush3.bf16.msra.mxu1 %v9670_v43 }
0x1c2d   :  { %8723 = vmatprep.subr.bf16.mxu1 %v9334_v0 }
0x1c30   :  { %8725 = vmatpush3.bf16.msra.mxu1 %v9684_v54 }
0x1c31   :  { %7389 = vmatprep.subr.mxu1 %v9336_v1 }
0x1c34   :  { %7390 = vmatpush3.msk.msra.mxu1 %vm313_vm1, %v10185_v19 }
0x1c35   :  { %8750 = vmatprep.subr.bf16.mxu1 %v9334_v0 }
0x1cfa   :  { %v2756_v8 = vpop.f32.mrb[32].mxu1 }
0x1cfb   :  { %v2757_v17 = vadd.f32 %v10095_v59, %v2756_v8  ;;  %v7359_v20 = vpop.f32.mrb[33].mxu1  ;;  %v8748_v8 = vpack.c.bf16 %v2926_v14, %v2925_v13  ;;  %v3374_v13 = vld [vmem:[#allocation2 + $0x3a8] sm:$0xff] }
0x1cfc   :  { %v10230_v20 = vld [vmem:[%s10812_s11] ss:$0 sm:$0xff] }
0x1cfd   :  { %v2760_v35 = vmax.f32 %v2757_v17, 0.0 }
0x1cff   :  { %7375 = vmatmul.mubr.msk.f32.vlgmr.msra.gmra.mrb[34].mxu0 %vm309_vm2, %v2760_v35 }
0x1d00   :  { %7426 = vmatprep.mubr.msk.f32.mxu0 %vm9335_vm0, %v9336_v1  ;;  %8728 = vmatpush3.bf16.msra.mxu0 %v8727_v33 }
0x1d01   :  { %8729 = vmatprep.subr.bf16.mxu0 %v9334_v0 }
0x1d04   :  { %8731 = vmatpush3.bf16.msra.mxu0 %v8730_v38 }
0x1d05   :  { %8732 = vmatprep.subr.bf16.mxu0 %v9334_v0 }
0x1d08   :  { %8734 = vmatpush3.bf16.msra.mxu0 %v8733_v44 }
0x1d09   :  { %8735 = vmatprep.subr.bf16.mxu0 %v9334_v0 }
0x1d0c   :  { %8737 = vmatpush3.bf16.msra.mxu0 %v8736_v52 }
0x1d0d   :  { %8738 = vmatprep.subr.bf16.mxu0 %v9334_v0 }
0x1d10   :  { %8740 = vmatpush3.bf16.msra.mxu0 %v8739_v2 }
0x1d11   :  { %8741 = vmatprep.subr.bf16.mxu0 %v9334_v0 }
0x1d14   :  { %8743 = vmatpush3.bf16.msra.mxu0 %v8742_v56 }
0x1d15   :  { %8744 = vmatprep.subr.bf16.mxu0 %v9334_v0 }
0x1d18   :  { %8746 = vmatpush3.bf16.msra.mxu0 %v8745_v63  ;;  %v3373_v63 = vld [vmem:[#allocation2 + $0x3a0] sm:$0xff] }
0x1d19   :  { %8747 = vmatprep.subr.bf16.mxu0 %v9334_v0  ;;  %v8817_v14 = vpack.c.bf16 %v3374_v13, %v3373_v63 }
0x1d1c   :  { %8749 = vmatpush3.bf16.msra.mxu0 %v8748_v8  ;;  %v3375_v8 = vld [vmem:[#allocation2 + $0x3b0] sm:$0xff] }
0x1d1d   :  { %8774 = vmatprep.subr.bf16.mxu0 %v9334_v0 }
0x1dd2   :  { %v2830_v21 = vpop.f32.mrb[34].mxu0 }
0x1dd3   :  { %v2831_v9 = vadd.f32 %v10203_v46, %v2830_v21  ;;  %v7376_v11 = vpop.f32.mrb[35].mxu0  ;;  %v3369_v21 = vld [vmem:[#allocation2 + $0x380] sm:$0xff] }
0x1dd4   :  { %v3371_v11 = vld [vmem:[#allocation2 + $0x390] sm:$0xff] }
0x1dd5   :  { %v2834_v12 = vmax.f32 %v2831_v9, 0.0  ;;  %v3370_v9 = vld [vmem:[#allocation2 + $0x388] sm:$0xff]  ;;  %v8814_v60 = vpack.c.bf16 %v3372_v32, %v3371_v11 }
0x1dd7   :  { %7392 = vmatmul.mubr.msk.f32.vlgmr.msra.gmra.mrb[34].mxu1 %vm309_vm2, %v2834_v12  ;;  %v8811_v12 = vpack.c.bf16 %v3370_v9, %v3369_v21 }
0x1dd8   :  { %8752 = vmatpush3.bf16.msra.mxu1 %v9446_v15  ;;  %7461 = vmatprep.mubr.msk.f32.mxu1 %vm9335_vm0, %v9336_v1 }
0x1dd9   :  { %8753 = vmatprep.subr.bf16.mxu1 %v9334_v0 }
0x1ddc   :  { %8755 = vmatpush3.bf16.msra.mxu1 %v9450_v18 }
0x1ddd   :  { %8756 = vmatprep.subr.bf16.mxu1 %v9334_v0 }
0x1de0   :  { %8758 = vmatpush3.bf16.msra.mxu1 %v9461_v24 }
0x1de1   :  { %8759 = vmatprep.subr.bf16.mxu1 %v9334_v0 }
0x1de4   :  { %8761 = vmatpush3.bf16.msra.mxu1 %v9472_v30 }
0x1de5   :  { %8762 = vmatprep.subr.bf16.mxu1 %v9334_v0 }
0x1de8   :  { %8764 = vmatpush3.bf16.msra.mxu1 %v9483_v36 }
0x1de9   :  { %8765 = vmatprep.subr.bf16.mxu1 %v9334_v0 }
0x1dec   :  { %8767 = vmatpush3.bf16.msra.mxu1 %v9494_v42 }
0x1ded   :  { %8768 = vmatprep.subr.bf16.mxu1 %v9334_v0 }
0x1df0   :  { %8770 = vmatpush3.bf16.msra.mxu1 %v9510_v47 }
0x1df1   :  { %8771 = vmatprep.subr.bf16.mxu1 %v9334_v0 }
0x1df4   :  { %8773 = vmatpush3.bf16.msra.mxu1 %v9523_v51 }
0x1df5   :  { %8783 = vmatprep.subr.bf16.mxu1 %v9334_v0 }
0x1eaa   :  { %v2904_v17 = vpop.f32.mrb[34].mxu1 }
0x1eab   :  { %v2905_v35 = vadd.f32 %v10230_v20, %v2904_v17  ;;  %v7393_v23 = vpop.f32.mrb[35].mxu1  ;;  %v3376_v17 = vld [vmem:[#allocation2 + $0x3b8] sm:$0xff] }
0x1eac   :  { %v3377_v23 = vld [vmem:[#allocation2 + $0x3c0] sm:$0xff] }
0x1ead   :  { %v2908_v27 = vsub.f32 %v10147_v49, %v2905_v35  ;;  %v2927_v33 = vadd.f32 %v10011_v26, %v2905_v35  ;;  %v8820_v35 = vpack.c.bf16 %v3376_v17, %v3375_v8 }
0x1eaf   :  { %v10235_v29 = vsub.f32 %v10132_v4, %v2908_v27  ;;  %v3378_v27 = vld [vmem:[#allocation2 + $0x3c8] sm:$0xff] }
0x1eb1   :  { %v2928_v58 = vadd.f32 %v2927_v33, %v10235_v29  ;;  %v8823_v33 = vpack.c.bf16 %v3378_v27, %v3377_v23 }
0x1eb3   :  { %7427 = vmatmul.mubr.f32.vlgmr.msra.gmra.mrb[36].mxu0 %v2928_v58  ;;  %v3379_v58 = vld [vmem:[#allocation2 + $0x3d0] sm:$0xff] }
0x1eb4   :  { %8776 = vmatpush3.bf16.msra.mxu0 %v9539_v55  ;;  %7478 = vmatprep.mubr.msk.f32.mxu0 %vm9335_vm0, %v9336_v1 }
0x1eb5   :  { %8777 = vmatprep.subr.bf16.mxu0 %v9334_v0 }
0x1eb8   :  { %8779 = vmatpush3.bf16.msra.mxu0 %v9545_v57 }
0x1eb9   :  { %8780 = vmatprep.subr.bf16.mxu0 %v9334_v0 }
0x1ebc   :  { %8782 = vmatpush3.bf16.msra.mxu0 %v9561_v62 }
0x1ebd   :  { %7476 = vmatprep.subr.mxu0 %v9336_v1 }
0x1ec0   :  { %7477 = vmatpush3.msk.msra.mxu0 %vm313_vm1, %v10026_v10 }
0x1ec1   :  { %8792 = vmatprep.subr.bf16.mxu0 %v9334_v0 }
0x1f86   :  { %v10250_v4 = vpop.f32.mrb[36].mxu0 }
0x1f87   :  { %v2999_v49 = vsub.f32 %v10250_v4, %v10235_v29  ;;  %v7428_v38 = vpop.f32.mrb[37].mxu0 }
0x1f89   :  { %7462 = vmatmul.mubr.f32.vlgmr.msra.gmra.mrb[36].mxu1 %v2999_v49  ;;  %v3380_v49 = vld [vmem:[#allocation2 + $0x3d8] sm:$0xff] }
0x1f8a   :  { %8785 = vmatpush3.bf16.msra.mxu1 %v9582_v5  ;;  %7495 = vmatprep.mubr.msk.f32.mxu1 %vm9335_vm0, %v9336_v1  ;;  %v8826_v38 = vpack.c.bf16 %v3380_v49, %v3379_v58 }
0x1f8b   :  { %8786 = vmatprep.subr.bf16.mxu1 %v9334_v0 }
0x1f8e   :  { %8788 = vmatpush3.bf16.msra.mxu1 %v9588_v7 }
0x1f8f   :  { %8789 = vmatprep.subr.bf16.mxu1 %v9334_v0 }
0x1f92   :  { %8791 = vmatpush3.bf16.msra.mxu1 %v9608_v16 }
0x1f93   :  { %7493 = vmatprep.subr.mxu1 %v9336_v1 }
0x1f96   :  { %7494 = vmatpush3.msk.msra.mxu1 %vm313_vm1, %v10046_v31 }
0x1f97   :  { %8801 = vmatprep.subr.bf16.mxu1 %v9334_v0 }
0x205c   :  { %v3066_v28 = vpop.f32.mrb[36].mxu1 }
0x205d   :  { %v3067_v39 = vadd.f32 %v10054_v37, %v3066_v28  ;;  %v7463_v44 = vpop.f32.mrb[37].mxu1 }
0x205f   :  { %v3070_v48 = vmax.f32 %v3067_v39, 0.0 }
0x2061   :  { %7479 = vmatmul.mubr.msk.f32.vlgmr.msra.gmra.mrb[38].mxu0 %vm309_vm2, %v3070_v48 }
0x2062   :  { %8794 = vmatpush3.bf16.msra.mxu0 %v9629_v22  ;;  %7512 = vmatprep.mubr.msk.f32.mxu0 %vm9335_vm0, %v9336_v1 }
0x2063   :  { %8795 = vmatprep.subr.bf16.mxu0 %v9334_v0 }
0x2066   :  { %8797 = vmatpush3.bf16.msra.mxu0 %v9635_v25 }
0x2067   :  { %8798 = vmatprep.subr.bf16.mxu0 %v9334_v0 }
0x206a   :  { %8800 = vmatpush3.bf16.msra.mxu0 %v9655_v34 }
0x206b   :  { %7510 = vmatprep.subr.mxu0 %v9336_v1 }
0x206e   :  { %7511 = vmatpush3.msk.msra.mxu0 %vm313_vm1, %v10069_v41 }
0x206f   :  { %8810 = vmatprep.subr.bf16.mxu0 %v9334_v0 }
0x2134   :  { %v3140_v50 = vpop.f32.mrb[38].mxu0 }
0x2135   :  { %v3141_v52 = vadd.f32 %v10077_v45, %v3140_v50  ;;  %v7480_v53 = vpop.f32.mrb[39].mxu0  ;;  %v3381_v50 = vld [vmem:[#allocation2 + $0x3e0] sm:$0xff] }
0x2137   :  { %v3144_v61 = vmax.f32 %v3141_v52, 0.0  ;;  %v3382_v52 = vld [vmem:[#allocation2 + $0x3e8] sm:$0xff] }
0x2138   :  { %v8829_v53 = vpack.c.bf16 %v3382_v52, %v3381_v50  ;;  %v3830_v50 = vld [vmem:[#allocation2 + $0x418] sm:$0xff] }
0x2139   :  { %7496 = vmatmul.mubr.msk.f32.vlgmr.msra.gmra.mrb[38].mxu1 %vm309_vm2, %v3144_v61  ;;  %v3383_v61 = vld [vmem:[#allocation2 + $0x3f0] sm:$0xff] }
0x213a   :  { %8803 = vmatpush3.bf16.msra.mxu1 %v9667_v40  ;;  %7529 = vmatprep.mubr.msk.f32.mxu1 %vm9335_vm0, %v9336_v1 }
0x213b   :  { %8804 = vmatprep.subr.bf16.mxu1 %v9334_v0 }
0x213e   :  { %8806 = vmatpush3.bf16.msra.mxu1 %v9670_v43 }
0x213f   :  { %8807 = vmatprep.subr.bf16.mxu1 %v9334_v0 }
0x2142   :  { %8809 = vmatpush3.bf16.msra.mxu1 %v9684_v54 }
0x2143   :  { %7527 = vmatprep.subr.mxu1 %v9336_v1 }
0x2146   :  { %7528 = vmatpush3.msk.msra.mxu1 %vm313_vm1, %v10185_v19 }
0x2147   :  { %8834 = vmatprep.subr.bf16.mxu1 %v9334_v0 }
0x220c   :  { %v3214_v2 = vpop.f32.mrb[38].mxu1 }
0x220d   :  { %v3215_v3 = vadd.f32 %v10095_v59, %v3214_v2  ;;  %v7497_v6 = vpop.f32.mrb[39].mxu1  ;;  %v3384_v2 = vld [vmem:[#allocation2 + $0x3f8] sm:$0xff] }
0x220f   :  { %v3218_v56 = vmax.f32 %v3215_v3, 0.0  ;;  %v8832_v3 = vpack.c.bf16 %v3384_v2, %v3383_v61  ;;  %v3832_v61 = vld [vmem:[#allocation2 + $0x428] sm:$0xff] }
0x2211   :  { %7513 = vmatmul.mubr.msk.f32.vlgmr.msra.gmra.mrb[40].mxu0 %vm309_vm2, %v3218_v56 }
0x2212   :  { %7564 = vmatprep.mubr.msk.f32.mxu0 %vm9335_vm0, %v9336_v1  ;;  %8812 = vmatpush3.bf16.msra.mxu0 %v8811_v12 }
0x2213   :  { %8813 = vmatprep.subr.bf16.mxu0 %v9334_v0 }
0x2216   :  { %8815 = vmatpush3.bf16.msra.mxu0 %v8814_v60 }
0x2217   :  { %8816 = vmatprep.subr.bf16.mxu0 %v9334_v0 }
0x221a   :  { %8818 = vmatpush3.bf16.msra.mxu0 %v8817_v14 }
0x221b   :  { %8819 = vmatprep.subr.bf16.mxu0 %v9334_v0 }
0x221e   :  { %8821 = vmatpush3.bf16.msra.mxu0 %v8820_v35 }
0x221f   :  { %8822 = vmatprep.subr.bf16.mxu0 %v9334_v0 }
0x2222   :  { %8824 = vmatpush3.bf16.msra.mxu0 %v8823_v33 }
0x2223   :  { %8825 = vmatprep.subr.bf16.mxu0 %v9334_v0 }
0x2226   :  { %8827 = vmatpush3.bf16.msra.mxu0 %v8826_v38 }
0x2227   :  { %8828 = vmatprep.subr.bf16.mxu0 %v9334_v0 }
0x222a   :  { %8830 = vmatpush3.bf16.msra.mxu0 %v8829_v53  ;;  %v3831_v53 = vld [vmem:[#allocation2 + $0x420] sm:$0xff] }
0x222b   :  { %8831 = vmatprep.subr.bf16.mxu0 %v9334_v0  ;;  %v8901_v2 = vpack.c.bf16 %v3832_v61, %v3831_v53 }
0x222e   :  { %8833 = vmatpush3.bf16.msra.mxu0 %v8832_v3  ;;  %v3833_v3 = vld [vmem:[#allocation2 + $0x430] sm:$0xff] }
0x222f   :  { %8858 = vmatprep.subr.bf16.mxu0 %v9334_v0 }
0x22e4   :  { %v3288_v28 = vpop.f32.mrb[40].mxu0 }
0x22e5   :  { %v3289_v39 = vadd.f32 %v10203_v46, %v3288_v28  ;;  %v7514_v44 = vpop.f32.mrb[41].mxu0  ;;  %v3827_v28 = vld [vmem:[#allocation2 + $0x400] sm:$0xff] }
0x22e6   :  { %v3829_v44 = vld [vmem:[#allocation2 + $0x410] sm:$0xff] }
0x22e7   :  { %v3292_v48 = vmax.f32 %v3289_v39, 0.0  ;;  %v3828_v39 = vld [vmem:[#allocation2 + $0x408] sm:$0xff]  ;;  %v8898_v52 = vpack.c.bf16 %v3830_v50, %v3829_v44 }
0x22e9   :  { %7530 = vmatmul.mubr.msk.f32.vlgmr.msra.gmra.mrb[40].mxu1 %vm309_vm2, %v3292_v48  ;;  %v8895_v48 = vpack.c.bf16 %v3828_v39, %v3827_v28 }
0x22ea   :  { %8836 = vmatpush3.bf16.msra.mxu1 %v9446_v15  ;;  %7599 = vmatprep.mubr.msk.f32.mxu1 %vm9335_vm0, %v9336_v1 }
0x22eb   :  { %8837 = vmatprep.subr.bf16.mxu1 %v9334_v0 }
0x22ee   :  { %8839 = vmatpush3.bf16.msra.mxu1 %v9450_v18 }
0x22ef   :  { %8840 = vmatprep.subr.bf16.mxu1 %v9334_v0 }
0x22f2   :  { %8842 = vmatpush3.bf16.msra.mxu1 %v9461_v24 }
0x22f3   :  { %8843 = vmatprep.subr.bf16.mxu1 %v9334_v0 }
0x22f6   :  { %8845 = vmatpush3.bf16.msra.mxu1 %v9472_v30 }
0x22f7   :  { %8846 = vmatprep.subr.bf16.mxu1 %v9334_v0 }
0x22fa   :  { %8848 = vmatpush3.bf16.msra.mxu1 %v9483_v36 }
0x22fb   :  { %8849 = vmatprep.subr.bf16.mxu1 %v9334_v0 }
0x22fe   :  { %8851 = vmatpush3.bf16.msra.mxu1 %v9494_v42 }
0x22ff   :  { %8852 = vmatprep.subr.bf16.mxu1 %v9334_v0 }
0x2302   :  { %8854 = vmatpush3.bf16.msra.mxu1 %v9510_v47 }
0x2303   :  { %8855 = vmatprep.subr.bf16.mxu1 %v9334_v0 }
0x2306   :  { %8857 = vmatpush3.bf16.msra.mxu1 %v9523_v51 }
0x2307   :  { %8867 = vmatprep.subr.bf16.mxu1 %v9334_v0 }
0x23bc   :  { %v3362_v6 = vpop.f32.mrb[40].mxu1 }
0x23bd   :  { %v3363_v56 = vadd.f32 %v10230_v20, %v3362_v6  ;;  %v7531_v21 = vpop.f32.mrb[41].mxu1  ;;  %v3834_v6 = vld [vmem:[#allocation2 + $0x438] sm:$0xff] }
0x23be   :  { %v3835_v21 = vld [vmem:[#allocation2 + $0x440] sm:$0xff] }
0x23bf   :  { %v3366_v9 = vsub.f32 %v10250_v4, %v3363_v56  ;;  %v3385_v12 = vadd.f32 %v10011_v26, %v3363_v56  ;;  %v8904_v56 = vpack.c.bf16 %v3834_v6, %v3833_v3 }
0x23c1   :  { %v10326_v11 = vsub.f32 %v10235_v29, %v3366_v9  ;;  %v3836_v9 = vld [vmem:[#allocation2 + $0x448] sm:$0xff] }
0x23c3   :  { %v3386_v32 = vadd.f32 %v3385_v12, %v10326_v11  ;;  %v8907_v12 = vpack.c.bf16 %v3836_v9, %v3835_v21  ;;  %v4285_v21 = vld [vmem:[#allocation2 + $0x480] sm:$0xff]  ;;  %v4286_v9 = vld [vmem:[#allocation2 + $0x488] sm:$0xff] }
0x23c5   :  { %7565 = vmatmul.mubr.f32.vlgmr.msra.gmra.mrb[42].mxu0 %v3386_v32  ;;  %v3837_v32 = vld [vmem:[#allocation2 + $0x450] sm:$0xff] }
0x23c6   :  { %8860 = vmatpush3.bf16.msra.mxu0 %v9539_v55  ;;  %7616 = vmatprep.mubr.msk.f32.mxu0 %vm9335_vm0, %v9336_v1 }
0x23c7   :  { %8861 = vmatprep.subr.bf16.mxu0 %v9334_v0 }
0x23ca   :  { %8863 = vmatpush3.bf16.msra.mxu0 %v9545_v57 }
0x23cb   :  { %8864 = vmatprep.subr.bf16.mxu0 %v9334_v0 }
0x23ce   :  { %8866 = vmatpush3.bf16.msra.mxu0 %v9561_v62 }
0x23cf   :  { %7614 = vmatprep.subr.mxu0 %v9336_v1 }
0x23d2   :  { %7615 = vmatpush3.msk.msra.mxu0 %vm313_vm1, %v10026_v10 }
0x23d3   :  { %8876 = vmatprep.subr.bf16.mxu0 %v9334_v0 }
0x2498   :  { %v10341_v29 = vpop.f32.mrb[42].mxu0 }
0x2499   :  { %v3457_v4 = vsub.f32 %v10341_v29, %v10326_v11  ;;  %v7566_v60 = vpop.f32.mrb[43].mxu0 }
0x249b   :  { %7600 = vmatmul.mubr.f32.vlgmr.msra.gmra.mrb[42].mxu1 %v3457_v4  ;;  %v3838_v4 = vld [vmem:[#allocation2 + $0x458] sm:$0xff] }
0x249c   :  { %8869 = vmatpush3.bf16.msra.mxu1 %v9582_v5  ;;  %7633 = vmatprep.mubr.msk.f32.mxu1 %vm9335_vm0, %v9336_v1  ;;  %v8910_v60 = vpack.c.bf16 %v3838_v4, %v3837_v32  ;;  %v8979_v32 = vpack.c.bf16 %v4286_v9, %v4285_v21  ;;  %v4288_v4 = vld [vmem:[#allocation2 + $0x498] sm:$0xff]  ;;  %v10548_v9 = vld [vmem:[%s10807_s6 + $0x30] sm:$0x3] }
0x249d   :  { %8870 = vmatprep.subr.bf16.mxu1 %v9334_v0 }
0x24a0   :  { %8872 = vmatpush3.bf16.msra.mxu1 %v9588_v7 }
0x24a1   :  { %8873 = vmatprep.subr.bf16.mxu1 %v9334_v0 }
0x24a4   :  { %8875 = vmatpush3.bf16.msra.mxu1 %v9608_v16 }
0x24a5   :  { %7631 = vmatprep.subr.mxu1 %v9336_v1 }
0x24a8   :  { %7632 = vmatpush3.msk.msra.mxu1 %vm313_vm1, %v10046_v31 }
0x24a9   :  { %8885 = vmatprep.subr.bf16.mxu1 %v9334_v0 }
0x256e   :  { %v3524_v63 = vpop.f32.mrb[42].mxu1 }
0x256f   :  { %v3525_v13 = vadd.f32 %v10054_v37, %v3524_v63  ;;  %v7601_v14 = vpop.f32.mrb[43].mxu1 }
0x2571   :  { %v3528_v8 = vmax.f32 %v3525_v13, 0.0 }
0x2573   :  { %7617 = vmatmul.mubr.msk.f32.vlgmr.msra.gmra.mrb[44].mxu0 %vm309_vm2, %v3528_v8 }
0x2574   :  { %8878 = vmatpush3.bf16.msra.mxu0 %v9629_v22  ;;  %7650 = vmatprep.mubr.msk.f32.mxu0 %vm9335_vm0, %v9336_v1 }
0x2575   :  { %8879 = vmatprep.subr.bf16.mxu0 %v9334_v0 }
0x2578   :  { %8881 = vmatpush3.bf16.msra.mxu0 %v9635_v25 }
0x2579   :  { %8882 = vmatprep.subr.bf16.mxu0 %v9334_v0 }
0x257c   :  { %8884 = vmatpush3.bf16.msra.mxu0 %v9655_v34 }
0x257d   :  { %7648 = vmatprep.subr.mxu0 %v9336_v1 }
0x2580   :  { %7649 = vmatpush3.msk.msra.mxu0 %vm313_vm1, %v10069_v41 }
0x2581   :  { %8894 = vmatprep.subr.bf16.mxu0 %v9334_v0 }
0x2646   :  { %v3598_v17 = vpop.f32.mrb[44].mxu0 }
0x2647   :  { %v3599_v35 = vadd.f32 %v10077_v45, %v3598_v17  ;;  %v7618_v23 = vpop.f32.mrb[45].mxu0  ;;  %v3839_v17 = vld [vmem:[#allocation2 + $0x460] sm:$0xff] }
0x2649   :  { %v3602_v27 = vmax.f32 %v3599_v35, 0.0  ;;  %v3840_v35 = vld [vmem:[#allocation2 + $0x468] sm:$0xff] }
0x264a   :  { %v8913_v23 = vpack.c.bf16 %v3840_v35, %v3839_v17  ;;  %v4293_v35 = vld [vmem:[#allocation2 + $0x4c0] sm:$0xff] }
0x264b   :  { %7634 = vmatmul.mubr.msk.f32.vlgmr.msra.gmra.mrb[44].mxu1 %vm309_vm2, %v3602_v27  ;;  %v3841_v27 = vld [vmem:[#allocation2 + $0x470] sm:$0xff] }
0x264c   :  { %8887 = vmatpush3.bf16.msra.mxu1 %v9667_v40  ;;  %7667 = vmatprep.mubr.msk.f32.mxu1 %vm9335_vm0, %v9336_v1 }
0x264d   :  { %8888 = vmatprep.subr.bf16.mxu1 %v9334_v0 }
0x2650   :  { %8890 = vmatpush3.bf16.msra.mxu1 %v9670_v43 }
0x2651   :  { %8891 = vmatprep.subr.bf16.mxu1 %v9334_v0 }
0x2654   :  { %8893 = vmatpush3.bf16.msra.mxu1 %v9684_v54 }
0x2655   :  { %7665 = vmatprep.subr.mxu1 %v9336_v1 }
0x2658   :  { %7666 = vmatpush3.msk.msra.mxu1 %vm313_vm1, %v10185_v19 }
0x2659   :  { %8918 = vmatprep.subr.bf16.mxu1 %v9334_v0 }
0x271e   :  { %v3672_v33 = vpop.f32.mrb[44].mxu1 }
0x271f   :  { %v3673_v58 = vadd.f32 %v10095_v59, %v3672_v33  ;;  %v7635_v49 = vpop.f32.mrb[45].mxu1  ;;  %v3842_v33 = vld [vmem:[#allocation2 + $0x478] sm:$0xff] }
0x2721   :  { %v3676_v38 = vmax.f32 %v3673_v58, 0.0  ;;  %v8916_v58 = vpack.c.bf16 %v3842_v33, %v3841_v27  ;;  %v4295_v33 = vld [vmem:[#allocation2 + $0x4d0] sm:$0xff] }
0x2723   :  { %7651 = vmatmul.mubr.msk.f32.vlgmr.msra.gmra.mrb[46].mxu0 %vm309_vm2, %v3676_v38 }
0x2724   :  { %7702 = vmatprep.mubr.msk.f32.mxu0 %vm9335_vm0, %v9336_v1  ;;  %8896 = vmatpush3.bf16.msra.mxu0 %v8895_v48 }
0x2725   :  { %8897 = vmatprep.subr.bf16.mxu0 %v9334_v0 }
0x2728   :  { %8899 = vmatpush3.bf16.msra.mxu0 %v8898_v52 }
0x2729   :  { %8900 = vmatprep.subr.bf16.mxu0 %v9334_v0 }
0x272c   :  { %8902 = vmatpush3.bf16.msra.mxu0 %v8901_v2 }
0x272d   :  { %8903 = vmatprep.subr.bf16.mxu0 %v9334_v0 }
0x2730   :  { %8905 = vmatpush3.bf16.msra.mxu0 %v8904_v56 }
0x2731   :  { %8906 = vmatprep.subr.bf16.mxu0 %v9334_v0 }
0x2734   :  { %8908 = vmatpush3.bf16.msra.mxu0 %v8907_v12  ;;  %v4287_v12 = vld [vmem:[#allocation2 + $0x490] sm:$0xff] }
0x2735   :  { %8909 = vmatprep.subr.bf16.mxu0 %v9334_v0 }
0x2738   :  { %8911 = vmatpush3.bf16.msra.mxu0 %v8910_v60  ;;  %v8982_v60 = vpack.c.bf16 %v4288_v4, %v4287_v12 }
0x2739   :  { %8912 = vmatprep.subr.bf16.mxu0 %v9334_v0 }
0x273c   :  { %8914 = vmatpush3.bf16.msra.mxu0 %v8913_v23  ;;  %v4294_v23 = vld [vmem:[#allocation2 + $0x4c8] sm:$0xff] }
0x273d   :  { %8915 = vmatprep.subr.bf16.mxu0 %v9334_v0  ;;  %v8991_v27 = vpack.c.bf16 %v4294_v23, %v4293_v35 }
0x2740   :  { %8917 = vmatpush3.bf16.msra.mxu0 %v8916_v58  ;;  %v4296_v58 = vld [vmem:[#allocation2 + $0x4d8] sm:$0xff] }
0x2741   :  { %8942 = vmatprep.subr.bf16.mxu0 %v9334_v0 }
0x27f6   :  { %v3746_v63 = vpop.f32.mrb[46].mxu0 }
0x27f7   :  { %v3747_v13 = vadd.f32 %v10203_v46, %v3746_v63  ;;  %v7652_v14 = vpop.f32.mrb[47].mxu0  ;;  %v4289_v63 = vld [vmem:[#allocation2 + $0x4a0] sm:$0xff] }
0x27f8   :  { %v4291_v14 = vld [vmem:[#allocation2 + $0x4b0] sm:$0xff] }
0x27f9   :  { %v3750_v8 = vmax.f32 %v3747_v13, 0.0  ;;  %v4290_v13 = vld [vmem:[#allocation2 + $0x4a8] sm:$0xff] }
0x27fb   :  { %7668 = vmatmul.mubr.msk.f32.vlgmr.msra.gmra.mrb[46].mxu1 %vm309_vm2, %v3750_v8  ;;  %v4292_v8 = vld [vmem:[#allocation2 + $0x4b8] sm:$0xff] }
0x27fc   :  { %8920 = vmatpush3.bf16.msra.mxu1 %v9446_v15  ;;  %7737 = vmatprep.mubr.msk.f32.mxu1 %vm9335_vm0, %v9336_v1  ;;  %v8988_v17 = vpack.c.bf16 %v4292_v8, %v4291_v14  ;;  %v10579_v14 = vld [vmem:[%s10806_s5] ss:$0 sm:$0xff] }
0x27fd   :  { %8921 = vmatprep.subr.bf16.mxu1 %v9334_v0 }
0x2800   :  { %8923 = vmatpush3.bf16.msra.mxu1 %v9450_v18 }
0x2801   :  { %8924 = vmatprep.subr.bf16.mxu1 %v9334_v0 }
0x2804   :  { %8926 = vmatpush3.bf16.msra.mxu1 %v9461_v24 }
0x2805   :  { %8927 = vmatprep.subr.bf16.mxu1 %v9334_v0 }
0x2808   :  { %8929 = vmatpush3.bf16.msra.mxu1 %v9472_v30 }
0x2809   :  { %8930 = vmatprep.subr.bf16.mxu1 %v9334_v0 }
0x280c   :  { %8932 = vmatpush3.bf16.msra.mxu1 %v9483_v36 }
0x280d   :  { %8933 = vmatprep.subr.bf16.mxu1 %v9334_v0 }
0x2810   :  { %8935 = vmatpush3.bf16.msra.mxu1 %v9494_v42 }
0x2811   :  { %8936 = vmatprep.subr.bf16.mxu1 %v9334_v0 }
0x2814   :  { %8938 = vmatpush3.bf16.msra.mxu1 %v9510_v47 }
0x2815   :  { %8939 = vmatprep.subr.bf16.mxu1 %v9334_v0 }
0x2818   :  { %8941 = vmatpush3.bf16.msra.mxu1 %v9523_v51 }
0x2819   :  { %8951 = vmatprep.subr.bf16.mxu1 %v9334_v0 }
0x28ce   :  { %v3820_v49 = vpop.f32.mrb[46].mxu1 }
0x28cf   :  { %v3821_v38 = vadd.f32 %v10230_v20, %v3820_v49  ;;  %v7669_v28 = vpop.f32.mrb[47].mxu1  ;;  %v8994_v49 = vpack.c.bf16 %v4296_v58, %v4295_v33 }
0x28d1   :  { %v3824_v39 = vsub.f32 %v10341_v29, %v3821_v38  ;;  %v3843_v48 = vadd.f32 %v10011_v26, %v3821_v38 }
0x28d3   :  { %v10417_v44 = vsub.f32 %v10326_v11, %v3824_v39 }
0x28d5   :  { %v3844_v50 = vadd.f32 %v3843_v48, %v10417_v44 }
0x28d7   :  { %7703 = vmatmul.mubr.f32.vlgmr.msra.gmra.mrb[48].mxu0 %v3844_v50  ;;  %v4297_v50 = vld [vmem:[#allocation2 + $0x4e0] sm:$0xff] }
0x28d8   :  { %8944 = vmatpush3.bf16.msra.mxu0 %v9539_v55  ;;  %7754 = vmatprep.mubr.msk.f32.mxu0 %vm9335_vm0, %v9336_v1 }
0x28d9   :  { %8945 = vmatprep.subr.bf16.mxu0 %v9334_v0 }
0x28dc   :  { %8947 = vmatpush3.bf16.msra.mxu0 %v9545_v57 }
0x28dd   :  { %8948 = vmatprep.subr.bf16.mxu0 %v9334_v0 }
0x28e0   :  { %8950 = vmatpush3.bf16.msra.mxu0 %v9561_v62 }
0x28e1   :  { %7752 = vmatprep.subr.mxu0 %v9336_v1 }
0x28e4   :  { %7753 = vmatpush3.msk.msra.mxu0 %vm313_vm1, %v10026_v10 }
0x28e5   :  { %8960 = vmatprep.subr.bf16.mxu0 %v9334_v0 }
0x29aa   :  { %v10432_v26 = vpop.f32.mrb[48].mxu0 }
0x29ab   :  { %v3915_v11 = vsub.f32 %v10432_v26, %v10417_v44  ;;  %v7704_v29 = vpop.f32.mrb[49].mxu0 }
0x29ad   :  { %7738 = vmatmul.mubr.f32.vlgmr.msra.gmra.mrb[48].mxu1 %v3915_v11  ;;  %v4298_v11 = vld [vmem:[#allocation2 + $0x4e8] sm:$0xff] }
0x29ae   :  { %8953 = vmatpush3.bf16.msra.mxu1 %v9582_v5  ;;  %7771 = vmatprep.mubr.msk.f32.mxu1 %vm9335_vm0, %v9336_v1  ;;  %v8997_v29 = vpack.c.bf16 %v4298_v11, %v4297_v50  ;;  %v4747_v11 = vld [vmem:[#allocation2 + $0x520] sm:$0xff] }
0x29af   :  { %8954 = vmatprep.subr.bf16.mxu1 %v9334_v0 }
0x29b2   :  { %8956 = vmatpush3.bf16.msra.mxu1 %v9588_v7 }
0x29b3   :  { %8957 = vmatprep.subr.bf16.mxu1 %v9334_v0 }
0x29b6   :  { %8959 = vmatpush3.bf16.msra.mxu1 %v9608_v16 }
0x29b7   :  { %7769 = vmatprep.subr.mxu1 %v9336_v1 }
0x29ba   :  { %7770 = vmatpush3.msk.msra.mxu1 %vm313_vm1, %v10046_v31 }
0x29bb   :  { %8969 = vmatprep.subr.bf16.mxu1 %v9334_v0 }
0x2a80   :  { %v3982_v10 = vpop.f32.mrb[48].mxu1 }
0x2a81   :  { %v3983_v52 = vadd.f32 %v10054_v37, %v3982_v10  ;;  %v7739_v53 = vpop.f32.mrb[49].mxu1  ;;  %v4299_v10 = vld [vmem:[#allocation2 + $0x4f0] sm:$0xff] }
0x2a83   :  { %v3986_v61 = vmax.f32 %v3983_v52, 0.0  ;;  %v4300_v52 = vld [vmem:[#allocation2 + $0x4f8] sm:$0xff] }
0x2a84   :  { %v9000_v53 = vpack.c.bf16 %v4300_v52, %v4299_v10  ;;  %v4749_v52 = vld [vmem:[#allocation2 + $0x530] sm:$0xff] }
0x2a85   :  { %7755 = vmatmul.mubr.msk.f32.vlgmr.msra.gmra.mrb[50].mxu0 %vm309_vm2, %v3986_v61 }
0x2a86   :  { %8962 = vmatpush3.bf16.msra.mxu0 %v9629_v22  ;;  %7788 = vmatprep.mubr.msk.f32.mxu0 %vm9335_vm0, %v9336_v1 }
0x2a87   :  { %8963 = vmatprep.subr.bf16.mxu0 %v9334_v0 }
0x2a8a   :  { %8965 = vmatpush3.bf16.msra.mxu0 %v9635_v25 }
0x2a8b   :  { %8966 = vmatprep.subr.bf16.mxu0 %v9334_v0 }
0x2a8e   :  { %8968 = vmatpush3.bf16.msra.mxu0 %v9655_v34 }
0x2a8f   :  { %7786 = vmatprep.subr.mxu0 %v9336_v1 }
0x2a92   :  { %7787 = vmatpush3.msk.msra.mxu0 %vm313_vm1, %v10069_v41 }
0x2a93   :  { %8978 = vmatprep.subr.bf16.mxu0 %v9334_v0 }
0x2b58   :  { %v4056_v31 = vpop.f32.mrb[50].mxu0 }
0x2b59   :  { %v4057_v37 = vadd.f32 %v10077_v45, %v4056_v31  ;;  %v7756_v2 = vpop.f32.mrb[51].mxu0 }
0x2b5b   :  { %v4060_v3 = vmax.f32 %v4057_v37, 0.0 }
0x2b5d   :  { %7772 = vmatmul.mubr.msk.f32.vlgmr.msra.gmra.mrb[50].mxu1 %vm309_vm2, %v4060_v3 }
0x2b5e   :  { %8971 = vmatpush3.bf16.msra.mxu1 %v9667_v40  ;;  %7805 = vmatprep.mubr.msk.f32.mxu1 %vm9335_vm0, %v9336_v1 }
0x2b5f   :  { %8972 = vmatprep.subr.bf16.mxu1 %v9334_v0 }
0x2b62   :  { %8974 = vmatpush3.bf16.msra.mxu1 %v9670_v43 }
0x2b63   :  { %8975 = vmatprep.subr.bf16.mxu1 %v9334_v0 }
0x2b66   :  { %8977 = vmatpush3.bf16.msra.mxu1 %v9684_v54 }
0x2b67   :  { %7803 = vmatprep.subr.mxu1 %v9336_v1 }
0x2b6a   :  { %7804 = vmatpush3.msk.msra.mxu1 %vm313_vm1, %v10185_v19 }
0x2b6b   :  { %9002 = vmatprep.subr.bf16.mxu1 %v9334_v0 }
0x2c30   :  { %v4130_v41 = vpop.f32.mrb[50].mxu1 }
0x2c31   :  { %v4131_v45 = vadd.f32 %v10095_v59, %v4130_v41  ;;  %v7773_v6 = vpop.f32.mrb[51].mxu1  ;;  %v8985_v59 = vpack.c.bf16 %v4290_v13, %v4289_v63  ;;  %v10513_v41 = vld [vmem:[%s10801_s0] sm:$0xff]  ;;  %v10571_v13 = vld [vmem:[%s10809_s8 + $0x30] sm:$0x3] }
0x2c33   :  { %v4134_v56 = vmax.f32 %v4131_v45, 0.0 }
0x2c35   :  { %7789 = vmatmul.mubr.msk.f32.vlgmr.msra.gmra.mrb[52].mxu0 %vm309_vm2, %v4134_v56 }
0x2c36   :  { %7840 = vmatprep.mubr.msk.f32.mxu0 %vm9335_vm0, %v9336_v1  ;;  %8980 = vmatpush3.bf16.msra.mxu0 %v8979_v32  ;;  %v10556_v32 = vld [vmem:[%s10804_s3] ss:$0 sm:$0xff] }
0x2c37   :  { %8981 = vmatprep.subr.bf16.mxu0 %v9334_v0 }
0x2c3a   :  { %8983 = vmatpush3.bf16.msra.mxu0 %v8982_v60 }
0x2c3b   :  { %8984 = vmatprep.subr.bf16.mxu0 %v9334_v0 }
0x2c3e   :  { %8986 = vmatpush3.bf16.msra.mxu0 %v8985_v59 }
0x2c3f   :  { %8987 = vmatprep.subr.bf16.mxu0 %v9334_v0 }
0x2c42   :  { %8989 = vmatpush3.bf16.msra.mxu0 %v8988_v17 }
0x2c43   :  { %8990 = vmatprep.subr.bf16.mxu0 %v9334_v0 }
0x2c46   :  { %8992 = vmatpush3.bf16.msra.mxu0 %v8991_v27  ;;  %v10597_v27 = vld [vmem:[%s10808_s7] ss:$0 sm:$0xff] }
0x2c47   :  { %8993 = vmatprep.subr.bf16.mxu0 %v9334_v0 }
0x2c4a   :  { %8995 = vmatpush3.bf16.msra.mxu0 %v8994_v49 }
0x2c4b   :  { %8996 = vmatprep.subr.bf16.mxu0 %v9334_v0 }
0x2c4e   :  { %8998 = vmatpush3.bf16.msra.mxu0 %v8997_v29  ;;  %v4748_v29 = vld [vmem:[#allocation2 + $0x528] sm:$0xff] }
0x2c4f   :  { %8999 = vmatprep.subr.bf16.mxu0 %v9334_v0  ;;  %v9069_v10 = vpack.c.bf16 %v4748_v29, %v4747_v11 }
0x2c52   :  { %9001 = vmatpush3.bf16.msra.mxu0 %v9000_v53  ;;  %v4750_v53 = vld [vmem:[#allocation2 + $0x538] sm:$0xff] }
0x2c53   :  { %9026 = vmatprep.subr.bf16.mxu0 %v9334_v0 }
0x2d08   :  { %v4204_v38 = vpop.f32.mrb[52].mxu0 }
0x2d09   :  { %v4205_v28 = vadd.f32 %v10203_v46, %v4204_v38  ;;  %v7790_v39 = vpop.f32.mrb[53].mxu0  ;;  %v4743_v38 = vld [vmem:[#allocation2 + $0x500] sm:$0xff] }
0x2d0b   :  { %v4208_v48 = vmax.f32 %v4205_v28, 0.0  ;;  %v4744_v28 = vld [vmem:[#allocation2 + $0x508] sm:$0xff] }
0x2d0c   :  { %v9063_v39 = vpack.c.bf16 %v4744_v28, %v4743_v38 }
0x2d0d   :  { %7806 = vmatmul.mubr.msk.f32.vlgmr.msra.gmra.mrb[52].mxu1 %vm309_vm2, %v4208_v48  ;;  %v4746_v48 = vld [vmem:[#allocation2 + $0x518] sm:$0xff] }
0x2d0e   :  { %9004 = vmatpush3.bf16.msra.mxu1 %v9446_v15  ;;  %7875 = vmatprep.mubr.msk.f32.mxu1 %vm9335_vm0, %v9336_v1 }
0x2d0f   :  { %9005 = vmatprep.subr.bf16.mxu1 %v9334_v0 }
0x2d12   :  { %9007 = vmatpush3.bf16.msra.mxu1 %v9450_v18 }
0x2d13   :  { %9008 = vmatprep.subr.bf16.mxu1 %v9334_v0 }
0x2d16   :  { %9010 = vmatpush3.bf16.msra.mxu1 %v9461_v24 }
0x2d17   :  { %9011 = vmatprep.subr.bf16.mxu1 %v9334_v0 }
0x2d1a   :  { %9013 = vmatpush3.bf16.msra.mxu1 %v9472_v30 }
0x2d1b   :  { %9014 = vmatprep.subr.bf16.mxu1 %v9334_v0 }
0x2d1e   :  { %9016 = vmatpush3.bf16.msra.mxu1 %v9483_v36 }
0x2d1f   :  { %9017 = vmatprep.subr.bf16.mxu1 %v9334_v0 }
0x2d22   :  { %9019 = vmatpush3.bf16.msra.mxu1 %v9494_v42 }
0x2d23   :  { %9020 = vmatprep.subr.bf16.mxu1 %v9334_v0 }
0x2d26   :  { %9022 = vmatpush3.bf16.msra.mxu1 %v9510_v47 }
0x2d27   :  { %9023 = vmatprep.subr.bf16.mxu1 %v9334_v0 }
0x2d2a   :  { %9025 = vmatpush3.bf16.msra.mxu1 %v9523_v51 }
0x2d2b   :  { %9035 = vmatprep.subr.bf16.mxu1 %v9334_v0 }
0x2de0   :  { %v4278_v61 = vpop.f32.mrb[52].mxu1 }
0x2de1   :  { %v4279_v31 = vadd.f32 %v10230_v20, %v4278_v61  ;;  %v7807_v37 = vpop.f32.mrb[53].mxu1  ;;  %v9072_v61 = vpack.c.bf16 %v4750_v53, %v4749_v52 }
0x2de2   :  { %v4752_v37 = vld [vmem:[#allocation2 + $0x548] sm:$0xff] }
0x2de3   :  { %v4282_v2 = vsub.f32 %v10432_v26, %v4279_v31  ;;  %v4301_v45 = vadd.f32 %v10513_v41, %v4279_v31  ;;  %v4751_v31 = vld [vmem:[#allocation2 + $0x540] sm:$0xff] }
0x2de5   :  { %v10508_v3 = vsub.f32 %v10417_v44, %v4282_v2  ;;  %v10528_v44 = vld [vmem:[%s10805_s4 + $0x30] sm:$0x3]  ;;  %v9075_v2 = vpack.c.bf16 %v4752_v37, %v4751_v31 }
0x2de7   :  { %v4302_v6 = vadd.f32 %v4301_v45, %v10508_v3  ;;  %v4753_v45 = vld [vmem:[#allocation2 + $0x550] sm:$0xff] }
0x2de9   :  { %7841 = vmatmul.mubr.f32.vlgmr.msra.gmra.mrb[54].mxu0 %v4302_v6  ;;  %v4754_v6 = vld [vmem:[#allocation2 + $0x558] sm:$0xff] }
0x2dea   :  { %9028 = vmatpush3.bf16.msra.mxu0 %v9539_v55  ;;  %7892 = vmatprep.mubr.msk.f32.mxu0 %vm9335_vm0, %v9336_v1 }
0x2deb   :  { %9029 = vmatprep.subr.bf16.mxu0 %v9334_v0 }
0x2dee   :  { %9031 = vmatpush3.bf16.msra.mxu0 %v9545_v57 }
0x2def   :  { %9032 = vmatprep.subr.bf16.mxu0 %v9334_v0 }
0x2df2   :  { %9034 = vmatpush3.bf16.msra.mxu0 %v9561_v62 }
0x2df3   :  { %7890 = vmatprep.subr.mxu0 %v9336_v1 }
0x2df6   :  { %7891 = vmatpush3.msk.msra.mxu0 %vm313_vm1, %v10528_v44 }
0x2df7   :  { %9044 = vmatprep.subr.bf16.mxu0 %v9334_v0 }
0x2ebc   :  { %v10533_v26 = vpop.f32.mrb[54].mxu0 }
0x2ebd   :  { %v4373_v56 = vsub.f32 %v10533_v26, %v10508_v3  ;;  %v7842_v21 = vpop.f32.mrb[55].mxu0 }
0x2ebf   :  { %7876 = vmatmul.mubr.f32.vlgmr.msra.gmra.mrb[54].mxu1 %v4373_v56  ;;  %v9078_v56 = vpack.c.bf16 %v4754_v6, %v4753_v45  ;;  %v5201_v6 = vld [vmem:[#allocation2 + $0x580] sm:$0xff] }
0x2ec0   :  { %9037 = vmatpush3.bf16.msra.mxu1 %v9582_v5  ;;  %7909 = vmatprep.mubr.msk.f32.mxu1 %vm9335_vm0, %v9336_v1 }
0x2ec1   :  { %9038 = vmatprep.subr.bf16.mxu1 %v9334_v0 }
0x2ec4   :  { %9040 = vmatpush3.bf16.msra.mxu1 %v9588_v7 }
0x2ec5   :  { %9041 = vmatprep.subr.bf16.mxu1 %v9334_v0 }
0x2ec8   :  { %9043 = vmatpush3.bf16.msra.mxu1 %v9608_v16 }
0x2ec9   :  { %7907 = vmatprep.subr.mxu1 %v9336_v1 }
0x2ecc   :  { %7908 = vmatpush3.msk.msra.mxu1 %vm313_vm1, %v10548_v9 }
0x2ecd   :  { %9053 = vmatprep.subr.bf16.mxu1 %v9334_v0 }
0x2f92   :  { %v4440_v12 = vpop.f32.mrb[54].mxu1 }
0x2f93   :  { %v4441_v4 = vadd.f32 %v10556_v32, %v4440_v12  ;;  %v7877_v60 = vpop.f32.mrb[55].mxu1 }
0x2f95   :  { %v4444_v63 = vmax.f32 %v4441_v4, 0.0 }
0x2f97   :  { %7893 = vmatmul.mubr.msk.f32.vlgmr.msra.gmra.mrb[56].mxu0 %vm309_vm2, %v4444_v63  ;;  %v4756_v63 = vld [vmem:[#allocation2 + $0x568] sm:$0xff] }
0x2f98   :  { %9046 = vmatpush3.bf16.msra.mxu0 %v9629_v22  ;;  %7926 = vmatprep.mubr.msk.f32.mxu0 %vm9335_vm0, %v9336_v1 }
0x2f99   :  { %9047 = vmatprep.subr.bf16.mxu0 %v9334_v0 }
0x2f9c   :  { %9049 = vmatpush3.bf16.msra.mxu0 %v9635_v25 }
0x2f9d   :  { %9050 = vmatprep.subr.bf16.mxu0 %v9334_v0 }
0x2fa0   :  { %9052 = vmatpush3.bf16.msra.mxu0 %v9655_v34 }
0x2fa1   :  { %7924 = vmatprep.subr.mxu0 %v9336_v1 }
0x2fa4   :  { %7925 = vmatpush3.msk.msra.mxu0 %vm313_vm1, %v10571_v13 }
0x2fa5   :  { %9062 = vmatprep.subr.bf16.mxu0 %v9334_v0 }
0x306a   :  { %v4514_v59 = vpop.f32.mrb[56].mxu0 }
0x306b   :  { %v4515_v8 = vadd.f32 %v10579_v14, %v4514_v59  ;;  %v7894_v17 = vpop.f32.mrb[57].mxu0 }
0x306c   :  { %v4758_v17 = vld [vmem:[#allocation2 + $0x578] sm:$0xff] }
0x306d   :  { %v4518_v35 = vmax.f32 %v4515_v8, 0.0  ;;  %v4757_v8 = vld [vmem:[#allocation2 + $0x570] sm:$0xff] }
0x306f   :  { %7910 = vmatmul.mubr.msk.f32.vlgmr.msra.gmra.mrb[56].mxu1 %vm309_vm2, %v4518_v35  ;;  %v9084_v35 = vpack.c.bf16 %v4758_v17, %v4757_v8  ;;  %v5207_v8 = vld [vmem:[#allocation2 + $0x5b0] sm:$0xff]  ;;  %v5208_v17 = vld [vmem:[#allocation2 + $0x5b8] sm:$0xff] }
0x3070   :  { %9055 = vmatpush3.bf16.msra.mxu1 %v9667_v40  ;;  %7943 = vmatprep.mubr.msk.f32.mxu1 %vm9335_vm0, %v9336_v1 }
0x3071   :  { %9056 = vmatprep.subr.bf16.mxu1 %v9334_v0 }
0x3074   :  { %9058 = vmatpush3.bf16.msra.mxu1 %v9670_v43 }
0x3075   :  { %9059 = vmatprep.subr.bf16.mxu1 %v9334_v0 }
0x3078   :  { %9061 = vmatpush3.bf16.msra.mxu1 %v9684_v54 }
0x3079   :  { %7941 = vmatprep.subr.mxu1 %v9336_v1 }
0x307c   :  { %7942 = vmatpush3.msk.msra.mxu1 %vm313_vm1, %v10185_v19  ;;  %v4745_v19 = vld [vmem:[#allocation2 + $0x510] sm:$0xff] }
0x307d   :  { %9086 = vmatprep.subr.bf16.mxu1 %v9334_v0  ;;  %v9066_v50 = vpack.c.bf16 %v4746_v48, %v4745_v19 }
0x3142   :  { %v4588_v23 = vpop.f32.mrb[56].mxu1 }
0x3143   :  { %v4589_v33 = vadd.f32 %v10597_v27, %v4588_v23  ;;  %v7911_v58 = vpop.f32.mrb[57].mxu1 }
0x3145   :  { %v4592_v49 = vmax.f32 %v4589_v33, 0.0 }
0x3147   :  { %7927 = vmatmul.mubr.msk.f32.vlgmr.msra.gmra.mrb[58].mxu0 %vm309_vm2, %v4592_v49 }
0x3148   :  { %7978 = vmatprep.mubr.msk.f32.mxu0 %vm9335_vm0, %v9336_v1  ;;  %9064 = vmatpush3.bf16.msra.mxu0 %v9063_v39 }
0x3149   :  { %9065 = vmatprep.subr.bf16.mxu0 %v9334_v0 }
0x314c   :  { %9067 = vmatpush3.bf16.msra.mxu0 %v9066_v50 }
0x314d   :  { %9068 = vmatprep.subr.bf16.mxu0 %v9334_v0 }
0x3150   :  { %9070 = vmatpush3.bf16.msra.mxu0 %v9069_v10 }
0x3151   :  { %9071 = vmatprep.subr.bf16.mxu0 %v9334_v0 }
0x3154   :  { %9073 = vmatpush3.bf16.msra.mxu0 %v9072_v61  ;;  %v10687_v61 = vld [vmem:[#allocation5 + $0x30] sm:$0x3] }
0x3155   :  { %9074 = vmatprep.subr.bf16.mxu0 %v9334_v0 }
0x3158   :  { %9076 = vmatpush3.bf16.msra.mxu0 %v9075_v2 }
0x3159   :  { %9077 = vmatprep.subr.bf16.mxu0 %v9334_v0 }
0x315c   :  { %9079 = vmatpush3.bf16.msra.mxu0 %v9078_v56  ;;  %v5202_v56 = vld [vmem:[#allocation2 + $0x588] sm:$0xff] }
0x315d   :  { %9080 = vmatprep.subr.bf16.mxu0 %v9334_v0 }
0x321a   :  { %v4662_v21 = vpop.f32.mrb[58].mxu0 }
0x321b   :  { %v4663_v12 = vadd.f32 %v10203_v46, %v4662_v21  ;;  %v7928_v4 = vpop.f32.mrb[59].mxu0  ;;  %v4755_v46 = vld [vmem:[#allocation2 + $0x560] sm:$0xff]  ;;  %v5203_v21 = vld [vmem:[#allocation2 + $0x590] sm:$0xff] }
0x321c   :  { %v9081_v59 = vpack.c.bf16 %v4756_v63, %v4755_v46  ;;  %v5204_v4 = vld [vmem:[#allocation2 + $0x598] sm:$0xff]  ;;  %v5205_v46 = vld [vmem:[#allocation2 + $0x5a0] sm:$0xff]  ;;  %v5206_v63 = vld [vmem:[#allocation2 + $0x5a8] sm:$0xff] }
0x321d   :  { %v4666_v60 = vmax.f32 %v4663_v12, 0.0  ;;  %v9147_v12 = vpack.c.bf16 %v5202_v56, %v5201_v6 }
0x321e   :  { %9082 = vmatpush3.bf16.msra.mxu0 %v9081_v59  ;;  %v9153_v59 = vpack.c.bf16 %v5206_v63, %v5205_v46 }
0x321f   :  { %7944 = vmatmul.mubr.msk.f32.vlgmr.msra.gmra.mrb[58].mxu1 %vm309_vm2, %v4666_v60  ;;  %9083 = vmatprep.subr.bf16.mxu0 %v9334_v0  ;;  %v9150_v60 = vpack.c.bf16 %v5204_v4, %v5203_v21 }
0x3220   :  { %9088 = vmatpush3.bf16.msra.mxu1 %v9446_v15  ;;  %8013 = vmatprep.mubr.msk.f32.mxu1 %vm9335_vm0, %v9336_v1 }
0x3221   :  { %9089 = vmatprep.subr.bf16.mxu1 %v9334_v0 }
0x3222   :  { %9085 = vmatpush3.bf16.msra.mxu0 %v9084_v35  ;;  %v9156_v35 = vpack.c.bf16 %v5208_v17, %v5207_v8 }
0x3223   :  { %9110 = vmatprep.subr.bf16.mxu0 %v9334_v0 }
0x3224   :  { %9091 = vmatpush3.bf16.msra.mxu1 %v9450_v18 }
0x3225   :  { %9092 = vmatprep.subr.bf16.mxu1 %v9334_v0 }
0x3228   :  { %9094 = vmatpush3.bf16.msra.mxu1 %v9461_v24 }
0x3229   :  { %9095 = vmatprep.subr.bf16.mxu1 %v9334_v0 }
0x322c   :  { %9097 = vmatpush3.bf16.msra.mxu1 %v9472_v30 }
0x322d   :  { %9098 = vmatprep.subr.bf16.mxu1 %v9334_v0 }
0x3230   :  { %9100 = vmatpush3.bf16.msra.mxu1 %v9483_v36 }
0x3231   :  { %9101 = vmatprep.subr.bf16.mxu1 %v9334_v0 }
0x3234   :  { %9103 = vmatpush3.bf16.msra.mxu1 %v9494_v42 }
0x3235   :  { %9104 = vmatprep.subr.bf16.mxu1 %v9334_v0 }
0x3238   :  { %9106 = vmatpush3.bf16.msra.mxu1 %v9510_v47 }
0x3239   :  { %9107 = vmatprep.subr.bf16.mxu1 %v9334_v0 }
0x323c   :  { %9109 = vmatpush3.bf16.msra.mxu1 %v9523_v51 }
0x323d   :  { %9119 = vmatprep.subr.bf16.mxu1 %v9334_v0 }
0x32f2   :  { %v4736_v23 = vpop.f32.mrb[58].mxu1 }
0x32f3   :  { %v4737_v33 = vadd.f32 %v10230_v20, %v4736_v23  ;;  %v7945_v58 = vpop.f32.mrb[59].mxu1  ;;  %v5209_v23 = vld [vmem:[#allocation2 + $0x5c0] sm:$0xff] }
0x32f5   :  { %v4740_v49 = vsub.f32 %v10533_v26, %v4737_v33  ;;  %v4759_v28 = vadd.f32 %v10513_v41, %v4737_v33  ;;  %v5210_v33 = vld [vmem:[#allocation2 + $0x5c8] sm:$0xff] }
0x32f6   :  { %v9159_v58 = vpack.c.bf16 %v5210_v33, %v5209_v23 }
0x32f7   :  { %v10634_v38 = vsub.f32 %v10508_v3, %v4740_v49  ;;  %v5211_v49 = vld [vmem:[#allocation2 + $0x5d0] sm:$0xff] }
0x32f9   :  { %v4760_v19 = vadd.f32 %v4759_v28, %v10634_v38  ;;  %v5212_v28 = vld [vmem:[#allocation2 + $0x5d8] sm:$0xff] }
0x32fb   :  { %7979 = vmatmul.mubr.f32.vlgmr.msra.gmra.mrb[60].mxu0 %v4760_v19  ;;  %v9162_v19 = vpack.c.bf16 %v5212_v28, %v5211_v49 }
0x32fc   :  { %9112 = vmatpush3.bf16.msra.mxu0 %v9539_v55  ;;  %8030 = vmatprep.mubr.msk.f32.mxu0 %vm9335_vm0, %v9336_v1 }
0x32fd   :  { %9113 = vmatprep.subr.bf16.mxu0 %v9334_v0 }
0x3300   :  { %9115 = vmatpush3.bf16.msra.mxu0 %v9545_v57 }
0x3301   :  { %9116 = vmatprep.subr.bf16.mxu0 %v9334_v0 }
0x3304   :  { %9118 = vmatpush3.bf16.msra.mxu0 %v9561_v62 }
0x3305   :  { %8028 = vmatprep.subr.mxu0 %v9336_v1 }
0x3308   :  { %8029 = vmatpush3.msk.msra.mxu0 %vm313_vm1, %v10528_v44 }
0x3309   :  { %9128 = vmatprep.subr.bf16.mxu0 %v9334_v0 }
0x33ce   :  { %v10649_v20 = vpop.f32.mrb[60].mxu0 }
0x33cf   :  { %v4831_v3 = vsub.f32 %v10649_v20, %v10634_v38  ;;  %v7980_v26 = vpop.f32.mrb[61].mxu0 }
0x33d0   :  { %v10705_v26 = vld [vmem:[%s10810_s9] ss:$0 sm:$0xff] }
0x33d1   :  { %8014 = vmatmul.mubr.f32.vlgmr.msra.gmra.mrb[60].mxu1 %v4831_v3 }
0x33d2   :  { %9121 = vmatpush3.bf16.msra.mxu1 %v9582_v5  ;;  %8047 = vmatprep.mubr.msk.f32.mxu1 %vm9335_vm0, %v9336_v1 }
0x33d3   :  { %9122 = vmatprep.subr.bf16.mxu1 %v9334_v0 }
0x33d6   :  { %9124 = vmatpush3.bf16.msra.mxu1 %v9588_v7 }
0x33d7   :  { %9125 = vmatprep.subr.bf16.mxu1 %v9334_v0 }
0x33da   :  { %9127 = vmatpush3.bf16.msra.mxu1 %v9608_v16 }
0x33db   :  { %8045 = vmatprep.subr.mxu1 %v9336_v1 }
0x33de   :  { %8046 = vmatpush3.msk.msra.mxu1 %vm313_vm1, %v10548_v9 }
0x33df   :  { %9137 = vmatprep.subr.bf16.mxu1 %v9334_v0 }
0x34a4   :  { %v4898_v39 = vpop.f32.mrb[60].mxu1 }
0x34a5   :  { %v4899_v48 = vadd.f32 %v10556_v32, %v4898_v39  ;;  %v8015_v50 = vpop.f32.mrb[61].mxu1 }
0x34a7   :  { %v4902_v11 = vmax.f32 %v4899_v48, 0.0 }
0x34a9   :  { %8031 = vmatmul.mubr.msk.f32.vlgmr.msra.gmra.mrb[62].mxu0 %vm309_vm2, %v4902_v11 }
0x34aa   :  { %9130 = vmatpush3.bf16.msra.mxu0 %v9629_v22  ;;  %8064 = vmatprep.mubr.msk.f32.mxu0 %vm9335_vm0, %v9336_v1 }
0x34ab   :  { %9131 = vmatprep.subr.bf16.mxu0 %v9334_v0 }
0x34ae   :  { %9133 = vmatpush3.bf16.msra.mxu0 %v9635_v25 }
0x34af   :  { %9134 = vmatprep.subr.bf16.mxu0 %v9334_v0 }
0x34b2   :  { %9136 = vmatpush3.bf16.msra.mxu0 %v9655_v34 }
0x34b3   :  { %8062 = vmatprep.subr.mxu0 %v9336_v1 }
0x34b6   :  { %8063 = vmatpush3.msk.msra.mxu0 %vm313_vm1, %v10571_v13 }
0x34b7   :  { %9146 = vmatprep.subr.bf16.mxu0 %v9334_v0 }
0x357c   :  { %v4972_v29 = vpop.f32.mrb[62].mxu0 }
0x357d   :  { %v4973_v10 = vadd.f32 %v10579_v14, %v4972_v29  ;;  %v8032_v52 = vpop.f32.mrb[63].mxu0 }
0x357f   :  { %v4976_v53 = vmax.f32 %v4973_v10, 0.0 }
0x3581   :  { %8048 = vmatmul.mubr.msk.f32.vlgmr.msra.gmra.mrb[62].mxu1 %vm309_vm2, %v4976_v53 }
0x3582   :  { %9139 = vmatpush3.bf16.msra.mxu1 %v9667_v40  ;;  %8081 = vmatprep.mubr.msk.f32.mxu1 %vm9335_vm0, %v9336_v1 }
0x3583   :  { %9140 = vmatprep.subr.bf16.mxu1 %v9334_v0 }
0x3586   :  { %9142 = vmatpush3.bf16.msra.mxu1 %v9670_v43 }
0x3587   :  { %9143 = vmatprep.subr.bf16.mxu1 %v9334_v0 }
0x358a   :  { %9145 = vmatpush3.bf16.msra.mxu1 %v9684_v54 }
0x358b   :  { %8079 = vmatprep.subr.mxu1 %v9336_v1 }
0x358e   :  { %8080 = vmatpush3.msk.msra.mxu1 %vm313_vm1, %v10687_v61 }
0x358f   :  { %9170 = vmatprep.subr.bf16.mxu1 %v9334_v0 }
0x3654   :  { %v5046_v31 = vpop.f32.mrb[62].mxu1 }
0x3655   :  { %v5047_v37 = vadd.f32 %v10597_v27, %v5046_v31  ;;  %v8049_v2 = vpop.f32.mrb[63].mxu1 }
0x3657   :  { %v5050_v45 = vmax.f32 %v5047_v37, 0.0 }
0x3659   :  { %8065 = vmatmul.mubr.msk.f32.vlgmr.msra.gmra.mrb[64].mxu0 %vm309_vm2, %v5050_v45 }
0x365a   :  { %8116 = vmatprep.mubr.msk.f32.mxu0 %vm9335_vm0, %v9336_v1  ;;  %9148 = vmatpush3.bf16.msra.mxu0 %v9147_v12 }
0x365b   :  { %9149 = vmatprep.subr.bf16.mxu0 %v9334_v0 }
0x365e   :  { %9151 = vmatpush3.bf16.msra.mxu0 %v9150_v60 }
0x365f   :  { %9152 = vmatprep.subr.bf16.mxu0 %v9334_v0 }
0x3662   :  { %9154 = vmatpush3.bf16.msra.mxu0 %v9153_v59 }
0x3663   :  { %9155 = vmatprep.subr.bf16.mxu0 %v9334_v0 }
0x3666   :  { %9157 = vmatpush3.bf16.msra.mxu0 %v9156_v35 }
0x3667   :  { %9158 = vmatprep.subr.bf16.mxu0 %v9334_v0 }
0x366a   :  { %9160 = vmatpush3.bf16.msra.mxu0 %v9159_v58 }
0x366b   :  { %9161 = vmatprep.subr.bf16.mxu0 %v9334_v0 }
0x366e   :  { %9163 = vmatpush3.bf16.msra.mxu0 %v9162_v19 }
0x366f   :  { %9164 = vmatprep.subr.bf16.mxu0 %v9334_v0 }
0x372c   :  { %v5120_v3 = vpop.f32.mrb[64].mxu0 }
0x372d   :  { %v5121_v39 = vadd.f32 %v10705_v26, %v5120_v3  ;;  %v8066_v48 = vpop.f32.mrb[65].mxu0 }
0x372f   :  { %v5124_v50 = vmax.f32 %v5121_v39, 0.0 }
0x3731   :  { %8082 = vmatmul.mubr.msk.f32.vlgmr.msra.gmra.mrb[64].mxu1 %vm309_vm2, %v5124_v50 }
0x3732   :  { %9172 = vmatpush3.bf16.msra.mxu1 %v9446_v15  ;;  %8151 = vmatprep.mubr.msk.f32.mxu1 %vm9335_vm0, %v9336_v1  ;;  %v5213_v15 = vld [vmem:[#allocation2 + $0x5e0] sm:$0xff] }
0x3733   :  { %9173 = vmatprep.subr.bf16.mxu1 %v9334_v0 }
0x3736   :  { %9175 = vmatpush3.bf16.msra.mxu1 %v9450_v18  ;;  %v5214_v18 = vld [vmem:[#allocation2 + $0x5e8] sm:$0xff] }
0x3737   :  { %9176 = vmatprep.subr.bf16.mxu1 %v9334_v0 }
0x373a   :  { %9178 = vmatpush3.bf16.msra.mxu1 %v9461_v24  ;;  %v9165_v24 = vpack.c.bf16 %v5214_v18, %v5213_v15 }
0x373b   :  { %9179 = vmatprep.subr.bf16.mxu1 %v9334_v0 }
0x373c   :  { %9166 = vmatpush3.bf16.msra.mxu0 %v9165_v24 }
0x373d   :  { %9167 = vmatprep.subr.bf16.mxu0 %v9334_v0 }
0x373e   :  { %9181 = vmatpush3.bf16.msra.mxu1 %v9472_v30  ;;  %v5215_v30 = vld [vmem:[#allocation2 + $0x5f0] sm:$0xff] }
0x373f   :  { %9182 = vmatprep.subr.bf16.mxu1 %v9334_v0 }
0x3742   :  { %9184 = vmatpush3.bf16.msra.mxu1 %v9483_v36  ;;  %v5216_v36 = vld [vmem:[#allocation2 + $0x5f8] sm:$0xff] }
0x3743   :  { %9185 = vmatprep.subr.bf16.mxu1 %v9334_v0  ;;  %v9168_v11 = vpack.c.bf16 %v5216_v36, %v5215_v30 }
0x3745   :  { %9169 = vmatpush3.bf16.msra.mxu0 %v9168_v11 }
0x3746   :  { %9187 = vmatpush3.bf16.msra.mxu1 %v9494_v42  ;;  %9194 = vmatprep.subr.bf16.mxu0 %v9334_v0 }
0x3747   :  { %9188 = vmatprep.subr.bf16.mxu1 %v9334_v0 }
0x374a   :  { %9190 = vmatpush3.bf16.msra.mxu1 %v9510_v47  ;;  %v10732_v47 = vld [vmem:[%s10812_s11] ss:$0 sm:$0xff]  ;;  %s9337_s11 = smov [#allocation7]  }
0x374b   :  { %9191 = vmatprep.subr.bf16.mxu1 %v9334_v0  ;;  %s5663_s19 = sshll.u32 %s9337_s11, 4  ;;  %s5664_s19 = int_to_ptr.vmem [resolvable:$true] %s5663_s19 }
0x374c   :  { %s9302_s20 = scalar_lea.vmem %s5664_s19, 128  ;;  %p9307_p3 = scmp.lt.s32.totalorder %s5664_s19, %s5664_s19 }
0x374d   :  { %p9303_p2 = scmp.ne.s32.totalorder %s5664_s19, %s9302_s20  ;;  %p9308_p4 = scmp.lt.s32.totalorder %s9302_s20, %s9302_s20 }
0x374e   :  { %9193 = vmatpush3.bf16.msra.mxu1 %v9523_v51 }
0x374f   :  { %9203 = vmatprep.subr.bf16.mxu1 %v9334_v0  ;;  %p9309_p5 = por %p9308_p4, %p9307_p3 }
0x3751   :  { %p9310_p6 = pnand %p9309_p5, %p9303_p2 }
0x3804   :  { %v5194_v42 = vpop.f32.mrb[64].mxu1 }
0x3805   :  { %v5195_v51 = vadd.f32 %v10732_v47, %v5194_v42  ;;  %v8083_v29 = vpop.f32.mrb[65].mxu1 }
0x3807   :  { %v5198_v10 = vsub.f32 %v10649_v20, %v5195_v51  ;;  %v5217_v53 = vadd.f32 %v10513_v41, %v5195_v51 }
0x3809   :  { %v5199_v52 = vsub.f32 %v10634_v38, %v5198_v10 }
0x380b   :  { %v5218_v31 = vadd.f32 %v5217_v53, %v5199_v52 }
0x380d   :  { %8117 = vmatmul.mubr.f32.vlgmr.msra.gmra.mrb[66].mxu0 %v5218_v31 }
0x380e   :  { %9196 = vmatpush3.bf16.msra.mxu0 %v9539_v55  ;;  %8168 = vmatprep.mubr.msk.f32.mxu0 %vm9335_vm0, %v9336_v1 }
0x380f   :  { %9197 = vmatprep.subr.bf16.mxu0 %v9334_v0 }
0x3812   :  { %9199 = vmatpush3.bf16.msra.mxu0 %v9545_v57 }
0x3813   :  { %9200 = vmatprep.subr.bf16.mxu0 %v9334_v0 }
0x3816   :  { %9202 = vmatpush3.bf16.msra.mxu0 %v9561_v62 }
0x3817   :  { %8166 = vmatprep.subr.mxu0 %v9336_v1 }
0x381a   :  { %8167 = vmatpush3.msk.msra.mxu0 %vm313_vm1, %v10528_v44 }
0x381b   :  { %9212 = vmatprep.subr.bf16.mxu0 %v9334_v0 }
0x38e0   :  { %v5285_v41 = vpop.f32.mrb[66].mxu0 }
0x38e1   :  { %v5289_v55 = vsub.f32 %v5285_v41, %v5199_v52  ;;  %v8118_v38 = vpop.f32.mrb[67].mxu0 }
0x38e3   :  { %8152 = vmatmul.mubr.f32.vlgmr.msra.gmra.mrb[66].mxu1 %v5289_v55 }
0x38e4   :  { %9205 = vmatpush3.bf16.msra.mxu1 %v9582_v5  ;;  %8185 = vmatprep.mubr.msk.f32.mxu1 %vm9335_vm0, %v9336_v1 }
0x38e5   :  { %9206 = vmatprep.subr.bf16.mxu1 %v9334_v0 }
0x38e8   :  { %9208 = vmatpush3.bf16.msra.mxu1 %v9588_v7 }
0x38e9   :  { %9209 = vmatprep.subr.bf16.mxu1 %v9334_v0 }
0x38ec   :  { %9211 = vmatpush3.bf16.msra.mxu1 %v9608_v16 }
0x38ed   :  { %8183 = vmatprep.subr.mxu1 %v9336_v1 }
0x38f0   :  { %8184 = vmatpush3.msk.msra.mxu1 %vm313_vm1, %v10548_v9 }
0x38f1   :  { %9221 = vmatprep.subr.bf16.mxu1 %v9334_v0 }
0x39b6   :  { %v5356_v57 = vpop.f32.mrb[66].mxu1 }
0x39b7   :  { %v5357_v62 = vadd.f32 %v10556_v32, %v5356_v57  ;;  %v8153_v5 = vpop.f32.mrb[67].mxu1 }
0x39b9   :  { %v5360_v44 = vmax.f32 %v5357_v62, 0.0 }
0x39bb   :  { %8169 = vmatmul.mubr.msk.f32.vlgmr.msra.gmra.mrb[68].mxu0 %vm309_vm2, %v5360_v44 }
0x39bc   :  { %9214 = vmatpush3.bf16.msra.mxu0 %v9629_v22  ;;  %8202 = vmatprep.mubr.msk.f32.mxu0 %vm9335_vm0, %v9336_v1 }
0x39bd   :  { %9215 = vmatprep.subr.bf16.mxu0 %v9334_v0 }
0x39c0   :  { %9217 = vmatpush3.bf16.msra.mxu0 %v9635_v25 }
0x39c1   :  { %9218 = vmatprep.subr.bf16.mxu0 %v9334_v0 }
0x39c4   :  { %9220 = vmatpush3.bf16.msra.mxu0 %v9655_v34 }
0x39c5   :  { %8200 = vmatprep.subr.mxu0 %v9336_v1 }
0x39c8   :  { %8201 = vmatpush3.msk.msra.mxu0 %vm313_vm1, %v10571_v13 }
0x3a8e   :  { %v5430_v7 = vpop.f32.mrb[68].mxu0 }
0x3a8f   :  { %v5431_v16 = vadd.f32 %v10579_v14, %v5430_v7  ;;  %v8170_v22 = vpop.f32.mrb[69].mxu0 }
0x3a91   :  { %v5434_v9 = vmax.f32 %v5431_v16, 0.0 }
0x3a93   :  { %8186 = vmatmul.mubr.msk.f32.vlgmr.msra.gmra.mrb[68].mxu1 %vm309_vm2, %v5434_v9 }
0x3a94   :  { %9223 = vmatpush3.bf16.msra.mxu1 %v9667_v40  ;;  %8219 = vmatprep.mubr.msk.f32.mxu1 %vm9335_vm0, %v9336_v1 }
0x3a95   :  { %9224 = vmatprep.subr.bf16.mxu1 %v9334_v0 }
0x3a98   :  { %9226 = vmatpush3.bf16.msra.mxu1 %v9670_v43 }
0x3a99   :  { %9227 = vmatprep.subr.bf16.mxu1 %v9334_v0 }
0x3a9c   :  { %9229 = vmatpush3.bf16.msra.mxu1 %v9684_v54 }
0x3a9d   :  { %8217 = vmatprep.subr.mxu1 %v9336_v1 }
0x3aa0   :  { %8218 = vmatpush3.msk.msra.mxu1 %vm313_vm1, %v10687_v61 }
0x3b66   :  { %v5504_v25 = vpop.f32.mrb[68].mxu1 }
0x3b67   :  { %v5505_v34 = vadd.f32 %v10597_v27, %v5504_v25  ;;  %v8187_v40 = vpop.f32.mrb[69].mxu1 }
0x3b69   :  { %v5508_v32 = vmax.f32 %v5505_v34, 0.0 }
0x3b6b   :  { %8203 = vmatmul.mubr.msk.f32.vlgmr.msra.gmra.mrb[70].mxu0 %vm309_vm2, %v5508_v32 }
0x3c3e   :  { %v5578_v13 = vpop.f32.mrb[70].mxu0 }
0x3c3f   :  { %v5579_v14 = vadd.f32 %v10705_v26, %v5578_v13  ;;  %v8204_v43 = vpop.f32.mrb[71].mxu0 }
0x3c41   :  { %v5582_v20 = vmax.f32 %v5579_v14, 0.0 }
0x3c43   :  { %8220 = vmatmul.mubr.msk.f32.vlgmr.msra.gmra.mrb[70].mxu1 %vm309_vm2, %v5582_v20 }
0x3d16   :  { %v5652_v0 = vpop.f32.mrb[70].mxu1 }
0x3d17   :  { %v5653_v1 = vadd.f32 %v10732_v47, %v5652_v0  ;;  %v8221_v54 = vpop.f32.mrb[71].mxu1 }
0x3d19   :  { %5656 = vst [vmem:[#allocation7] sm:$0xff] %v5653_v1 }
0x3d1a   :  { %9313 = shalt.err (!%p9310_p6)
}
0x3d1b   :  { %s9314_s24 = scalar_lea.hbm %s10813_s12, 128 }
0x3d1c   :  { %p9315_p7 = scmp.ne.s32.totalorder %s10813_s12, %s9314_s24  ;;  %p9318_p8 = scmp.lt.u32.totalorder %s9314_s24, %s10813_s12 }
0x3d1e   :  { %p9320_p9 = pnand %p9318_p8, %p9315_p7 }
0x3d20   :  { %9323 = shalt.err (!%p9320_p9)
}
0x3d21   :  { %5666 = dma.vmem_to_hbm [thread:$0]  %s5664_s19, 128, %s10813_s12, [#allocation4]  }
0x3d22   :  { %9328 = dma.done.wait [#allocation4], 128  }
0x3d23   :  { %9329 = vsyncadd [#allocation4], 4294967168 }
0x3d24   :  { %5670 = vsyncpa [#allocation3], 1 }
0x3d25   :  { %5671 = vsyncpa [#allocation6], 1 }
0x3d26   :  { %5672 = vsyncpa [#allocation4], 1 }

</bundles_post_ra>
